<compile_context>
chip_gen: v5e
topology: v5e:2x2
jax: 0.10.0
libtpu: 0.0.40
codegen_flags: <defaults>
</compile_context>

<pallas_src>
import math

import jax
import jax.numpy as jnp
from jax import lax
from jax.experimental import pallas as pl
from jax.experimental.pallas import tpu as pltpu

# ----------------------------- small config -----------------------------------
B = 2                         # batch
IMG = 32                      # config.image_size
PATCH = 8                     # swin-stub patch size
GRID_P = IMG // PATCH         # 4
V_TOK = GRID_P * GRID_P       # 16 visual tokens
PATCH_FEAT = 3 * PATCH * PATCH  # 192
SWIN_H = 48                   # swin hidden size (stub)
D = 32                        # config.feature_dim
T_OTSL = 8                    # config.otsl_max_length
TOTAL = 16                    # config.total_sequence_length
N_LAYOUT = TOTAL - T_OTSL     # layout_prompt_length = 8
L_DEC = N_LAYOUT + T_OTSL     # decoder sequence length = 16
VOCAB = 16                    # OTSL tokenizer vocab (stub)
PAD_ID, BOS_ID, EOS_ID = 0, 1, 2
TEMP = 0.1                    # layout pointer temperature
N_DEC_LAYERS = 4              # BartConfig(decoder_layers=4)
EPS_LN = 1e-5

# Packed lane-dense output slab (one unmasked (16,128) store per batch element).
SLAB_R, SLAB_C = 16, 128
TAG_C0 = 0                          # tag_logits      rows [0:T_OTSL)     cols [0:VOCAB)
PTR_C0 = TAG_C0 + VOCAB             # pointer(+empty) rows [0:N_LAYOUT+1) cols [+T_OTSL)
ROW_C0 = PTR_C0 + T_OTSL            # row_sim         rows [0:N_LAYOUT)   cols [+N_LAYOUT)
COL_C0 = ROW_C0 + N_LAYOUT          # col_sim         rows [0:N_LAYOUT)   cols [+N_LAYOUT)
assert COL_C0 + N_LAYOUT <= SLAB_C and max(T_OTSL, N_LAYOUT + 1) <= SLAB_R


# ----------------------------- static weight-slab layouts ----------------------
def _make_col_layout(entries):
    off, c = {}, 0
    for name, width in entries:
        off[name] = (c, width)
        c += width
    return off, c


def _make_row_layout(entries):
    off, r = {}, 0
    for name, rows, cols in entries:
        off[name] = (r, rows, cols)
        r += rows
    return off, r


# W_D: every (D, *) matmul weight, column-packed (stored bf16).
_WD_ENTRIES = [("le_wc", D)]
for _l in range(N_DEC_LAYERS):
    _WD_ENTRIES += [(f"wqkv{_l}", 3 * D), (f"wo{_l}", D), (f"cq{_l}", D),
                    (f"ckv{_l}", 2 * D), (f"co{_l}", D), (f"f1{_l}", 4 * D)]
_WD_ENTRIES += [("tag_head", VOCAB + D),    # [lm_head (tied tok_emb^T) | ptr tag proj]
                ("box_head", D + 4 * D)]    # [ptr box proj | row/col span first Linear]
WD_OFF, WD_COLS = _make_col_layout(_WD_ENTRIES)

# W_UP: 64/128-row matmul weights, row-packed (stored bf16).
_WUP_ENTRIES = [("vp_w2", 2 * D, D), ("r_w2", 2 * D, D), ("c_w2", 2 * D, D)] + \
               [(f"f2{_l}", 4 * D, D) for _l in range(N_DEC_LAYERS)]
WUP_OFF, WUP_ROWS = _make_row_layout(_WUP_ENTRIES)

# ROWS: every bias / LN param / embedding table as rows of one (R, 128) f32 slab.
ROWS_C = 128
_ROWS_ENTRIES = [
    ("patch_b", 1, SWIN_H),
    ("vp_b1", 1, 2 * D), ("vp_b2", 1, D), ("vp_g", 1, D), ("vp_beta", 1, D),
    ("le_wb", 4, D), ("le_bb", 1, D),
    ("layout_pos", N_LAYOUT, D), ("prompt_g", 1, D), ("prompt_b", 1, D),
    ("tok_emb", VOCAB, D),
    ("dec_pos", L_DEC, D), ("emb_g", 1, D), ("emb_b", 1, D),
]
for _l in range(N_DEC_LAYERS):
    _ROWS_ENTRIES += [(f"ln{_l}", 6, D), (f"fb1_{_l}", 1, 4 * D), (f"fb2_{_l}", 1, D)]
_ROWS_ENTRIES += [
    ("ptr_bb", 1, D), ("ptr_bt", 1, D), ("ptr_empty", 1, D),
    ("rc_b1", 1, 4 * D),
    ("r_b2", 1, D), ("r_g", 1, D), ("r_b", 1, D),
    ("c_b2", 1, D), ("c_g", 1, D), ("c_b", 1, D),
]
ROWS_OFF, ROWS_R = _make_row_layout(_ROWS_ENTRIES)


# ----------------------------- in-kernel helpers -------------------------------
def _layernorm(x, g, b):
    mu = jnp.mean(x, axis=-1, keepdims=True)
    xc = x - mu
    var = jnp.mean(xc * xc, axis=-1, keepdims=True)
    return xc * lax.rsqrt(var + EPS_LN) * g + b


def _l2norm(x):                          # F.normalize(p=2, dim=-1), rsqrt form
    ss = jnp.sum(x * x, axis=-1, keepdims=True)
    return x * lax.rsqrt(jnp.maximum(ss, 1e-24))


def _gelu(x):
    # TODO(synk): reference uses exact (erf) GELU; tanh approximation used here
    # for robust Mosaic lowering (EUP tanh).
    return jax.nn.gelu(x, approximate=True)


def _softmax(s):
    m = jnp.max(s, axis=-1, keepdims=True)
    e = jnp.exp(s - m)
    return e * pl.reciprocal(jnp.sum(e, axis=-1, keepdims=True), approx=True)


def _mm(a, b):                           # a @ b, bf16 MXU, f32 accumulate
    return lax.dot_general(a.astype(jnp.bfloat16), b.astype(jnp.bfloat16),
                           (((1,), (0,)), ((), ())),
                           preferred_element_type=jnp.float32)


def _mmT(a, b):                          # a @ b.T without materializing transpose
    return lax.dot_general(a.astype(jnp.bfloat16), b.astype(jnp.bfloat16),
                           (((1,), (1,)), ((), ())),
                           preferred_element_type=jnp.float32)


# ----------------------------- fused Pallas kernel ------------------------------
def tflop_fused_kernel(tok_ids_ref,                 # SMEM (B, T_OTSL) int32  (scalar prefetch)
                       patches_ref, bbox_ref,       # (1,V_TOK,192) f32, (1,N_LAYOUT,4) f32
                       w_patch, w_vp1, w_d, w_up, rows_ref,
                       o_ref):                      # (1, SLAB_R, SLAB_C) f32
    b = pl.program_id(0)

    def rget(name):                                 # bias / LN / embedding rows (f32)
        r0, r, c = ROWS_OFF[name]
        return rows_ref[r0:r0 + r, 0:c]

    def dget(name):                                 # (D, w) weight slice (bf16)
        c0, c = WD_OFF[name]
        return w_d[:, c0:c0 + c]

    def uget(name):                                 # (rows, D) weight slice (bf16)
        r0, r, _ = WUP_OFF[name]
        return w_up[r0:r0 + r, :]

    # --- Swin patch-embed stub + visual_proj + F.normalize ---
    # TODO(synk): pretrained Swinv2 backbone cannot be loaded; single patch-embed
    # matmul stands in for it.
    swin = _mm(patches_ref[0], w_patch[...]) + rget("patch_b")        # (V_TOK, SWIN_H)
    h = _gelu(_mm(swin, w_vp1[...]) + rget("vp_b1"))
    vis = _mm(h, uget("vp_w2")) + rget("vp_b2")
    vis = _l2norm(_layernorm(vis, rget("vp_g"), rget("vp_beta")))     # (V_TOK, D)

    # --- LayoutEncoder stub: K=4 bbox projection on the VPU + global visual ctx ---
    # TODO(synk): LayoutEncoder class is not defined in the reference file.
    bbox = bbox_ref[0]                                                # (N_LAYOUT, 4)
    le_wb = rget("le_wb")                                             # (4, D)
    layout_emb = rget("le_bb") + _mm(jnp.mean(vis, axis=0, keepdims=True), dget("le_wc"))
    for k_ in range(4):                                               # 4 broadcast FMAs
        layout_emb = layout_emb + bbox[:, k_:k_ + 1] * le_wb[k_:k_ + 1, :]

    # --- prepare_layout_prompt: + pos embed, LayerNorm ---
    layout_prompt = _layernorm(layout_emb + rget("layout_pos"),
                               rget("prompt_g"), rget("prompt_b"))    # (N_LAYOUT, D)

    # --- in-kernel shift_tokens_right + token-embedding gather (one-hot matmul) ---
    id_tiles = [jnp.full((1, 1), BOS_ID, jnp.int32)]
    for t in range(1, T_OTSL):
        id_tiles.append(jnp.full((1, 1), tok_ids_ref[b, t - 1], jnp.int32))
    ids_col = jnp.concatenate(id_tiles, axis=0)                       # (T_OTSL, 1)
    ids_row = jnp.concatenate(id_tiles, axis=1)                       # (1, T_OTSL)

    onehot = (lax.broadcasted_iota(jnp.int32, (T_OTSL, VOCAB), 1) == ids_col)
    token_embeds = _mm(onehot.astype(jnp.float32), rget("tok_emb"))   # (T_OTSL, D)

    # --- decoder input embeddings (+ learned positions, embedding LN) ---
    x = jnp.concatenate([layout_prompt, token_embeds], axis=0)        # (L_DEC, D)
    x = _layernorm(x + rget("dec_pos"), rget("emb_g"), rget("emb_b"))

    # --- additive causal + key-padding mask, built ONCE, reused by all 4 layers ---
    ri = lax.broadcasted_iota(jnp.int32, (L_DEC, L_DEC), 0)
    ci = lax.broadcasted_iota(jnp.int32, (L_DEC, L_DEC), 1)
    causal_add = jnp.where(ri >= ci, 0.0, -1e9).astype(jnp.float32)
    key_add = jnp.concatenate(
        [jnp.zeros((1, N_LAYOUT), jnp.float32),
         jnp.where(ids_row != PAD_ID, 0.0, -1e9).astype(jnp.float32)], axis=1)
    add_mask = causal_add + key_add                                   # (L_DEC, L_DEC)

    # --- 4 BART-style decoder layers (post-LN) ---
    # TODO(synk): real BartForCausalLM is pretrained with 16 heads, qkv biases and
    # dropout; this is a deterministic single-head, bias-free stand-in.
    for l in range(N_DEC_LAYERS):
        ln = rget(f"ln{l}")                                           # (6, D) g1,b1,g2,b2,g3,b3
        qkv = _mm(x, dget(f"wqkv{l}"))                                # Q pre-scaled by 1/sqrt(D)
        q, k, v = qkv[:, 0:D], qkv[:, D:2 * D], qkv[:, 2 * D:3 * D]
        s = _mmT(q, k) + add_mask
        sa = _mm(_mm(_softmax(s), v), dget(f"wo{l}"))
        h1 = _layernorm(x + sa, ln[0:1, :], ln[1:2, :])

        kv = _mm(vis, dget(f"ckv{l}"))                                # (V_TOK, 2D)
        cs = _mmT(_mm(h1, dget(f"cq{l}")), kv[:, 0:D])                # cq pre-scaled; encoder mask = 1s
        ca = _mm(_mm(_softmax(cs), kv[:, D:2 * D]), dget(f"co{l}"))
        h2 = _layernorm(h1 + ca, ln[2:3, :], ln[3:4, :])

        ff = _gelu(_mm(h2, dget(f"f1{l}")) + rget(f"fb1_{l}"))
        ff = _mm(ff, uget(f"f2{l}")) + rget(f"fb2_{l}")
        x = _layernorm(h2 + ff, ln[4:5, :], ln[5:6, :])

    bbox_emb = x[0:N_LAYOUT, :]                                       # (N_LAYOUT, D)
    tag_emb = x[N_LAYOUT:L_DEC, :]                                    # (T_OTSL, D)

    # --- fused lm_head | pointer tag projection (one (D, VOCAB+D) matmul) ---
    tag_cat = _mm(tag_emb, dget("tag_head"))
    tag_logits = tag_cat[:, 0:VOCAB]
    tag_proj = tag_cat[:, VOCAB:VOCAB + D] + rget("ptr_bt")

    # --- fused pointer box projection | row/col span first Linear (one (D,5D) matmul) ---
    # TODO(synk): LayoutPointer class is not defined in the reference file.
    box_cat = _mm(bbox_emb, dget("box_head"))
    box_proj = box_cat[:, 0:D] + rget("ptr_bb")
    rc_h = _gelu(box_cat[:, D:5 * D] + rget("rc_b1"))

    rows_aug = jnp.concatenate([box_proj, rget("ptr_empty")], axis=0)  # (N_LAYOUT+1, D)
    ptr_all = _mmT(rows_aug, tag_proj) * (1.0 / TEMP)                  # (N_LAYOUT+1, T_OTSL)

    # --- get_sim_matrix: span MLP -> LN -> L2 -> masked Gram matrices ---
    rp = _l2norm(_layernorm(_mm(rc_h[:, 0:2 * D], uget("r_w2")) + rget("r_b2"),
                            rget("r_g"), rget("r_b")))
    cp = _l2norm(_layernorm(_mm(rc_h[:, 2 * D:4 * D], uget("c_w2")) + rget("c_b2"),
                            rget("c_g"), rget("c_b")))
    m = (jnp.sum(bbox, axis=-1, keepdims=True) != 0.0).astype(jnp.float32)   # (N_LAYOUT,1)
    not_eye = (lax.broadcasted_iota(jnp.int32, (N_LAYOUT, N_LAYOUT), 0) !=
               lax.broadcasted_iota(jnp.int32, (N_LAYOUT, N_LAYOUT), 1)).astype(jnp.float32)
    rpm, cpm = rp * m, cp * m            # padded-box rows/cols zeroed before the Gram matmul
    row_sim = _mmT(rpm, rpm) * not_eye
    col_sim = _mmT(cpm, cpm) * not_eye

    # --- assemble lane-dense slab in registers, one unmasked (16,128) store ---
    f32 = jnp.float32
    col_tag = jnp.concatenate([tag_logits, jnp.zeros((SLAB_R - T_OTSL, VOCAB), f32)], axis=0)
    col_ptr = jnp.concatenate([ptr_all, jnp.zeros((SLAB_R - (N_LAYOUT + 1), T_OTSL), f32)], axis=0)
    col_row = jnp.concatenate([row_sim, jnp.zeros((SLAB_R - N_LAYOUT, N_LAYOUT), f32)], axis=0)
    col_col = jnp.concatenate([col_sim, jnp.zeros((SLAB_R - N_LAYOUT, N_LAYOUT), f32)], axis=0)
    pad = jnp.zeros((SLAB_R, SLAB_C - (VOCAB + T_OTSL + 2 * N_LAYOUT)), f32)
    o_ref[0] = jnp.concatenate([col_tag, col_ptr, col_row, col_col, pad], axis=1)


# ----------------------------- pallas_call wrapper -------------------------------
def tflop_fused(token_ids, patches, bboxes, params):
    Bn = patches.shape[0]
    w_patch, w_vp1 = params["w_patch"], params["w_vp1"]
    w_d, w_up, rows = params["w_d"], params["w_up"], params["rows"]

    def bspec(tail):
        nd = len(tail)
        return pl.BlockSpec((1,) + tuple(tail), lambda b, ids, _nd=nd: (b,) + (0,) * _nd)

    def wspec(shape):
        nd = len(shape)
        return pl.BlockSpec(tuple(shape), lambda b, ids, _nd=nd: (0,) * _nd)

    grid_spec = pltpu.PrefetchScalarGridSpec(
        num_scalar_prefetch=1,                      # token_ids -> SMEM
        grid=(Bn,),
        in_specs=[bspec(patches.shape[1:]), bspec(bboxes.shape[1:]),
                  wspec(w_patch.shape), wspec(w_vp1.shape), wspec(w_d.shape),
                  wspec(w_up.shape), wspec(rows.shape)],
        out_specs=bspec((SLAB_R, SLAB_C)),
    )
    return pl.pallas_call(
        tflop_fused_kernel,
        out_shape=jax.ShapeDtypeStruct((Bn, SLAB_R, SLAB_C), jnp.float32),
        grid_spec=grid_spec,
        compiler_params=pltpu.CompilerParams(
            dimension_semantics=("parallel",),      # 2 batch elems -> 2 TCs on v7x
            vmem_limit_bytes=4 * 1024 * 1024,       # actual footprint < 1 MiB
        ),
    )(token_ids, patches, bboxes, w_patch, w_vp1, w_d, w_up, rows)


# ----------------------------- parameters (packed slabs) -------------------------
def init_params(key):
    keys = iter(jax.random.split(key, 128))

    def w(shape, scale=0.02):
        return (scale * jax.random.normal(next(keys), shape)).astype(jnp.float32)

    zeros = lambda s: jnp.zeros(s, jnp.float32)
    ones = lambda s: jnp.ones(s, jnp.float32)
    scale = 1.0 / math.sqrt(D)

    # --- raw parameters ---
    patch_w = w((PATCH_FEAT, SWIN_H))
    vp_w1 = w((SWIN_H, 2 * D))

    up = {"vp_w2": w((2 * D, D)), "r_w2": w((2 * D, D)), "c_w2": w((2 * D, D))}
    for l in range(N_DEC_LAYERS):
        up[f"f2{l}"] = w((4 * D, D))

    tok_emb = w((VOCAB, D))                          # tied with lm_head
    ptr_wt, ptr_wb, rc_w1 = w((D, D)), w((D, D)), w((D, 4 * D))

    wd = {"le_wc": w((D, D))}
    for l in range(N_DEC_LAYERS):
        wqkv = w((D, 3 * D))
        wd[f"wqkv{l}"] = wqkv.at[:, :D].multiply(scale)   # fold 1/sqrt(D) into Q
        wd[f"wo{l}"] = w((D, D))
        wd[f"cq{l}"] = w((D, D)) * scale                  # fold 1/sqrt(D) into cross-attn Q
        wd[f"ckv{l}"] = w((D, 2 * D))
        wd[f"co{l}"] = w((D, D))
        wd[f"f1{l}"] = w((D, 4 * D))
    wd["tag_head"] = jnp.concatenate([tok_emb.T, ptr_wt], axis=1)
    wd["box_head"] = jnp.concatenate([ptr_wb, rc_w1], axis=1)

    rows = {
        "patch_b": zeros((1, SWIN_H)),
        "vp_b1": zeros((1, 2 * D)), "vp_b2": zeros((1, D)),
        "vp_g": ones((1, D)), "vp_beta": zeros((1, D)),
        "le_wb": w((4, D)), "le_bb": zeros((1, D)),
        "layout_pos": w((N_LAYOUT, D)), "prompt_g": ones((1, D)), "prompt_b": zeros((1, D)),
        "tok_emb": tok_emb,
        "dec_pos": w((L_DEC, D)), "emb_g": ones((1, D)), "emb_b": zeros((1, D)),
        "ptr_bb": zeros((1, D)), "ptr_bt": zeros((1, D)), "ptr_empty": w((1, D)),
        "rc_b1": zeros((1, 4 * D)),
        "r_b2": zeros((1, D)), "r_g": ones((1, D)), "r_b": zeros((1, D)),
        "c_b2": zeros((1, D)), "c_g": ones((1, D)), "c_b": zeros((1, D)),
    }
    for l in range(N_DEC_LAYERS):
        rows[f"ln{l}"] = jnp.stack([jnp.ones(D), jnp.zeros(D)] * 3).astype(jnp.float32)
        rows[f"fb1_{l}"] = zeros((1, 4 * D))
        rows[f"fb2_{l}"] = zeros((1, D))

    # --- pack into slabs ---
    w_d = jnp.concatenate([wd[name] for name, _ in _WD_ENTRIES], axis=1).astype(jnp.bfloat16)
    w_up = jnp.concatenate([up[name] for name, _, _ in _WUP_ENTRIES], axis=0).astype(jnp.bfloat16)
    rows_slab = jnp.concatenate(
        [jnp.pad(rows[name], ((0, 0), (0, ROWS_C - c))) for name, r, c in _ROWS_ENTRIES], axis=0)

    assert w_d.shape == (D, WD_COLS)
    assert w_up.shape == (WUP_ROWS, D)
    assert rows_slab.shape == (ROWS_R, ROWS_C)
    return {
        "w_patch": patch_w.astype(jnp.bfloat16),
        "w_vp1": vp_w1.astype(jnp.bfloat16),
        "w_d": w_d,
        "w_up": w_up,
        "rows": rows_slab,
    }


# ----------------------------- forward (training path) --------------------------
@jax.jit
def tflop_forward(params, images, bboxes, token_ids):
    Bn = images.shape[0]

    # Patch extraction (pure data movement); the 192->48 matmul runs in-kernel.
    patches = images.reshape(Bn, 3, GRID_P, PATCH, GRID_P, PATCH)
    patches = patches.transpose(0, 2, 4, 1, 3, 5).reshape(Bn, V_TOK, PATCH_FEAT)

    # Single fused Pallas kernel for the whole model body.
    slab = tflop_fused(token_ids.astype(jnp.int32), patches, bboxes, params)

    tag_logits = slab[:, 0:T_OTSL, TAG_C0:TAG_C0 + VOCAB]
    ptr_all = slab[:, 0:N_LAYOUT + 1, PTR_C0:PTR_C0 + T_OTSL]

    # TODO(synk): get_coef_matrix requires OTSL/HTML string parsing by the
    # tokenizer; it has no tensor/Pallas equivalent, so the coef outputs stay None.
    return dict(tag_logits=tag_logits,
                pointer_logits=ptr_all[:, :N_LAYOUT, :],
                empty_pointer_logits=ptr_all[:, N_LAYOUT:, :],
                row_sim_matrix=slab[:, 0:N_LAYOUT, ROW_C0:ROW_C0 + N_LAYOUT],
                col_sim_matrix=slab[:, 0:N_LAYOUT, COL_C0:COL_C0 + N_LAYOUT],
                row_span_coef=None,
                col_span_coef=None)


# ----------------------------- main ---------------------------------------------
if __name__ == "__main__":
    root = jax.random.PRNGKey(0)
    k_param, k_img, k_box, k_tok = jax.random.split(root, 4)

    params = init_params(k_param)

    images = jax.random.normal(k_img, (B, 3, IMG, IMG), jnp.float32)          # NCHW
    bboxes = jax.random.uniform(k_box, (B, N_LAYOUT, 4), jnp.float32)
    bboxes = bboxes.at[1, -2:, :].set(0.0)            # some padded boxes (mask path)
    token_ids = jax.random.randint(k_tok, (B, T_OTSL), 3, VOCAB, jnp.int32)
    token_ids = token_ids.at[0, -2:].set(PAD_ID)      # some padded tokens (mask path)

    out = tflop_forward(params, images, bboxes, token_ids)
    out = jax.block_until_ready(out)

    assert out["tag_logits"].shape == (B, T_OTSL, VOCAB)
    assert out["pointer_logits"].shape == (B, N_LAYOUT, T_OTSL)
    assert out["empty_pointer_logits"].shape == (B, 1, T_OTSL)
    assert out["row_sim_matrix"].shape == (B, N_LAYOUT, N_LAYOUT)
    assert out["col_sim_matrix"].shape == (B, N_LAYOUT, N_LAYOUT)
    assert bool(jnp.all(jnp.isfinite(out["tag_logits"])))
    assert bool(jnp.all(jnp.isfinite(out["row_sim_matrix"])))
    print("KERNEL_OK")
</pallas_src>

<mosaic_0001>
module attributes {stable_mosaic.version = 11 : i64} {
  func.func @tflop_fused_kernel(%arg0: i32, %arg1: memref<2x8xi32, #tpu.memory_space<smem>>, %arg2: memref<1x16x192xf32, #tpu.memory_space<vmem>>, %arg3: memref<1x8x4xf32, #tpu.memory_space<vmem>>, %arg4: memref<192x48xbf16, #tpu.memory_space<vmem>>, %arg5: memref<48x64xbf16, #tpu.memory_space<vmem>>, %arg6: memref<32x1776xbf16, #tpu.memory_space<vmem>>, %arg7: memref<704x32xbf16, #tpu.memory_space<vmem>>, %arg8: memref<96x128xf32, #tpu.memory_space<vmem>>, %arg9: memref<1x16x128xf32, #tpu.memory_space<vmem>>) attributes {dimension_semantics = [#tpu.dimension_semantics<parallel>], iteration_bounds = array<i64: 2>, scalar_prefetch = 1 : i64, scratch_operands = 0 : i64, tpu.core_type = #tpu.core_type<tc>, window_params = [{transform_indices = @transform_0, window_bounds = array<i64: 1, 16, 192>}, {transform_indices = @transform_1, window_bounds = array<i64: 1, 8, 4>}, {pipeline_mode = #tpu.pipeline_mode<synchronous>, transform_indices = @transform_2, window_bounds = array<i64: 192, 48>}, {pipeline_mode = #tpu.pipeline_mode<synchronous>, transform_indices = @transform_3, window_bounds = array<i64: 48, 64>}, {pipeline_mode = #tpu.pipeline_mode<synchronous>, transform_indices = @transform_4, window_bounds = array<i64: 32, 1776>}, {pipeline_mode = #tpu.pipeline_mode<synchronous>, transform_indices = @transform_5, window_bounds = array<i64: 704, 32>}, {pipeline_mode = #tpu.pipeline_mode<synchronous>, transform_indices = @transform_6, window_bounds = array<i64: 96, 128>}, {transform_indices = @transform_7, window_bounds = array<i64: 1, 16, 128>}]} {
    %c0 = arith.constant 0 : index
    %c0_0 = arith.constant 0 : index
    %c0_1 = arith.constant 0 : index
    %0 = vector.load %arg2[%c0, %c0_0, %c0_1] : memref<1x16x192xf32, #tpu.memory_space<vmem>>, vector<1x16x192xf32>
    %1 = vector.shape_cast %0 : vector<1x16x192xf32> to vector<16x192xf32>
    %c0_2 = arith.constant 0 : index
    %c0_3 = arith.constant 0 : index
    %2 = vector.load %arg4[%c0_2, %c0_3] : memref<192x48xbf16, #tpu.memory_space<vmem>>, vector<192x48xbf16>
    %3 = arith.truncf %1 : vector<16x192xf32> to vector<16x192xbf16>
    %cst = arith.constant dense<0.000000e+00> : vector<16x48xf32>
    %4 = tpu.matmul %3, %2, %cst {dimension_numbers = #tpu.dot_dimension_numbers<[1], [0], [0], [1], [0, 0, 1, 1], [], []>} : vector<16x192xbf16>, vector<192x48xbf16>, vector<16x48xf32> -> vector<16x48xf32>
    %c0_4 = arith.constant 0 : index
    %c0_5 = arith.constant 0 : index
    %5 = vector.load %arg8[%c0_4, %c0_5] : memref<96x128xf32, #tpu.memory_space<vmem>>, vector<1x48xf32>
    %6 = vector.broadcast %5 : vector<1x48xf32> to vector<16x48xf32>
    %7 = arith.addf %4, %6 : vector<16x48xf32>
    %c0_6 = arith.constant 0 : index
    %c0_7 = arith.constant 0 : index
    %8 = vector.load %arg5[%c0_6, %c0_7] : memref<48x64xbf16, #tpu.memory_space<vmem>>, vector<48x64xbf16>
    %9 = arith.truncf %7 : vector<16x48xf32> to vector<16x48xbf16>
    %cst_8 = arith.constant dense<0.000000e+00> : vector<16x64xf32>
    %10 = tpu.matmul %9, %8, %cst_8 {dimension_numbers = #tpu.dot_dimension_numbers<[1], [0], [0], [1], [0, 0, 1, 1], [], []>} : vector<16x48xbf16>, vector<48x64xbf16>, vector<16x64xf32> -> vector<16x64xf32>
    %c1 = arith.constant 1 : index
    %c0_9 = arith.constant 0 : index
    %11 = vector.load %arg8[%c1, %c0_9] : memref<96x128xf32, #tpu.memory_space<vmem>>, vector<1x64xf32>
    %12 = vector.broadcast %11 : vector<1x64xf32> to vector<16x64xf32>
    %13 = arith.addf %10, %12 : vector<16x64xf32>
    %14 = arith.mulf %13, %13 : vector<16x64xf32>
    %15 = arith.mulf %13, %14 : vector<16x64xf32>
    %cst_10 = arith.constant 4.471500e-02 : f32
    %16 = vector.broadcast %cst_10 : f32 to vector<16x64xf32>
    %17 = arith.mulf %16, %15 : vector<16x64xf32>
    %18 = arith.addf %13, %17 : vector<16x64xf32>
    %cst_11 = arith.constant 0.797884583 : f32
    %19 = vector.broadcast %cst_11 : f32 to vector<16x64xf32>
    %20 = arith.mulf %19, %18 : vector<16x64xf32>
    %21 = math.tanh %20 : vector<16x64xf32>
    %cst_12 = arith.constant 1.000000e+00 : f32
    %22 = vector.broadcast %cst_12 : f32 to vector<16x64xf32>
    %23 = arith.addf %22, %21 : vector<16x64xf32>
    %cst_13 = arith.constant 5.000000e-01 : f32
    %24 = vector.broadcast %cst_13 : f32 to vector<16x64xf32>
    %25 = arith.mulf %24, %23 : vector<16x64xf32>
    %26 = arith.mulf %13, %25 : vector<16x64xf32>
    %c0_14 = arith.constant 0 : index
    %c0_15 = arith.constant 0 : index
    %27 = vector.load %arg7[%c0_14, %c0_15] : memref<704x32xbf16, #tpu.memory_space<vmem>>, vector<64x32xbf16>
    %28 = arith.truncf %26 : vector<16x64xf32> to vector<16x64xbf16>
    %cst_16 = arith.constant dense<0.000000e+00> : vector<16x32xf32>
    %29 = tpu.matmul %28, %27, %cst_16 {dimension_numbers = #tpu.dot_dimension_numbers<[1], [0], [0], [1], [0, 0, 1, 1], [], []>} : vector<16x64xbf16>, vector<64x32xbf16>, vector<16x32xf32> -> vector<16x32xf32>
    %c2 = arith.constant 2 : index
    %c0_17 = arith.constant 0 : index
    %30 = vector.load %arg8[%c2, %c0_17] : memref<96x128xf32, #tpu.memory_space<vmem>>, vector<1x32xf32>
    %31 = vector.broadcast %30 : vector<1x32xf32> to vector<16x32xf32>
    %32 = arith.addf %29, %31 : vector<16x32xf32>
    %c3 = arith.constant 3 : index
    %c0_18 = arith.constant 0 : index
    %33 = vector.load %arg8[%c3, %c0_18] : memref<96x128xf32, #tpu.memory_space<vmem>>, vector<1x32xf32>
    %c4 = arith.constant 4 : index
    %c0_19 = arith.constant 0 : index
    %34 = vector.load %arg8[%c4, %c0_19] : memref<96x128xf32, #tpu.memory_space<vmem>>, vector<1x32xf32>
    %cst_20 = arith.constant dense<0.000000e+00> : vector<16xf32>
    %35 = vector.multi_reduction <add>, %32, %cst_20 [1] : vector<16x32xf32> to vector<16xf32>
    %36 = vector.shape_cast %35 : vector<16xf32> to vector<16x1xf32>
    %cst_21 = arith.constant 3.200000e+01 : f32
    %37 = vector.broadcast %cst_21 : f32 to vector<16x1xf32>
    %38 = arith.divf %36, %37 : vector<16x1xf32>
    %39 = vector.broadcast %38 : vector<16x1xf32> to vector<16x32xf32>
    %40 = arith.subf %32, %39 : vector<16x32xf32>
    %41 = arith.mulf %40, %40 : vector<16x32xf32>
    %cst_22 = arith.constant dense<0.000000e+00> : vector<16xf32>
    %42 = vector.multi_reduction <add>, %41, %cst_22 [1] : vector<16x32xf32> to vector<16xf32>
    %43 = vector.shape_cast %42 : vector<16xf32> to vector<16x1xf32>
    %cst_23 = arith.constant 3.200000e+01 : f32
    %44 = vector.broadcast %cst_23 : f32 to vector<16x1xf32>
    %45 = arith.divf %43, %44 : vector<16x1xf32>
    %cst_24 = arith.constant 9.99999974E-6 : f32
    %46 = vector.broadcast %cst_24 : f32 to vector<16x1xf32>
    %47 = arith.addf %45, %46 : vector<16x1xf32>
    %48 = math.rsqrt %47 : vector<16x1xf32>
    %49 = vector.broadcast %48 : vector<16x1xf32> to vector<16x32xf32>
    %50 = arith.mulf %40, %49 : vector<16x32xf32>
    %51 = vector.broadcast %33 : vector<1x32xf32> to vector<16x32xf32>
    %52 = arith.mulf %50, %51 : vector<16x32xf32>
    %53 = vector.broadcast %34 : vector<1x32xf32> to vector<16x32xf32>
    %54 = arith.addf %52, %53 : vector<16x32xf32>
    %55 = arith.mulf %54, %54 : vector<16x32xf32>
    %cst_25 = arith.constant dense<0.000000e+00> : vector<16xf32>
    %56 = vector.multi_reduction <add>, %55, %cst_25 [1] : vector<16x32xf32> to vector<16xf32>
    %57 = vector.shape_cast %56 : vector<16xf32> to vector<16x1xf32>
    %cst_26 = arith.constant 1.000000e-24 : f32
    %58 = vector.broadcast %cst_26 : f32 to vector<16x1xf32>
    %59 = arith.maximumf %57, %58 : vector<16x1xf32>
    %60 = math.rsqrt %59 : vector<16x1xf32>
    %61 = vector.broadcast %60 : vector<16x1xf32> to vector<16x32xf32>
    %62 = arith.mulf %54, %61 : vector<16x32xf32>
    %c0_27 = arith.constant 0 : index
    %c0_28 = arith.constant 0 : index
    %c0_29 = arith.constant 0 : index
    %63 = vector.load %arg3[%c0_27, %c0_28, %c0_29] : memref<1x8x4xf32, #tpu.memory_space<vmem>>, vector<1x8x4xf32>
    %64 = vector.shape_cast %63 : vector<1x8x4xf32> to vector<8x4xf32>
    %c5 = arith.constant 5 : index
    %c0_30 = arith.constant 0 : index
    %65 = vector.load %arg8[%c5, %c0_30] : memref<96x128xf32, #tpu.memory_space<vmem>>, vector<4x32xf32>
    %c9 = arith.constant 9 : index
    %c0_31 = arith.constant 0 : index
    %66 = vector.load %arg8[%c9, %c0_31] : memref<96x128xf32, #tpu.memory_space<vmem>>, vector<1x32xf32>
    %cst_32 = arith.constant dense<0.000000e+00> : vector<32xf32>
    %67 = vector.multi_reduction <add>, %62, %cst_32 [0] : vector<16x32xf32> to vector<32xf32>
    %68 = vector.shape_cast %67 : vector<32xf32> to vector<1x32xf32>
    %cst_33 = arith.constant 1.600000e+01 : f32
    %69 = vector.broadcast %cst_33 : f32 to vector<1x32xf32>
    %70 = arith.divf %68, %69 : vector<1x32xf32>
    %c0_34 = arith.constant 0 : index
    %c0_35 = arith.constant 0 : index
    %71 = vector.load %arg6[%c0_34, %c0_35] : memref<32x1776xbf16, #tpu.memory_space<vmem>>, vector<32x32xbf16>
    %72 = arith.truncf %70 : vector<1x32xf32> to vector<1x32xbf16>
    %cst_36 = arith.constant dense<0.000000e+00> : vector<1x32xf32>
    %73 = tpu.matmul %72, %71, %cst_36 {dimension_numbers = #tpu.dot_dimension_numbers<[1], [0], [0], [1], [0, 0, 1, 1], [], []>} : vector<1x32xbf16>, vector<32x32xbf16>, vector<1x32xf32> -> vector<1x32xf32>
    %74 = arith.addf %66, %73 : vector<1x32xf32>
    %75 = vector.extract_strided_slice %64 {offsets = [0, 0], sizes = [8, 1], strides = [1, 1]} : vector<8x4xf32> to vector<8x1xf32>
    %76 = vector.extract_strided_slice %65 {offsets = [0, 0], sizes = [1, 32], strides = [1, 1]} : vector<4x32xf32> to vector<1x32xf32>
    %77 = vector.broadcast %75 : vector<8x1xf32> to vector<8x32xf32>
    %78 = vector.broadcast %76 : vector<1x32xf32> to vector<8x32xf32>
    %79 = arith.mulf %77, %78 : vector<8x32xf32>
    %80 = vector.broadcast %74 : vector<1x32xf32> to vector<8x32xf32>
    %81 = arith.addf %80, %79 : vector<8x32xf32>
    %82 = vector.extract_strided_slice %64 {offsets = [0, 1], sizes = [8, 1], strides = [1, 1]} : vector<8x4xf32> to vector<8x1xf32>
    %83 = vector.extract_strided_slice %65 {offsets = [1, 0], sizes = [1, 32], strides = [1, 1]} : vector<4x32xf32> to vector<1x32xf32>
    %84 = vector.broadcast %82 : vector<8x1xf32> to vector<8x32xf32>
    %85 = vector.broadcast %83 : vector<1x32xf32> to vector<8x32xf32>
    %86 = arith.mulf %84, %85 : vector<8x32xf32>
    %87 = arith.addf %81, %86 : vector<8x32xf32>
    %88 = vector.extract_strided_slice %64 {offsets = [0, 2], sizes = [8, 1], strides = [1, 1]} : vector<8x4xf32> to vector<8x1xf32>
    %89 = vector.extract_strided_slice %65 {offsets = [2, 0], sizes = [1, 32], strides = [1, 1]} : vector<4x32xf32> to vector<1x32xf32>
    %90 = vector.broadcast %88 : vector<8x1xf32> to vector<8x32xf32>
    %91 = vector.broadcast %89 : vector<1x32xf32> to vector<8x32xf32>
    %92 = arith.mulf %90, %91 : vector<8x32xf32>
    %93 = arith.addf %87, %92 : vector<8x32xf32>
    %94 = vector.extract_strided_slice %64 {offsets = [0, 3], sizes = [8, 1], strides = [1, 1]} : vector<8x4xf32> to vector<8x1xf32>
    %95 = vector.extract_strided_slice %65 {offsets = [3, 0], sizes = [1, 32], strides = [1, 1]} : vector<4x32xf32> to vector<1x32xf32>
    %96 = vector.broadcast %94 : vector<8x1xf32> to vector<8x32xf32>
    %97 = vector.broadcast %95 : vector<1x32xf32> to vector<8x32xf32>
    %98 = arith.mulf %96, %97 : vector<8x32xf32>
    %99 = arith.addf %93, %98 : vector<8x32xf32>
    %c10 = arith.constant 10 : index
    %c0_37 = arith.constant 0 : index
    %100 = vector.load %arg8[%c10, %c0_37] : memref<96x128xf32, #tpu.memory_space<vmem>>, vector<8x32xf32>
    %101 = arith.addf %99, %100 : vector<8x32xf32>
    %c18 = arith.constant 18 : index
    %c0_38 = arith.constant 0 : index
    %102 = vector.load %arg8[%c18, %c0_38] : memref<96x128xf32, #tpu.memory_space<vmem>>, vector<1x32xf32>
    %c19 = arith.constant 19 : index
    %c0_39 = arith.constant 0 : index
    %103 = vector.load %arg8[%c19, %c0_39] : memref<96x128xf32, #tpu.memory_space<vmem>>, vector<1x32xf32>
    %cst_40 = arith.constant dense<0.000000e+00> : vector<8xf32>
    %104 = vector.multi_reduction <add>, %101, %cst_40 [1] : vector<8x32xf32> to vector<8xf32>
    %105 = vector.shape_cast %104 : vector<8xf32> to vector<8x1xf32>
    %cst_41 = arith.constant 3.200000e+01 : f32
    %106 = vector.broadcast %cst_41 : f32 to vector<8x1xf32>
    %107 = arith.divf %105, %106 : vector<8x1xf32>
    %108 = vector.broadcast %107 : vector<8x1xf32> to vector<8x32xf32>
    %109 = arith.subf %101, %108 : vector<8x32xf32>
    %110 = arith.mulf %109, %109 : vector<8x32xf32>
    %cst_42 = arith.constant dense<0.000000e+00> : vector<8xf32>
    %111 = vector.multi_reduction <add>, %110, %cst_42 [1] : vector<8x32xf32> to vector<8xf32>
    %112 = vector.shape_cast %111 : vector<8xf32> to vector<8x1xf32>
    %cst_43 = arith.constant 3.200000e+01 : f32
    %113 = vector.broadcast %cst_43 : f32 to vector<8x1xf32>
    %114 = arith.divf %112, %113 : vector<8x1xf32>
    %cst_44 = arith.constant 9.99999974E-6 : f32
    %115 = vector.broadcast %cst_44 : f32 to vector<8x1xf32>
    %116 = arith.addf %114, %115 : vector<8x1xf32>
    %117 = math.rsqrt %116 : vector<8x1xf32>
    %118 = vector.broadcast %117 : vector<8x1xf32> to vector<8x32xf32>
    %119 = arith.mulf %109, %118 : vector<8x32xf32>
    %120 = vector.broadcast %102 : vector<1x32xf32> to vector<8x32xf32>
    %121 = arith.mulf %119, %120 : vector<8x32xf32>
    %122 = vector.broadcast %103 : vector<1x32xf32> to vector<8x32xf32>
    %123 = arith.addf %121, %122 : vector<8x32xf32>
    %c1_i32 = arith.constant 1 : i32
    %124 = vector.broadcast %c1_i32 : i32 to vector<1x1xi32>
    %125 = arith.index_cast %arg0 : i32 to index
    %c0_45 = arith.constant 0 : index
    %126 = memref.load %arg1[%125, %c0_45] : memref<2x8xi32, #tpu.memory_space<smem>>
    %127 = vector.broadcast %126 : i32 to vector<1x1xi32>
    %128 = arith.index_cast %arg0 : i32 to index
    %c1_46 = arith.constant 1 : index
    %129 = memref.load %arg1[%128, %c1_46] : memref<2x8xi32, #tpu.memory_space<smem>>
    %130 = vector.broadcast %129 : i32 to vector<1x1xi32>
    %131 = arith.index_cast %arg0 : i32 to index
    %c2_47 = arith.constant 2 : index
    %132 = memref.load %arg1[%131, %c2_47] : memref<2x8xi32, #tpu.memory_space<smem>>
    %133 = vector.broadcast %132 : i32 to vector<1x1xi32>
    %134 = arith.index_cast %arg0 : i32 to index
    %c3_48 = arith.constant 3 : index
    %135 = memref.load %arg1[%134, %c3_48] : memref<2x8xi32, #tpu.memory_space<smem>>
    %136 = vector.broadcast %135 : i32 to vector<1x1xi32>
    %137 = arith.index_cast %arg0 : i32 to index
    %c4_49 = arith.constant 4 : index
    %138 = memref.load %arg1[%137, %c4_49] : memref<2x8xi32, #tpu.memory_space<smem>>
    %139 = vector.broadcast %138 : i32 to vector<1x1xi32>
    %140 = arith.index_cast %arg0 : i32 to index
    %c5_50 = arith.constant 5 : index
    %141 = memref.load %arg1[%140, %c5_50] : memref<2x8xi32, #tpu.memory_space<smem>>
    %142 = vector.broadcast %141 : i32 to vector<1x1xi32>
    %143 = arith.index_cast %arg0 : i32 to index
    %c6 = arith.constant 6 : index
    %144 = memref.load %arg1[%143, %c6] : memref<2x8xi32, #tpu.memory_space<smem>>
    %145 = vector.broadcast %144 : i32 to vector<1x1xi32>
    %146 = tpu.concatenate %124, %127, %130, %133, %136, %139, %142, %145 in 0 : vector<1x1xi32>, vector<1x1xi32>, vector<1x1xi32>, vector<1x1xi32>, vector<1x1xi32>, vector<1x1xi32>, vector<1x1xi32>, vector<1x1xi32> -> vector<8x1xi32>
    %147 = tpu.concatenate %124, %127, %130, %133, %136, %139, %142, %145 in 1 : vector<1x1xi32>, vector<1x1xi32>, vector<1x1xi32>, vector<1x1xi32>, vector<1x1xi32>, vector<1x1xi32>, vector<1x1xi32>, vector<1x1xi32> -> vector<1x8xi32>
    %148 = tpu.iota {dimensions = array<i32: 1>} : vector<8x16xi32>
    %149 = vector.broadcast %146 : vector<8x1xi32> to vector<8x16xi32>
    %150 = arith.cmpi eq, %148, %149 : vector<8x16xi32>
    %151 = arith.extui %150 : vector<8x16xi1> to vector<8x16xi32>
    %152 = arith.sitofp %151 : vector<8x16xi32> to vector<8x16xf32>
    %c20 = arith.constant 20 : index
    %c0_51 = arith.constant 0 : index
    %153 = vector.load %arg8[%c20, %c0_51] : memref<96x128xf32, #tpu.memory_space<vmem>>, vector<16x32xf32>
    %154 = arith.truncf %152 : vector<8x16xf32> to vector<8x16xbf16>
    %155 = arith.truncf %153 : vector<16x32xf32> to vector<16x32xbf16>
    %cst_52 = arith.constant dense<0.000000e+00> : vector<8x32xf32>
    %156 = tpu.matmul %154, %155, %cst_52 {dimension_numbers = #tpu.dot_dimension_numbers<[1], [0], [0], [1], [0, 0, 1, 1], [], []>} : vector<8x16xbf16>, vector<16x32xbf16>, vector<8x32xf32> -> vector<8x32xf32>
    %157 = tpu.concatenate %123, %156 in 0 : vector<8x32xf32>, vector<8x32xf32> -> vector<16x32xf32>
    %c36 = arith.constant 36 : index
    %c0_53 = arith.constant 0 : index
    %158 = vector.load %arg8[%c36, %c0_53] : memref<96x128xf32, #tpu.memory_space<vmem>>, vector<16x32xf32>
    %159 = arith.addf %157, %158 : vector<16x32xf32>
    %c52 = arith.constant 52 : index
    %c0_54 = arith.constant 0 : index
    %160 = vector.load %arg8[%c52, %c0_54] : memref<96x128xf32, #tpu.memory_space<vmem>>, vector<1x32xf32>
    %c53 = arith.constant 53 : index
    %c0_55 = arith.constant 0 : index
    %161 = vector.load %arg8[%c53, %c0_55] : memref<96x128xf32, #tpu.memory_space<vmem>>, vector<1x32xf32>
    %cst_56 = arith.constant dense<0.000000e+00> : vector<16xf32>
    %162 = vector.multi_reduction <add>, %159, %cst_56 [1] : vector<16x32xf32> to vector<16xf32>
    %163 = vector.shape_cast %162 : vector<16xf32> to vector<16x1xf32>
    %cst_57 = arith.constant 3.200000e+01 : f32
    %164 = vector.broadcast %cst_57 : f32 to vector<16x1xf32>
    %165 = arith.divf %163, %164 : vector<16x1xf32>
    %166 = vector.broadcast %165 : vector<16x1xf32> to vector<16x32xf32>
    %167 = arith.subf %159, %166 : vector<16x32xf32>
    %168 = arith.mulf %167, %167 : vector<16x32xf32>
    %cst_58 = arith.constant dense<0.000000e+00> : vector<16xf32>
    %169 = vector.multi_reduction <add>, %168, %cst_58 [1] : vector<16x32xf32> to vector<16xf32>
    %170 = vector.shape_cast %169 : vector<16xf32> to vector<16x1xf32>
    %cst_59 = arith.constant 3.200000e+01 : f32
    %171 = vector.broadcast %cst_59 : f32 to vector<16x1xf32>
    %172 = arith.divf %170, %171 : vector<16x1xf32>
    %cst_60 = arith.constant 9.99999974E-6 : f32
    %173 = vector.broadcast %cst_60 : f32 to vector<16x1xf32>
    %174 = arith.addf %172, %173 : vector<16x1xf32>
    %175 = math.rsqrt %174 : vector<16x1xf32>
    %176 = vector.broadcast %175 : vector<16x1xf32> to vector<16x32xf32>
    %177 = arith.mulf %167, %176 : vector<16x32xf32>
    %178 = vector.broadcast %160 : vector<1x32xf32> to vector<16x32xf32>
    %179 = arith.mulf %177, %178 : vector<16x32xf32>
    %180 = vector.broadcast %161 : vector<1x32xf32> to vector<16x32xf32>
    %181 = arith.addf %179, %180 : vector<16x32xf32>
    %182 = tpu.iota {dimensions = array<i32: 0>} : vector<16x16xi32>
    %183 = tpu.iota {dimensions = array<i32: 1>} : vector<16x16xi32>
    %184 = arith.cmpi sge, %182, %183 : vector<16x16xi32>
    %cst_61 = arith.constant 0.000000e+00 : f32
    %cst_62 = arith.constant -1.000000e+09 : f32
    %185 = vector.broadcast %cst_61 : f32 to vector<16x16xf32>
    %186 = vector.broadcast %cst_62 : f32 to vector<16x16xf32>
    %187 = arith.select %184, %185, %186 : vector<16x16xi1>, vector<16x16xf32>
    %cst_63 = arith.constant 0.000000e+00 : f32
    %188 = vector.broadcast %cst_63 : f32 to vector<1x8xf32>
    %c0_i32 = arith.constant 0 : i32
    %189 = vector.broadcast %c0_i32 : i32 to vector<1x8xi32>
    %190 = arith.cmpi ne, %147, %189 : vector<1x8xi32>
    %cst_64 = arith.constant 0.000000e+00 : f32
    %cst_65 = arith.constant -1.000000e+09 : f32
    %191 = vector.broadcast %cst_64 : f32 to vector<1x8xf32>
    %192 = vector.broadcast %cst_65 : f32 to vector<1x8xf32>
    %193 = arith.select %190, %191, %192 : vector<1x8xi1>, vector<1x8xf32>
    %194 = tpu.concatenate %188, %193 in 1 : vector<1x8xf32>, vector<1x8xf32> -> vector<1x16xf32>
    %195 = vector.broadcast %194 : vector<1x16xf32> to vector<16x16xf32>
    %196 = arith.addf %187, %195 : vector<16x16xf32>
    %c54 = arith.constant 54 : index
    %c0_66 = arith.constant 0 : index
    %197 = vector.load %arg8[%c54, %c0_66] : memref<96x128xf32, #tpu.memory_space<vmem>>, vector<6x32xf32>
    %c0_67 = arith.constant 0 : index
    %c32 = arith.constant 32 : index
    %198 = vector.load %arg6[%c0_67, %c32] : memref<32x1776xbf16, #tpu.memory_space<vmem>>, vector<32x96xbf16>
    %199 = arith.truncf %181 : vector<16x32xf32> to vector<16x32xbf16>
    %cst_68 = arith.constant dense<0.000000e+00> : vector<16x96xf32>
    %200 = tpu.matmul %199, %198, %cst_68 {dimension_numbers = #tpu.dot_dimension_numbers<[1], [0], [0], [1], [0, 0, 1, 1], [], []>} : vector<16x32xbf16>, vector<32x96xbf16>, vector<16x96xf32> -> vector<16x96xf32>
    %201 = vector.extract_strided_slice %200 {offsets = [0, 0], sizes = [16, 32], strides = [1, 1]} : vector<16x96xf32> to vector<16x32xf32>
    %202 = vector.extract_strided_slice %200 {offsets = [0, 32], sizes = [16, 32], strides = [1, 1]} : vector<16x96xf32> to vector<16x32xf32>
    %203 = vector.extract_strided_slice %200 {offsets = [0, 64], sizes = [16, 32], strides = [1, 1]} : vector<16x96xf32> to vector<16x32xf32>
    %204 = arith.truncf %201 : vector<16x32xf32> to vector<16x32xbf16>
    %205 = arith.truncf %202 : vector<16x32xf32> to vector<16x32xbf16>
    %cst_69 = arith.constant dense<0.000000e+00> : vector<16x16xf32>
    %206 = tpu.matmul %204, %205, %cst_69 {dimension_numbers = #tpu.dot_dimension_numbers<[1], [1], [0], [0], [0, 0, 1, 0], [], []>} : vector<16x32xbf16>, vector<16x32xbf16>, vector<16x16xf32> -> vector<16x16xf32>
    %207 = arith.addf %206, %196 : vector<16x16xf32>
    %cst_70 = arith.constant dense<0xFF800000> : vector<16xf32>
    %208 = vector.multi_reduction <maximumf>, %207, %cst_70 [1] : vector<16x16xf32> to vector<16xf32>
    %209 = vector.shape_cast %208 : vector<16xf32> to vector<16x1xf32>
    %210 = vector.broadcast %209 : vector<16x1xf32> to vector<16x16xf32>
    %211 = arith.subf %207, %210 : vector<16x16xf32>
    %212 = math.exp %211 : vector<16x16xf32>
    %cst_71 = arith.constant dense<0.000000e+00> : vector<16xf32>
    %213 = vector.multi_reduction <add>, %212, %cst_71 [1] : vector<16x16xf32> to vector<16xf32>
    %214 = vector.shape_cast %213 : vector<16xf32> to vector<16x1xf32>
    %215 = tpu.reciprocal %214 {approx = true} : vector<16x1xf32> -> vector<16x1xf32>
    %216 = vector.broadcast %215 : vector<16x1xf32> to vector<16x16xf32>
    %217 = arith.mulf %212, %216 : vector<16x16xf32>
    %218 = arith.truncf %217 : vector<16x16xf32> to vector<16x16xbf16>
    %219 = arith.truncf %203 : vector<16x32xf32> to vector<16x32xbf16>
    %cst_72 = arith.constant dense<0.000000e+00> : vector<16x32xf32>
    %220 = tpu.matmul %218, %219, %cst_72 {dimension_numbers = #tpu.dot_dimension_numbers<[1], [0], [0], [1], [0, 0, 1, 1], [], []>} : vector<16x16xbf16>, vector<16x32xbf16>, vector<16x32xf32> -> vector<16x32xf32>
    %c0_73 = arith.constant 0 : index
    %c128 = arith.constant 128 : index
    %221 = vector.load %arg6[%c0_73, %c128] : memref<32x1776xbf16, #tpu.memory_space<vmem>>, vector<32x32xbf16>
    %222 = arith.truncf %220 : vector<16x32xf32> to vector<16x32xbf16>
    %cst_74 = arith.constant dense<0.000000e+00> : vector<16x32xf32>
    %223 = tpu.matmul %222, %221, %cst_74 {dimension_numbers = #tpu.dot_dimension_numbers<[1], [0], [0], [1], [0, 0, 1, 1], [], []>} : vector<16x32xbf16>, vector<32x32xbf16>, vector<16x32xf32> -> vector<16x32xf32>
    %224 = arith.addf %181, %223 : vector<16x32xf32>
    %225 = vector.extract_strided_slice %197 {offsets = [0, 0], sizes = [1, 32], strides = [1, 1]} : vector<6x32xf32> to vector<1x32xf32>
    %226 = vector.extract_strided_slice %197 {offsets = [1, 0], sizes = [1, 32], strides = [1, 1]} : vector<6x32xf32> to vector<1x32xf32>
    %cst_75 = arith.constant dense<0.000000e+00> : vector<16xf32>
    %227 = vector.multi_reduction <add>, %224, %cst_75 [1] : vector<16x32xf32> to vector<16xf32>
    %228 = vector.shape_cast %227 : vector<16xf32> to vector<16x1xf32>
    %cst_76 = arith.constant 3.200000e+01 : f32
    %229 = vector.broadcast %cst_76 : f32 to vector<16x1xf32>
    %230 = arith.divf %228, %229 : vector<16x1xf32>
    %231 = vector.broadcast %230 : vector<16x1xf32> to vector<16x32xf32>
    %232 = arith.subf %224, %231 : vector<16x32xf32>
    %233 = arith.mulf %232, %232 : vector<16x32xf32>
    %cst_77 = arith.constant dense<0.000000e+00> : vector<16xf32>
    %234 = vector.multi_reduction <add>, %233, %cst_77 [1] : vector<16x32xf32> to vector<16xf32>
    %235 = vector.shape_cast %234 : vector<16xf32> to vector<16x1xf32>
    %cst_78 = arith.constant 3.200000e+01 : f32
    %236 = vector.broadcast %cst_78 : f32 to vector<16x1xf32>
    %237 = arith.divf %235, %236 : vector<16x1xf32>
    %cst_79 = arith.constant 9.99999974E-6 : f32
    %238 = vector.broadcast %cst_79 : f32 to vector<16x1xf32>
    %239 = arith.addf %237, %238 : vector<16x1xf32>
    %240 = math.rsqrt %239 : vector<16x1xf32>
    %241 = vector.broadcast %240 : vector<16x1xf32> to vector<16x32xf32>
    %242 = arith.mulf %232, %241 : vector<16x32xf32>
    %243 = vector.broadcast %225 : vector<1x32xf32> to vector<16x32xf32>
    %244 = arith.mulf %242, %243 : vector<16x32xf32>
    %245 = vector.broadcast %226 : vector<1x32xf32> to vector<16x32xf32>
    %246 = arith.addf %244, %245 : vector<16x32xf32>
    %c0_80 = arith.constant 0 : index
    %c192 = arith.constant 192 : index
    %247 = vector.load %arg6[%c0_80, %c192] : memref<32x1776xbf16, #tpu.memory_space<vmem>>, vector<32x64xbf16>
    %248 = arith.truncf %62 : vector<16x32xf32> to vector<16x32xbf16>
    %cst_81 = arith.constant dense<0.000000e+00> : vector<16x64xf32>
    %249 = tpu.matmul %248, %247, %cst_81 {dimension_numbers = #tpu.dot_dimension_numbers<[1], [0], [0], [1], [0, 0, 1, 1], [], []>} : vector<16x32xbf16>, vector<32x64xbf16>, vector<16x64xf32> -> vector<16x64xf32>
    %c0_82 = arith.constant 0 : index
    %c160 = arith.constant 160 : index
    %250 = vector.load %arg6[%c0_82, %c160] : memref<32x1776xbf16, #tpu.memory_space<vmem>>, vector<32x32xbf16>
    %251 = arith.truncf %246 : vector<16x32xf32> to vector<16x32xbf16>
    %cst_83 = arith.constant dense<0.000000e+00> : vector<16x32xf32>
    %252 = tpu.matmul %251, %250, %cst_83 {dimension_numbers = #tpu.dot_dimension_numbers<[1], [0], [0], [1], [0, 0, 1, 1], [], []>} : vector<16x32xbf16>, vector<32x32xbf16>, vector<16x32xf32> -> vector<16x32xf32>
    %253 = vector.extract_strided_slice %249 {offsets = [0, 0], sizes = [16, 32], strides = [1, 1]} : vector<16x64xf32> to vector<16x32xf32>
    %254 = arith.truncf %252 : vector<16x32xf32> to vector<16x32xbf16>
    %255 = arith.truncf %253 : vector<16x32xf32> to vector<16x32xbf16>
    %cst_84 = arith.constant dense<0.000000e+00> : vector<16x16xf32>
    %256 = tpu.matmul %254, %255, %cst_84 {dimension_numbers = #tpu.dot_dimension_numbers<[1], [1], [0], [0], [0, 0, 1, 0], [], []>} : vector<16x32xbf16>, vector<16x32xbf16>, vector<16x16xf32> -> vector<16x16xf32>
    %cst_85 = arith.constant dense<0xFF800000> : vector<16xf32>
    %257 = vector.multi_reduction <maximumf>, %256, %cst_85 [1] : vector<16x16xf32> to vector<16xf32>
    %258 = vector.shape_cast %257 : vector<16xf32> to vector<16x1xf32>
    %259 = vector.broadcast %258 : vector<16x1xf32> to vector<16x16xf32>
    %260 = arith.subf %256, %259 : vector<16x16xf32>
    %261 = math.exp %260 : vector<16x16xf32>
    %cst_86 = arith.constant dense<0.000000e+00> : vector<16xf32>
    %262 = vector.multi_reduction <add>, %261, %cst_86 [1] : vector<16x16xf32> to vector<16xf32>
    %263 = vector.shape_cast %262 : vector<16xf32> to vector<16x1xf32>
    %264 = tpu.reciprocal %263 {approx = true} : vector<16x1xf32> -> vector<16x1xf32>
    %265 = vector.broadcast %264 : vector<16x1xf32> to vector<16x16xf32>
    %266 = arith.mulf %261, %265 : vector<16x16xf32>
    %267 = vector.extract_strided_slice %249 {offsets = [0, 32], sizes = [16, 32], strides = [1, 1]} : vector<16x64xf32> to vector<16x32xf32>
    %268 = arith.truncf %266 : vector<16x16xf32> to vector<16x16xbf16>
    %269 = arith.truncf %267 : vector<16x32xf32> to vector<16x32xbf16>
    %cst_87 = arith.constant dense<0.000000e+00> : vector<16x32xf32>
    %270 = tpu.matmul %268, %269, %cst_87 {dimension_numbers = #tpu.dot_dimension_numbers<[1], [0], [0], [1], [0, 0, 1, 1], [], []>} : vector<16x16xbf16>, vector<16x32xbf16>, vector<16x32xf32> -> vector<16x32xf32>
    %c0_88 = arith.constant 0 : index
    %c256 = arith.constant 256 : index
    %271 = vector.load %arg6[%c0_88, %c256] : memref<32x1776xbf16, #tpu.memory_space<vmem>>, vector<32x32xbf16>
    %272 = arith.truncf %270 : vector<16x32xf32> to vector<16x32xbf16>
    %cst_89 = arith.constant dense<0.000000e+00> : vector<16x32xf32>
    %273 = tpu.matmul %272, %271, %cst_89 {dimension_numbers = #tpu.dot_dimension_numbers<[1], [0], [0], [1], [0, 0, 1, 1], [], []>} : vector<16x32xbf16>, vector<32x32xbf16>, vector<16x32xf32> -> vector<16x32xf32>
    %274 = arith.addf %246, %273 : vector<16x32xf32>
    %275 = vector.extract_strided_slice %197 {offsets = [2, 0], sizes = [1, 32], strides = [1, 1]} : vector<6x32xf32> to vector<1x32xf32>
    %276 = vector.extract_strided_slice %197 {offsets = [3, 0], sizes = [1, 32], strides = [1, 1]} : vector<6x32xf32> to vector<1x32xf32>
    %cst_90 = arith.constant dense<0.000000e+00> : vector<16xf32>
    %277 = vector.multi_reduction <add>, %274, %cst_90 [1] : vector<16x32xf32> to vector<16xf32>
    %278 = vector.shape_cast %277 : vector<16xf32> to vector<16x1xf32>
    %cst_91 = arith.constant 3.200000e+01 : f32
    %279 = vector.broadcast %cst_91 : f32 to vector<16x1xf32>
    %280 = arith.divf %278, %279 : vector<16x1xf32>
    %281 = vector.broadcast %280 : vector<16x1xf32> to vector<16x32xf32>
    %282 = arith.subf %274, %281 : vector<16x32xf32>
    %283 = arith.mulf %282, %282 : vector<16x32xf32>
    %cst_92 = arith.constant dense<0.000000e+00> : vector<16xf32>
    %284 = vector.multi_reduction <add>, %283, %cst_92 [1] : vector<16x32xf32> to vector<16xf32>
    %285 = vector.shape_cast %284 : vector<16xf32> to vector<16x1xf32>
    %cst_93 = arith.constant 3.200000e+01 : f32
    %286 = vector.broadcast %cst_93 : f32 to vector<16x1xf32>
    %287 = arith.divf %285, %286 : vector<16x1xf32>
    %cst_94 = arith.constant 9.99999974E-6 : f32
    %288 = vector.broadcast %cst_94 : f32 to vector<16x1xf32>
    %289 = arith.addf %287, %288 : vector<16x1xf32>
    %290 = math.rsqrt %289 : vector<16x1xf32>
    %291 = vector.broadcast %290 : vector<16x1xf32> to vector<16x32xf32>
    %292 = arith.mulf %282, %291 : vector<16x32xf32>
    %293 = vector.broadcast %275 : vector<1x32xf32> to vector<16x32xf32>
    %294 = arith.mulf %292, %293 : vector<16x32xf32>
    %295 = vector.broadcast %276 : vector<1x32xf32> to vector<16x32xf32>
    %296 = arith.addf %294, %295 : vector<16x32xf32>
    %c0_95 = arith.constant 0 : index
    %c288 = arith.constant 288 : index
    %297 = vector.load %arg6[%c0_95, %c288] : memref<32x1776xbf16, #tpu.memory_space<vmem>>, vector<32x128xbf16>
    %298 = arith.truncf %296 : vector<16x32xf32> to vector<16x32xbf16>
    %cst_96 = arith.constant dense<0.000000e+00> : vector<16x128xf32>
    %299 = tpu.matmul %298, %297, %cst_96 {dimension_numbers = #tpu.dot_dimension_numbers<[1], [0], [0], [1], [0, 0, 1, 1], [], []>} : vector<16x32xbf16>, vector<32x128xbf16>, vector<16x128xf32> -> vector<16x128xf32>
    %c60 = arith.constant 60 : index
    %c0_97 = arith.constant 0 : index
    %300 = vector.load %arg8[%c60, %c0_97] : memref<96x128xf32, #tpu.memory_space<vmem>>, vector<1x128xf32>
    %301 = vector.broadcast %300 : vector<1x128xf32> to vector<16x128xf32>
    %302 = arith.addf %299, %301 : vector<16x128xf32>
    %303 = arith.mulf %302, %302 : vector<16x128xf32>
    %304 = arith.mulf %302, %303 : vector<16x128xf32>
    %cst_98 = arith.constant 4.471500e-02 : f32
    %305 = vector.broadcast %cst_98 : f32 to vector<16x128xf32>
    %306 = arith.mulf %305, %304 : vector<16x128xf32>
    %307 = arith.addf %302, %306 : vector<16x128xf32>
    %cst_99 = arith.constant 0.797884583 : f32
    %308 = vector.broadcast %cst_99 : f32 to vector<16x128xf32>
    %309 = arith.mulf %308, %307 : vector<16x128xf32>
    %310 = math.tanh %309 : vector<16x128xf32>
    %cst_100 = arith.constant 1.000000e+00 : f32
    %311 = vector.broadcast %cst_100 : f32 to vector<16x128xf32>
    %312 = arith.addf %311, %310 : vector<16x128xf32>
    %cst_101 = arith.constant 5.000000e-01 : f32
    %313 = vector.broadcast %cst_101 : f32 to vector<16x128xf32>
    %314 = arith.mulf %313, %312 : vector<16x128xf32>
    %315 = arith.mulf %302, %314 : vector<16x128xf32>
    %c192_102 = arith.constant 192 : index
    %c0_103 = arith.constant 0 : index
    %316 = vector.load %arg7[%c192_102, %c0_103] : memref<704x32xbf16, #tpu.memory_space<vmem>>, vector<128x32xbf16>
    %317 = arith.truncf %315 : vector<16x128xf32> to vector<16x128xbf16>
    %cst_104 = arith.constant dense<0.000000e+00> : vector<16x32xf32>
    %318 = tpu.matmul %317, %316, %cst_104 {dimension_numbers = #tpu.dot_dimension_numbers<[1], [0], [0], [1], [0, 0, 1, 1], [], []>} : vector<16x128xbf16>, vector<128x32xbf16>, vector<16x32xf32> -> vector<16x32xf32>
    %c61 = arith.constant 61 : index
    %c0_105 = arith.constant 0 : index
    %319 = vector.load %arg8[%c61, %c0_105] : memref<96x128xf32, #tpu.memory_space<vmem>>, vector<1x32xf32>
    %320 = vector.broadcast %319 : vector<1x32xf32> to vector<16x32xf32>
    %321 = arith.addf %318, %320 : vector<16x32xf32>
    %322 = arith.addf %296, %321 : vector<16x32xf32>
    %323 = vector.extract_strided_slice %197 {offsets = [4, 0], sizes = [1, 32], strides = [1, 1]} : vector<6x32xf32> to vector<1x32xf32>
    %324 = vector.extract_strided_slice %197 {offsets = [5, 0], sizes = [1, 32], strides = [1, 1]} : vector<6x32xf32> to vector<1x32xf32>
    %cst_106 = arith.constant dense<0.000000e+00> : vector<16xf32>
    %325 = vector.multi_reduction <add>, %322, %cst_106 [1] : vector<16x32xf32> to vector<16xf32>
    %326 = vector.shape_cast %325 : vector<16xf32> to vector<16x1xf32>
    %cst_107 = arith.constant 3.200000e+01 : f32
    %327 = vector.broadcast %cst_107 : f32 to vector<16x1xf32>
    %328 = arith.divf %326, %327 : vector<16x1xf32>
    %329 = vector.broadcast %328 : vector<16x1xf32> to vector<16x32xf32>
    %330 = arith.subf %322, %329 : vector<16x32xf32>
    %331 = arith.mulf %330, %330 : vector<16x32xf32>
    %cst_108 = arith.constant dense<0.000000e+00> : vector<16xf32>
    %332 = vector.multi_reduction <add>, %331, %cst_108 [1] : vector<16x32xf32> to vector<16xf32>
    %333 = vector.shape_cast %332 : vector<16xf32> to vector<16x1xf32>
    %cst_109 = arith.constant 3.200000e+01 : f32
    %334 = vector.broadcast %cst_109 : f32 to vector<16x1xf32>
    %335 = arith.divf %333, %334 : vector<16x1xf32>
    %cst_110 = arith.constant 9.99999974E-6 : f32
    %336 = vector.broadcast %cst_110 : f32 to vector<16x1xf32>
    %337 = arith.addf %335, %336 : vector<16x1xf32>
    %338 = math.rsqrt %337 : vector<16x1xf32>
    %339 = vector.broadcast %338 : vector<16x1xf32> to vector<16x32xf32>
    %340 = arith.mulf %330, %339 : vector<16x32xf32>
    %341 = vector.broadcast %323 : vector<1x32xf32> to vector<16x32xf32>
    %342 = arith.mulf %340, %341 : vector<16x32xf32>
    %343 = vector.broadcast %324 : vector<1x32xf32> to vector<16x32xf32>
    %344 = arith.addf %342, %343 : vector<16x32xf32>
    %c62 = arith.constant 62 : index
    %c0_111 = arith.constant 0 : index
    %345 = vector.load %arg8[%c62, %c0_111] : memref<96x128xf32, #tpu.memory_space<vmem>>, vector<6x32xf32>
    %c0_112 = arith.constant 0 : index
    %c416 = arith.constant 416 : index
    %346 = vector.load %arg6[%c0_112, %c416] : memref<32x1776xbf16, #tpu.memory_space<vmem>>, vector<32x96xbf16>
    %347 = arith.truncf %344 : vector<16x32xf32> to vector<16x32xbf16>
    %cst_113 = arith.constant dense<0.000000e+00> : vector<16x96xf32>
    %348 = tpu.matmul %347, %346, %cst_113 {dimension_numbers = #tpu.dot_dimension_numbers<[1], [0], [0], [1], [0, 0, 1, 1], [], []>} : vector<16x32xbf16>, vector<32x96xbf16>, vector<16x96xf32> -> vector<16x96xf32>
    %349 = vector.extract_strided_slice %348 {offsets = [0, 0], sizes = [16, 32], strides = [1, 1]} : vector<16x96xf32> to vector<16x32xf32>
    %350 = vector.extract_strided_slice %348 {offsets = [0, 32], sizes = [16, 32], strides = [1, 1]} : vector<16x96xf32> to vector<16x32xf32>
    %351 = vector.extract_strided_slice %348 {offsets = [0, 64], sizes = [16, 32], strides = [1, 1]} : vector<16x96xf32> to vector<16x32xf32>
    %352 = arith.truncf %349 : vector<16x32xf32> to vector<16x32xbf16>
    %353 = arith.truncf %350 : vector<16x32xf32> to vector<16x32xbf16>
    %cst_114 = arith.constant dense<0.000000e+00> : vector<16x16xf32>
    %354 = tpu.matmul %352, %353, %cst_114 {dimension_numbers = #tpu.dot_dimension_numbers<[1], [1], [0], [0], [0, 0, 1, 0], [], []>} : vector<16x32xbf16>, vector<16x32xbf16>, vector<16x16xf32> -> vector<16x16xf32>
    %355 = arith.addf %354, %196 : vector<16x16xf32>
    %cst_115 = arith.constant dense<0xFF800000> : vector<16xf32>
    %356 = vector.multi_reduction <maximumf>, %355, %cst_115 [1] : vector<16x16xf32> to vector<16xf32>
    %357 = vector.shape_cast %356 : vector<16xf32> to vector<16x1xf32>
    %358 = vector.broadcast %357 : vector<16x1xf32> to vector<16x16xf32>
    %359 = arith.subf %355, %358 : vector<16x16xf32>
    %360 = math.exp %359 : vector<16x16xf32>
    %cst_116 = arith.constant dense<0.000000e+00> : vector<16xf32>
    %361 = vector.multi_reduction <add>, %360, %cst_116 [1] : vector<16x16xf32> to vector<16xf32>
    %362 = vector.shape_cast %361 : vector<16xf32> to vector<16x1xf32>
    %363 = tpu.reciprocal %362 {approx = true} : vector<16x1xf32> -> vector<16x1xf32>
    %364 = vector.broadcast %363 : vector<16x1xf32> to vector<16x16xf32>
    %365 = arith.mulf %360, %364 : vector<16x16xf32>
    %366 = arith.truncf %365 : vector<16x16xf32> to vector<16x16xbf16>
    %367 = arith.truncf %351 : vector<16x32xf32> to vector<16x32xbf16>
    %cst_117 = arith.constant dense<0.000000e+00> : vector<16x32xf32>
    %368 = tpu.matmul %366, %367, %cst_117 {dimension_numbers = #tpu.dot_dimension_numbers<[1], [0], [0], [1], [0, 0, 1, 1], [], []>} : vector<16x16xbf16>, vector<16x32xbf16>, vector<16x32xf32> -> vector<16x32xf32>
    %c0_118 = arith.constant 0 : index
    %c512 = arith.constant 512 : index
    %369 = vector.load %arg6[%c0_118, %c512] : memref<32x1776xbf16, #tpu.memory_space<vmem>>, vector<32x32xbf16>
    %370 = arith.truncf %368 : vector<16x32xf32> to vector<16x32xbf16>
    %cst_119 = arith.constant dense<0.000000e+00> : vector<16x32xf32>
    %371 = tpu.matmul %370, %369, %cst_119 {dimension_numbers = #tpu.dot_dimension_numbers<[1], [0], [0], [1], [0, 0, 1, 1], [], []>} : vector<16x32xbf16>, vector<32x32xbf16>, vector<16x32xf32> -> vector<16x32xf32>
    %372 = arith.addf %344, %371 : vector<16x32xf32>
    %373 = vector.extract_strided_slice %345 {offsets = [0, 0], sizes = [1, 32], strides = [1, 1]} : vector<6x32xf32> to vector<1x32xf32>
    %374 = vector.extract_strided_slice %345 {offsets = [1, 0], sizes = [1, 32], strides = [1, 1]} : vector<6x32xf32> to vector<1x32xf32>
    %cst_120 = arith.constant dense<0.000000e+00> : vector<16xf32>
    %375 = vector.multi_reduction <add>, %372, %cst_120 [1] : vector<16x32xf32> to vector<16xf32>
    %376 = vector.shape_cast %375 : vector<16xf32> to vector<16x1xf32>
    %cst_121 = arith.constant 3.200000e+01 : f32
    %377 = vector.broadcast %cst_121 : f32 to vector<16x1xf32>
    %378 = arith.divf %376, %377 : vector<16x1xf32>
    %379 = vector.broadcast %378 : vector<16x1xf32> to vector<16x32xf32>
    %380 = arith.subf %372, %379 : vector<16x32xf32>
    %381 = arith.mulf %380, %380 : vector<16x32xf32>
    %cst_122 = arith.constant dense<0.000000e+00> : vector<16xf32>
    %382 = vector.multi_reduction <add>, %381, %cst_122 [1] : vector<16x32xf32> to vector<16xf32>
    %383 = vector.shape_cast %382 : vector<16xf32> to vector<16x1xf32>
    %cst_123 = arith.constant 3.200000e+01 : f32
    %384 = vector.broadcast %cst_123 : f32 to vector<16x1xf32>
    %385 = arith.divf %383, %384 : vector<16x1xf32>
    %cst_124 = arith.constant 9.99999974E-6 : f32
    %386 = vector.broadcast %cst_124 : f32 to vector<16x1xf32>
    %387 = arith.addf %385, %386 : vector<16x1xf32>
    %388 = math.rsqrt %387 : vector<16x1xf32>
    %389 = vector.broadcast %388 : vector<16x1xf32> to vector<16x32xf32>
    %390 = arith.mulf %380, %389 : vector<16x32xf32>
    %391 = vector.broadcast %373 : vector<1x32xf32> to vector<16x32xf32>
    %392 = arith.mulf %390, %391 : vector<16x32xf32>
    %393 = vector.broadcast %374 : vector<1x32xf32> to vector<16x32xf32>
    %394 = arith.addf %392, %393 : vector<16x32xf32>
    %c0_125 = arith.constant 0 : index
    %c576 = arith.constant 576 : index
    %395 = vector.load %arg6[%c0_125, %c576] : memref<32x1776xbf16, #tpu.memory_space<vmem>>, vector<32x64xbf16>
    %396 = arith.truncf %62 : vector<16x32xf32> to vector<16x32xbf16>
    %cst_126 = arith.constant dense<0.000000e+00> : vector<16x64xf32>
    %397 = tpu.matmul %396, %395, %cst_126 {dimension_numbers = #tpu.dot_dimension_numbers<[1], [0], [0], [1], [0, 0, 1, 1], [], []>} : vector<16x32xbf16>, vector<32x64xbf16>, vector<16x64xf32> -> vector<16x64xf32>
    %c0_127 = arith.constant 0 : index
    %c544 = arith.constant 544 : index
    %398 = vector.load %arg6[%c0_127, %c544] : memref<32x1776xbf16, #tpu.memory_space<vmem>>, vector<32x32xbf16>
    %399 = arith.truncf %394 : vector<16x32xf32> to vector<16x32xbf16>
    %cst_128 = arith.constant dense<0.000000e+00> : vector<16x32xf32>
    %400 = tpu.matmul %399, %398, %cst_128 {dimension_numbers = #tpu.dot_dimension_numbers<[1], [0], [0], [1], [0, 0, 1, 1], [], []>} : vector<16x32xbf16>, vector<32x32xbf16>, vector<16x32xf32> -> vector<16x32xf32>
    %401 = vector.extract_strided_slice %397 {offsets = [0, 0], sizes = [16, 32], strides = [1, 1]} : vector<16x64xf32> to vector<16x32xf32>
    %402 = arith.truncf %400 : vector<16x32xf32> to vector<16x32xbf16>
    %403 = arith.truncf %401 : vector<16x32xf32> to vector<16x32xbf16>
    %cst_129 = arith.constant dense<0.000000e+00> : vector<16x16xf32>
    %404 = tpu.matmul %402, %403, %cst_129 {dimension_numbers = #tpu.dot_dimension_numbers<[1], [1], [0], [0], [0, 0, 1, 0], [], []>} : vector<16x32xbf16>, vector<16x32xbf16>, vector<16x16xf32> -> vector<16x16xf32>
    %cst_130 = arith.constant dense<0xFF800000> : vector<16xf32>
    %405 = vector.multi_reduction <maximumf>, %404, %cst_130 [1] : vector<16x16xf32> to vector<16xf32>
    %406 = vector.shape_cast %405 : vector<16xf32> to vector<16x1xf32>
    %407 = vector.broadcast %406 : vector<16x1xf32> to vector<16x16xf32>
    %408 = arith.subf %404, %407 : vector<16x16xf32>
    %409 = math.exp %408 : vector<16x16xf32>
    %cst_131 = arith.constant dense<0.000000e+00> : vector<16xf32>
    %410 = vector.multi_reduction <add>, %409, %cst_131 [1] : vector<16x16xf32> to vector<16xf32>
    %411 = vector.shape_cast %410 : vector<16xf32> to vector<16x1xf32>
    %412 = tpu.reciprocal %411 {approx = true} : vector<16x1xf32> -> vector<16x1xf32>
    %413 = vector.broadcast %412 : vector<16x1xf32> to vector<16x16xf32>
    %414 = arith.mulf %409, %413 : vector<16x16xf32>
    %415 = vector.extract_strided_slice %397 {offsets = [0, 32], sizes = [16, 32], strides = [1, 1]} : vector<16x64xf32> to vector<16x32xf32>
    %416 = arith.truncf %414 : vector<16x16xf32> to vector<16x16xbf16>
    %417 = arith.truncf %415 : vector<16x32xf32> to vector<16x32xbf16>
    %cst_132 = arith.constant dense<0.000000e+00> : vector<16x32xf32>
    %418 = tpu.matmul %416, %417, %cst_132 {dimension_numbers = #tpu.dot_dimension_numbers<[1], [0], [0], [1], [0, 0, 1, 1], [], []>} : vector<16x16xbf16>, vector<16x32xbf16>, vector<16x32xf32> -> vector<16x32xf32>
    %c0_133 = arith.constant 0 : index
    %c640 = arith.constant 640 : index
    %419 = vector.load %arg6[%c0_133, %c640] : memref<32x1776xbf16, #tpu.memory_space<vmem>>, vector<32x32xbf16>
    %420 = arith.truncf %418 : vector<16x32xf32> to vector<16x32xbf16>
    %cst_134 = arith.constant dense<0.000000e+00> : vector<16x32xf32>
    %421 = tpu.matmul %420, %419, %cst_134 {dimension_numbers = #tpu.dot_dimension_numbers<[1], [0], [0], [1], [0, 0, 1, 1], [], []>} : vector<16x32xbf16>, vector<32x32xbf16>, vector<16x32xf32> -> vector<16x32xf32>
    %422 = arith.addf %394, %421 : vector<16x32xf32>
    %423 = vector.extract_strided_slice %345 {offsets = [2, 0], sizes = [1, 32], strides = [1, 1]} : vector<6x32xf32> to vector<1x32xf32>
    %424 = vector.extract_strided_slice %345 {offsets = [3, 0], sizes = [1, 32], strides = [1, 1]} : vector<6x32xf32> to vector<1x32xf32>
    %cst_135 = arith.constant dense<0.000000e+00> : vector<16xf32>
    %425 = vector.multi_reduction <add>, %422, %cst_135 [1] : vector<16x32xf32> to vector<16xf32>
    %426 = vector.shape_cast %425 : vector<16xf32> to vector<16x1xf32>
    %cst_136 = arith.constant 3.200000e+01 : f32
    %427 = vector.broadcast %cst_136 : f32 to vector<16x1xf32>
    %428 = arith.divf %426, %427 : vector<16x1xf32>
    %429 = vector.broadcast %428 : vector<16x1xf32> to vector<16x32xf32>
    %430 = arith.subf %422, %429 : vector<16x32xf32>
    %431 = arith.mulf %430, %430 : vector<16x32xf32>
    %cst_137 = arith.constant dense<0.000000e+00> : vector<16xf32>
    %432 = vector.multi_reduction <add>, %431, %cst_137 [1] : vector<16x32xf32> to vector<16xf32>
    %433 = vector.shape_cast %432 : vector<16xf32> to vector<16x1xf32>
    %cst_138 = arith.constant 3.200000e+01 : f32
    %434 = vector.broadcast %cst_138 : f32 to vector<16x1xf32>
    %435 = arith.divf %433, %434 : vector<16x1xf32>
    %cst_139 = arith.constant 9.99999974E-6 : f32
    %436 = vector.broadcast %cst_139 : f32 to vector<16x1xf32>
    %437 = arith.addf %435, %436 : vector<16x1xf32>
    %438 = math.rsqrt %437 : vector<16x1xf32>
    %439 = vector.broadcast %438 : vector<16x1xf32> to vector<16x32xf32>
    %440 = arith.mulf %430, %439 : vector<16x32xf32>
    %441 = vector.broadcast %423 : vector<1x32xf32> to vector<16x32xf32>
    %442 = arith.mulf %440, %441 : vector<16x32xf32>
    %443 = vector.broadcast %424 : vector<1x32xf32> to vector<16x32xf32>
    %444 = arith.addf %442, %443 : vector<16x32xf32>
    %c0_140 = arith.constant 0 : index
    %c672 = arith.constant 672 : index
    %445 = vector.load %arg6[%c0_140, %c672] : memref<32x1776xbf16, #tpu.memory_space<vmem>>, vector<32x128xbf16>
    %446 = arith.truncf %444 : vector<16x32xf32> to vector<16x32xbf16>
    %cst_141 = arith.constant dense<0.000000e+00> : vector<16x128xf32>
    %447 = tpu.matmul %446, %445, %cst_141 {dimension_numbers = #tpu.dot_dimension_numbers<[1], [0], [0], [1], [0, 0, 1, 1], [], []>} : vector<16x32xbf16>, vector<32x128xbf16>, vector<16x128xf32> -> vector<16x128xf32>
    %c68 = arith.constant 68 : index
    %c0_142 = arith.constant 0 : index
    %448 = vector.load %arg8[%c68, %c0_142] : memref<96x128xf32, #tpu.memory_space<vmem>>, vector<1x128xf32>
    %449 = vector.broadcast %448 : vector<1x128xf32> to vector<16x128xf32>
    %450 = arith.addf %447, %449 : vector<16x128xf32>
    %451 = arith.mulf %450, %450 : vector<16x128xf32>
    %452 = arith.mulf %450, %451 : vector<16x128xf32>
    %cst_143 = arith.constant 4.471500e-02 : f32
    %453 = vector.broadcast %cst_143 : f32 to vector<16x128xf32>
    %454 = arith.mulf %453, %452 : vector<16x128xf32>
    %455 = arith.addf %450, %454 : vector<16x128xf32>
    %cst_144 = arith.constant 0.797884583 : f32
    %456 = vector.broadcast %cst_144 : f32 to vector<16x128xf32>
    %457 = arith.mulf %456, %455 : vector<16x128xf32>
    %458 = math.tanh %457 : vector<16x128xf32>
    %cst_145 = arith.constant 1.000000e+00 : f32
    %459 = vector.broadcast %cst_145 : f32 to vector<16x128xf32>
    %460 = arith.addf %459, %458 : vector<16x128xf32>
    %cst_146 = arith.constant 5.000000e-01 : f32
    %461 = vector.broadcast %cst_146 : f32 to vector<16x128xf32>
    %462 = arith.mulf %461, %460 : vector<16x128xf32>
    %463 = arith.mulf %450, %462 : vector<16x128xf32>
    %c320 = arith.constant 320 : index
    %c0_147 = arith.constant 0 : index
    %464 = vector.load %arg7[%c320, %c0_147] : memref<704x32xbf16, #tpu.memory_space<vmem>>, vector<128x32xbf16>
    %465 = arith.truncf %463 : vector<16x128xf32> to vector<16x128xbf16>
    %cst_148 = arith.constant dense<0.000000e+00> : vector<16x32xf32>
    %466 = tpu.matmul %465, %464, %cst_148 {dimension_numbers = #tpu.dot_dimension_numbers<[1], [0], [0], [1], [0, 0, 1, 1], [], []>} : vector<16x128xbf16>, vector<128x32xbf16>, vector<16x32xf32> -> vector<16x32xf32>
    %c69 = arith.constant 69 : index
    %c0_149 = arith.constant 0 : index
    %467 = vector.load %arg8[%c69, %c0_149] : memref<96x128xf32, #tpu.memory_space<vmem>>, vector<1x32xf32>
    %468 = vector.broadcast %467 : vector<1x32xf32> to vector<16x32xf32>
    %469 = arith.addf %466, %468 : vector<16x32xf32>
    %470 = arith.addf %444, %469 : vector<16x32xf32>
    %471 = vector.extract_strided_slice %345 {offsets = [4, 0], sizes = [1, 32], strides = [1, 1]} : vector<6x32xf32> to vector<1x32xf32>
    %472 = vector.extract_strided_slice %345 {offsets = [5, 0], sizes = [1, 32], strides = [1, 1]} : vector<6x32xf32> to vector<1x32xf32>
    %cst_150 = arith.constant dense<0.000000e+00> : vector<16xf32>
    %473 = vector.multi_reduction <add>, %470, %cst_150 [1] : vector<16x32xf32> to vector<16xf32>
    %474 = vector.shape_cast %473 : vector<16xf32> to vector<16x1xf32>
    %cst_151 = arith.constant 3.200000e+01 : f32
    %475 = vector.broadcast %cst_151 : f32 to vector<16x1xf32>
    %476 = arith.divf %474, %475 : vector<16x1xf32>
    %477 = vector.broadcast %476 : vector<16x1xf32> to vector<16x32xf32>
    %478 = arith.subf %470, %477 : vector<16x32xf32>
    %479 = arith.mulf %478, %478 : vector<16x32xf32>
    %cst_152 = arith.constant dense<0.000000e+00> : vector<16xf32>
    %480 = vector.multi_reduction <add>, %479, %cst_152 [1] : vector<16x32xf32> to vector<16xf32>
    %481 = vector.shape_cast %480 : vector<16xf32> to vector<16x1xf32>
    %cst_153 = arith.constant 3.200000e+01 : f32
    %482 = vector.broadcast %cst_153 : f32 to vector<16x1xf32>
    %483 = arith.divf %481, %482 : vector<16x1xf32>
    %cst_154 = arith.constant 9.99999974E-6 : f32
    %484 = vector.broadcast %cst_154 : f32 to vector<16x1xf32>
    %485 = arith.addf %483, %484 : vector<16x1xf32>
    %486 = math.rsqrt %485 : vector<16x1xf32>
    %487 = vector.broadcast %486 : vector<16x1xf32> to vector<16x32xf32>
    %488 = arith.mulf %478, %487 : vector<16x32xf32>
    %489 = vector.broadcast %471 : vector<1x32xf32> to vector<16x32xf32>
    %490 = arith.mulf %488, %489 : vector<16x32xf32>
    %491 = vector.broadcast %472 : vector<1x32xf32> to vector<16x32xf32>
    %492 = arith.addf %490, %491 : vector<16x32xf32>
    %c70 = arith.constant 70 : index
    %c0_155 = arith.constant 0 : index
    %493 = vector.load %arg8[%c70, %c0_155] : memref<96x128xf32, #tpu.memory_space<vmem>>, vector<6x32xf32>
    %c0_156 = arith.constant 0 : index
    %c800 = arith.constant 800 : index
    %494 = vector.load %arg6[%c0_156, %c800] : memref<32x1776xbf16, #tpu.memory_space<vmem>>, vector<32x96xbf16>
    %495 = arith.truncf %492 : vector<16x32xf32> to vector<16x32xbf16>
    %cst_157 = arith.constant dense<0.000000e+00> : vector<16x96xf32>
    %496 = tpu.matmul %495, %494, %cst_157 {dimension_numbers = #tpu.dot_dimension_numbers<[1], [0], [0], [1], [0, 0, 1, 1], [], []>} : vector<16x32xbf16>, vector<32x96xbf16>, vector<16x96xf32> -> vector<16x96xf32>
    %497 = vector.extract_strided_slice %496 {offsets = [0, 0], sizes = [16, 32], strides = [1, 1]} : vector<16x96xf32> to vector<16x32xf32>
    %498 = vector.extract_strided_slice %496 {offsets = [0, 32], sizes = [16, 32], strides = [1, 1]} : vector<16x96xf32> to vector<16x32xf32>
    %499 = vector.extract_strided_slice %496 {offsets = [0, 64], sizes = [16, 32], strides = [1, 1]} : vector<16x96xf32> to vector<16x32xf32>
    %500 = arith.truncf %497 : vector<16x32xf32> to vector<16x32xbf16>
    %501 = arith.truncf %498 : vector<16x32xf32> to vector<16x32xbf16>
    %cst_158 = arith.constant dense<0.000000e+00> : vector<16x16xf32>
    %502 = tpu.matmul %500, %501, %cst_158 {dimension_numbers = #tpu.dot_dimension_numbers<[1], [1], [0], [0], [0, 0, 1, 0], [], []>} : vector<16x32xbf16>, vector<16x32xbf16>, vector<16x16xf32> -> vector<16x16xf32>
    %503 = arith.addf %502, %196 : vector<16x16xf32>
    %cst_159 = arith.constant dense<0xFF800000> : vector<16xf32>
    %504 = vector.multi_reduction <maximumf>, %503, %cst_159 [1] : vector<16x16xf32> to vector<16xf32>
    %505 = vector.shape_cast %504 : vector<16xf32> to vector<16x1xf32>
    %506 = vector.broadcast %505 : vector<16x1xf32> to vector<16x16xf32>
    %507 = arith.subf %503, %506 : vector<16x16xf32>
    %508 = math.exp %507 : vector<16x16xf32>
    %cst_160 = arith.constant dense<0.000000e+00> : vector<16xf32>
    %509 = vector.multi_reduction <add>, %508, %cst_160 [1] : vector<16x16xf32> to vector<16xf32>
    %510 = vector.shape_cast %509 : vector<16xf32> to vector<16x1xf32>
    %511 = tpu.reciprocal %510 {approx = true} : vector<16x1xf32> -> vector<16x1xf32>
    %512 = vector.broadcast %511 : vector<16x1xf32> to vector<16x16xf32>
    %513 = arith.mulf %508, %512 : vector<16x16xf32>
    %514 = arith.truncf %513 : vector<16x16xf32> to vector<16x16xbf16>
    %515 = arith.truncf %499 : vector<16x32xf32> to vector<16x32xbf16>
    %cst_161 = arith.constant dense<0.000000e+00> : vector<16x32xf32>
    %516 = tpu.matmul %514, %515, %cst_161 {dimension_numbers = #tpu.dot_dimension_numbers<[1], [0], [0], [1], [0, 0, 1, 1], [], []>} : vector<16x16xbf16>, vector<16x32xbf16>, vector<16x32xf32> -> vector<16x32xf32>
    %c0_162 = arith.constant 0 : index
    %c896 = arith.constant 896 : index
    %517 = vector.load %arg6[%c0_162, %c896] : memref<32x1776xbf16, #tpu.memory_space<vmem>>, vector<32x32xbf16>
    %518 = arith.truncf %516 : vector<16x32xf32> to vector<16x32xbf16>
    %cst_163 = arith.constant dense<0.000000e+00> : vector<16x32xf32>
    %519 = tpu.matmul %518, %517, %cst_163 {dimension_numbers = #tpu.dot_dimension_numbers<[1], [0], [0], [1], [0, 0, 1, 1], [], []>} : vector<16x32xbf16>, vector<32x32xbf16>, vector<16x32xf32> -> vector<16x32xf32>
    %520 = arith.addf %492, %519 : vector<16x32xf32>
    %521 = vector.extract_strided_slice %493 {offsets = [0, 0], sizes = [1, 32], strides = [1, 1]} : vector<6x32xf32> to vector<1x32xf32>
    %522 = vector.extract_strided_slice %493 {offsets = [1, 0], sizes = [1, 32], strides = [1, 1]} : vector<6x32xf32> to vector<1x32xf32>
    %cst_164 = arith.constant dense<0.000000e+00> : vector<16xf32>
    %523 = vector.multi_reduction <add>, %520, %cst_164 [1] : vector<16x32xf32> to vector<16xf32>
    %524 = vector.shape_cast %523 : vector<16xf32> to vector<16x1xf32>
    %cst_165 = arith.constant 3.200000e+01 : f32
    %525 = vector.broadcast %cst_165 : f32 to vector<16x1xf32>
    %526 = arith.divf %524, %525 : vector<16x1xf32>
    %527 = vector.broadcast %526 : vector<16x1xf32> to vector<16x32xf32>
    %528 = arith.subf %520, %527 : vector<16x32xf32>
    %529 = arith.mulf %528, %528 : vector<16x32xf32>
    %cst_166 = arith.constant dense<0.000000e+00> : vector<16xf32>
    %530 = vector.multi_reduction <add>, %529, %cst_166 [1] : vector<16x32xf32> to vector<16xf32>
    %531 = vector.shape_cast %530 : vector<16xf32> to vector<16x1xf32>
    %cst_167 = arith.constant 3.200000e+01 : f32
    %532 = vector.broadcast %cst_167 : f32 to vector<16x1xf32>
    %533 = arith.divf %531, %532 : vector<16x1xf32>
    %cst_168 = arith.constant 9.99999974E-6 : f32
    %534 = vector.broadcast %cst_168 : f32 to vector<16x1xf32>
    %535 = arith.addf %533, %534 : vector<16x1xf32>
    %536 = math.rsqrt %535 : vector<16x1xf32>
    %537 = vector.broadcast %536 : vector<16x1xf32> to vector<16x32xf32>
    %538 = arith.mulf %528, %537 : vector<16x32xf32>
    %539 = vector.broadcast %521 : vector<1x32xf32> to vector<16x32xf32>
    %540 = arith.mulf %538, %539 : vector<16x32xf32>
    %541 = vector.broadcast %522 : vector<1x32xf32> to vector<16x32xf32>
    %542 = arith.addf %540, %541 : vector<16x32xf32>
    %c0_169 = arith.constant 0 : index
    %c960 = arith.constant 960 : index
    %543 = vector.load %arg6[%c0_169, %c960] : memref<32x1776xbf16, #tpu.memory_space<vmem>>, vector<32x64xbf16>
    %544 = arith.truncf %62 : vector<16x32xf32> to vector<16x32xbf16>
    %cst_170 = arith.constant dense<0.000000e+00> : vector<16x64xf32>
    %545 = tpu.matmul %544, %543, %cst_170 {dimension_numbers = #tpu.dot_dimension_numbers<[1], [0], [0], [1], [0, 0, 1, 1], [], []>} : vector<16x32xbf16>, vector<32x64xbf16>, vector<16x64xf32> -> vector<16x64xf32>
    %c0_171 = arith.constant 0 : index
    %c928 = arith.constant 928 : index
    %546 = vector.load %arg6[%c0_171, %c928] : memref<32x1776xbf16, #tpu.memory_space<vmem>>, vector<32x32xbf16>
    %547 = arith.truncf %542 : vector<16x32xf32> to vector<16x32xbf16>
    %cst_172 = arith.constant dense<0.000000e+00> : vector<16x32xf32>
    %548 = tpu.matmul %547, %546, %cst_172 {dimension_numbers = #tpu.dot_dimension_numbers<[1], [0], [0], [1], [0, 0, 1, 1], [], []>} : vector<16x32xbf16>, vector<32x32xbf16>, vector<16x32xf32> -> vector<16x32xf32>
    %549 = vector.extract_strided_slice %545 {offsets = [0, 0], sizes = [16, 32], strides = [1, 1]} : vector<16x64xf32> to vector<16x32xf32>
    %550 = arith.truncf %548 : vector<16x32xf32> to vector<16x32xbf16>
    %551 = arith.truncf %549 : vector<16x32xf32> to vector<16x32xbf16>
    %cst_173 = arith.constant dense<0.000000e+00> : vector<16x16xf32>
    %552 = tpu.matmul %550, %551, %cst_173 {dimension_numbers = #tpu.dot_dimension_numbers<[1], [1], [0], [0], [0, 0, 1, 0], [], []>} : vector<16x32xbf16>, vector<16x32xbf16>, vector<16x16xf32> -> vector<16x16xf32>
    %cst_174 = arith.constant dense<0xFF800000> : vector<16xf32>
    %553 = vector.multi_reduction <maximumf>, %552, %cst_174 [1] : vector<16x16xf32> to vector<16xf32>
    %554 = vector.shape_cast %553 : vector<16xf32> to vector<16x1xf32>
    %555 = vector.broadcast %554 : vector<16x1xf32> to vector<16x16xf32>
    %556 = arith.subf %552, %555 : vector<16x16xf32>
    %557 = math.exp %556 : vector<16x16xf32>
    %cst_175 = arith.constant dense<0.000000e+00> : vector<16xf32>
    %558 = vector.multi_reduction <add>, %557, %cst_175 [1] : vector<16x16xf32> to vector<16xf32>
    %559 = vector.shape_cast %558 : vector<16xf32> to vector<16x1xf32>
    %560 = tpu.reciprocal %559 {approx = true} : vector<16x1xf32> -> vector<16x1xf32>
    %561 = vector.broadcast %560 : vector<16x1xf32> to vector<16x16xf32>
    %562 = arith.mulf %557, %561 : vector<16x16xf32>
    %563 = vector.extract_strided_slice %545 {offsets = [0, 32], sizes = [16, 32], strides = [1, 1]} : vector<16x64xf32> to vector<16x32xf32>
    %564 = arith.truncf %562 : vector<16x16xf32> to vector<16x16xbf16>
    %565 = arith.truncf %563 : vector<16x32xf32> to vector<16x32xbf16>
    %cst_176 = arith.constant dense<0.000000e+00> : vector<16x32xf32>
    %566 = tpu.matmul %564, %565, %cst_176 {dimension_numbers = #tpu.dot_dimension_numbers<[1], [0], [0], [1], [0, 0, 1, 1], [], []>} : vector<16x16xbf16>, vector<16x32xbf16>, vector<16x32xf32> -> vector<16x32xf32>
    %c0_177 = arith.constant 0 : index
    %c1024 = arith.constant 1024 : index
    %567 = vector.load %arg6[%c0_177, %c1024] : memref<32x1776xbf16, #tpu.memory_space<vmem>>, vector<32x32xbf16>
    %568 = arith.truncf %566 : vector<16x32xf32> to vector<16x32xbf16>
    %cst_178 = arith.constant dense<0.000000e+00> : vector<16x32xf32>
    %569 = tpu.matmul %568, %567, %cst_178 {dimension_numbers = #tpu.dot_dimension_numbers<[1], [0], [0], [1], [0, 0, 1, 1], [], []>} : vector<16x32xbf16>, vector<32x32xbf16>, vector<16x32xf32> -> vector<16x32xf32>
    %570 = arith.addf %542, %569 : vector<16x32xf32>
    %571 = vector.extract_strided_slice %493 {offsets = [2, 0], sizes = [1, 32], strides = [1, 1]} : vector<6x32xf32> to vector<1x32xf32>
    %572 = vector.extract_strided_slice %493 {offsets = [3, 0], sizes = [1, 32], strides = [1, 1]} : vector<6x32xf32> to vector<1x32xf32>
    %cst_179 = arith.constant dense<0.000000e+00> : vector<16xf32>
    %573 = vector.multi_reduction <add>, %570, %cst_179 [1] : vector<16x32xf32> to vector<16xf32>
    %574 = vector.shape_cast %573 : vector<16xf32> to vector<16x1xf32>
    %cst_180 = arith.constant 3.200000e+01 : f32
    %575 = vector.broadcast %cst_180 : f32 to vector<16x1xf32>
    %576 = arith.divf %574, %575 : vector<16x1xf32>
    %577 = vector.broadcast %576 : vector<16x1xf32> to vector<16x32xf32>
    %578 = arith.subf %570, %577 : vector<16x32xf32>
    %579 = arith.mulf %578, %578 : vector<16x32xf32>
    %cst_181 = arith.constant dense<0.000000e+00> : vector<16xf32>
    %580 = vector.multi_reduction <add>, %579, %cst_181 [1] : vector<16x32xf32> to vector<16xf32>
    %581 = vector.shape_cast %580 : vector<16xf32> to vector<16x1xf32>
    %cst_182 = arith.constant 3.200000e+01 : f32
    %582 = vector.broadcast %cst_182 : f32 to vector<16x1xf32>
    %583 = arith.divf %581, %582 : vector<16x1xf32>
    %cst_183 = arith.constant 9.99999974E-6 : f32
    %584 = vector.broadcast %cst_183 : f32 to vector<16x1xf32>
    %585 = arith.addf %583, %584 : vector<16x1xf32>
    %586 = math.rsqrt %585 : vector<16x1xf32>
    %587 = vector.broadcast %586 : vector<16x1xf32> to vector<16x32xf32>
    %588 = arith.mulf %578, %587 : vector<16x32xf32>
    %589 = vector.broadcast %571 : vector<1x32xf32> to vector<16x32xf32>
    %590 = arith.mulf %588, %589 : vector<16x32xf32>
    %591 = vector.broadcast %572 : vector<1x32xf32> to vector<16x32xf32>
    %592 = arith.addf %590, %591 : vector<16x32xf32>
    %c0_184 = arith.constant 0 : index
    %c1056 = arith.constant 1056 : index
    %593 = vector.load %arg6[%c0_184, %c1056] : memref<32x1776xbf16, #tpu.memory_space<vmem>>, vector<32x128xbf16>
    %594 = arith.truncf %592 : vector<16x32xf32> to vector<16x32xbf16>
    %cst_185 = arith.constant dense<0.000000e+00> : vector<16x128xf32>
    %595 = tpu.matmul %594, %593, %cst_185 {dimension_numbers = #tpu.dot_dimension_numbers<[1], [0], [0], [1], [0, 0, 1, 1], [], []>} : vector<16x32xbf16>, vector<32x128xbf16>, vector<16x128xf32> -> vector<16x128xf32>
    %c76 = arith.constant 76 : index
    %c0_186 = arith.constant 0 : index
    %596 = vector.load %arg8[%c76, %c0_186] : memref<96x128xf32, #tpu.memory_space<vmem>>, vector<1x128xf32>
    %597 = vector.broadcast %596 : vector<1x128xf32> to vector<16x128xf32>
    %598 = arith.addf %595, %597 : vector<16x128xf32>
    %599 = arith.mulf %598, %598 : vector<16x128xf32>
    %600 = arith.mulf %598, %599 : vector<16x128xf32>
    %cst_187 = arith.constant 4.471500e-02 : f32
    %601 = vector.broadcast %cst_187 : f32 to vector<16x128xf32>
    %602 = arith.mulf %601, %600 : vector<16x128xf32>
    %603 = arith.addf %598, %602 : vector<16x128xf32>
    %cst_188 = arith.constant 0.797884583 : f32
    %604 = vector.broadcast %cst_188 : f32 to vector<16x128xf32>
    %605 = arith.mulf %604, %603 : vector<16x128xf32>
    %606 = math.tanh %605 : vector<16x128xf32>
    %cst_189 = arith.constant 1.000000e+00 : f32
    %607 = vector.broadcast %cst_189 : f32 to vector<16x128xf32>
    %608 = arith.addf %607, %606 : vector<16x128xf32>
    %cst_190 = arith.constant 5.000000e-01 : f32
    %609 = vector.broadcast %cst_190 : f32 to vector<16x128xf32>
    %610 = arith.mulf %609, %608 : vector<16x128xf32>
    %611 = arith.mulf %598, %610 : vector<16x128xf32>
    %c448 = arith.constant 448 : index
    %c0_191 = arith.constant 0 : index
    %612 = vector.load %arg7[%c448, %c0_191] : memref<704x32xbf16, #tpu.memory_space<vmem>>, vector<128x32xbf16>
    %613 = arith.truncf %611 : vector<16x128xf32> to vector<16x128xbf16>
    %cst_192 = arith.constant dense<0.000000e+00> : vector<16x32xf32>
    %614 = tpu.matmul %613, %612, %cst_192 {dimension_numbers = #tpu.dot_dimension_numbers<[1], [0], [0], [1], [0, 0, 1, 1], [], []>} : vector<16x128xbf16>, vector<128x32xbf16>, vector<16x32xf32> -> vector<16x32xf32>
    %c77 = arith.constant 77 : index
    %c0_193 = arith.constant 0 : index
    %615 = vector.load %arg8[%c77, %c0_193] : memref<96x128xf32, #tpu.memory_space<vmem>>, vector<1x32xf32>
    %616 = vector.broadcast %615 : vector<1x32xf32> to vector<16x32xf32>
    %617 = arith.addf %614, %616 : vector<16x32xf32>
    %618 = arith.addf %592, %617 : vector<16x32xf32>
    %619 = vector.extract_strided_slice %493 {offsets = [4, 0], sizes = [1, 32], strides = [1, 1]} : vector<6x32xf32> to vector<1x32xf32>
    %620 = vector.extract_strided_slice %493 {offsets = [5, 0], sizes = [1, 32], strides = [1, 1]} : vector<6x32xf32> to vector<1x32xf32>
    %cst_194 = arith.constant dense<0.000000e+00> : vector<16xf32>
    %621 = vector.multi_reduction <add>, %618, %cst_194 [1] : vector<16x32xf32> to vector<16xf32>
    %622 = vector.shape_cast %621 : vector<16xf32> to vector<16x1xf32>
    %cst_195 = arith.constant 3.200000e+01 : f32
    %623 = vector.broadcast %cst_195 : f32 to vector<16x1xf32>
    %624 = arith.divf %622, %623 : vector<16x1xf32>
    %625 = vector.broadcast %624 : vector<16x1xf32> to vector<16x32xf32>
    %626 = arith.subf %618, %625 : vector<16x32xf32>
    %627 = arith.mulf %626, %626 : vector<16x32xf32>
    %cst_196 = arith.constant dense<0.000000e+00> : vector<16xf32>
    %628 = vector.multi_reduction <add>, %627, %cst_196 [1] : vector<16x32xf32> to vector<16xf32>
    %629 = vector.shape_cast %628 : vector<16xf32> to vector<16x1xf32>
    %cst_197 = arith.constant 3.200000e+01 : f32
    %630 = vector.broadcast %cst_197 : f32 to vector<16x1xf32>
    %631 = arith.divf %629, %630 : vector<16x1xf32>
    %cst_198 = arith.constant 9.99999974E-6 : f32
    %632 = vector.broadcast %cst_198 : f32 to vector<16x1xf32>
    %633 = arith.addf %631, %632 : vector<16x1xf32>
    %634 = math.rsqrt %633 : vector<16x1xf32>
    %635 = vector.broadcast %634 : vector<16x1xf32> to vector<16x32xf32>
    %636 = arith.mulf %626, %635 : vector<16x32xf32>
    %637 = vector.broadcast %619 : vector<1x32xf32> to vector<16x32xf32>
    %638 = arith.mulf %636, %637 : vector<16x32xf32>
    %639 = vector.broadcast %620 : vector<1x32xf32> to vector<16x32xf32>
    %640 = arith.addf %638, %639 : vector<16x32xf32>
    %c78 = arith.constant 78 : index
    %c0_199 = arith.constant 0 : index
    %641 = vector.load %arg8[%c78, %c0_199] : memref<96x128xf32, #tpu.memory_space<vmem>>, vector<6x32xf32>
    %c0_200 = arith.constant 0 : index
    %c1184 = arith.constant 1184 : index
    %642 = vector.load %arg6[%c0_200, %c1184] : memref<32x1776xbf16, #tpu.memory_space<vmem>>, vector<32x96xbf16>
    %643 = arith.truncf %640 : vector<16x32xf32> to vector<16x32xbf16>
    %cst_201 = arith.constant dense<0.000000e+00> : vector<16x96xf32>
    %644 = tpu.matmul %643, %642, %cst_201 {dimension_numbers = #tpu.dot_dimension_numbers<[1], [0], [0], [1], [0, 0, 1, 1], [], []>} : vector<16x32xbf16>, vector<32x96xbf16>, vector<16x96xf32> -> vector<16x96xf32>
    %645 = vector.extract_strided_slice %644 {offsets = [0, 0], sizes = [16, 32], strides = [1, 1]} : vector<16x96xf32> to vector<16x32xf32>
    %646 = vector.extract_strided_slice %644 {offsets = [0, 32], sizes = [16, 32], strides = [1, 1]} : vector<16x96xf32> to vector<16x32xf32>
    %647 = vector.extract_strided_slice %644 {offsets = [0, 64], sizes = [16, 32], strides = [1, 1]} : vector<16x96xf32> to vector<16x32xf32>
    %648 = arith.truncf %645 : vector<16x32xf32> to vector<16x32xbf16>
    %649 = arith.truncf %646 : vector<16x32xf32> to vector<16x32xbf16>
    %cst_202 = arith.constant dense<0.000000e+00> : vector<16x16xf32>
    %650 = tpu.matmul %648, %649, %cst_202 {dimension_numbers = #tpu.dot_dimension_numbers<[1], [1], [0], [0], [0, 0, 1, 0], [], []>} : vector<16x32xbf16>, vector<16x32xbf16>, vector<16x16xf32> -> vector<16x16xf32>
    %651 = arith.addf %650, %196 : vector<16x16xf32>
    %cst_203 = arith.constant dense<0xFF800000> : vector<16xf32>
    %652 = vector.multi_reduction <maximumf>, %651, %cst_203 [1] : vector<16x16xf32> to vector<16xf32>
    %653 = vector.shape_cast %652 : vector<16xf32> to vector<16x1xf32>
    %654 = vector.broadcast %653 : vector<16x1xf32> to vector<16x16xf32>
    %655 = arith.subf %651, %654 : vector<16x16xf32>
    %656 = math.exp %655 : vector<16x16xf32>
    %cst_204 = arith.constant dense<0.000000e+00> : vector<16xf32>
    %657 = vector.multi_reduction <add>, %656, %cst_204 [1] : vector<16x16xf32> to vector<16xf32>
    %658 = vector.shape_cast %657 : vector<16xf32> to vector<16x1xf32>
    %659 = tpu.reciprocal %658 {approx = true} : vector<16x1xf32> -> vector<16x1xf32>
    %660 = vector.broadcast %659 : vector<16x1xf32> to vector<16x16xf32>
    %661 = arith.mulf %656, %660 : vector<16x16xf32>
    %662 = arith.truncf %661 : vector<16x16xf32> to vector<16x16xbf16>
    %663 = arith.truncf %647 : vector<16x32xf32> to vector<16x32xbf16>
    %cst_205 = arith.constant dense<0.000000e+00> : vector<16x32xf32>
    %664 = tpu.matmul %662, %663, %cst_205 {dimension_numbers = #tpu.dot_dimension_numbers<[1], [0], [0], [1], [0, 0, 1, 1], [], []>} : vector<16x16xbf16>, vector<16x32xbf16>, vector<16x32xf32> -> vector<16x32xf32>
    %c0_206 = arith.constant 0 : index
    %c1280 = arith.constant 1280 : index
    %665 = vector.load %arg6[%c0_206, %c1280] : memref<32x1776xbf16, #tpu.memory_space<vmem>>, vector<32x32xbf16>
    %666 = arith.truncf %664 : vector<16x32xf32> to vector<16x32xbf16>
    %cst_207 = arith.constant dense<0.000000e+00> : vector<16x32xf32>
    %667 = tpu.matmul %666, %665, %cst_207 {dimension_numbers = #tpu.dot_dimension_numbers<[1], [0], [0], [1], [0, 0, 1, 1], [], []>} : vector<16x32xbf16>, vector<32x32xbf16>, vector<16x32xf32> -> vector<16x32xf32>
    %668 = arith.addf %640, %667 : vector<16x32xf32>
    %669 = vector.extract_strided_slice %641 {offsets = [0, 0], sizes = [1, 32], strides = [1, 1]} : vector<6x32xf32> to vector<1x32xf32>
    %670 = vector.extract_strided_slice %641 {offsets = [1, 0], sizes = [1, 32], strides = [1, 1]} : vector<6x32xf32> to vector<1x32xf32>
    %cst_208 = arith.constant dense<0.000000e+00> : vector<16xf32>
    %671 = vector.multi_reduction <add>, %668, %cst_208 [1] : vector<16x32xf32> to vector<16xf32>
    %672 = vector.shape_cast %671 : vector<16xf32> to vector<16x1xf32>
    %cst_209 = arith.constant 3.200000e+01 : f32
    %673 = vector.broadcast %cst_209 : f32 to vector<16x1xf32>
    %674 = arith.divf %672, %673 : vector<16x1xf32>
    %675 = vector.broadcast %674 : vector<16x1xf32> to vector<16x32xf32>
    %676 = arith.subf %668, %675 : vector<16x32xf32>
    %677 = arith.mulf %676, %676 : vector<16x32xf32>
    %cst_210 = arith.constant dense<0.000000e+00> : vector<16xf32>
    %678 = vector.multi_reduction <add>, %677, %cst_210 [1] : vector<16x32xf32> to vector<16xf32>
    %679 = vector.shape_cast %678 : vector<16xf32> to vector<16x1xf32>
    %cst_211 = arith.constant 3.200000e+01 : f32
    %680 = vector.broadcast %cst_211 : f32 to vector<16x1xf32>
    %681 = arith.divf %679, %680 : vector<16x1xf32>
    %cst_212 = arith.constant 9.99999974E-6 : f32
    %682 = vector.broadcast %cst_212 : f32 to vector<16x1xf32>
    %683 = arith.addf %681, %682 : vector<16x1xf32>
    %684 = math.rsqrt %683 : vector<16x1xf32>
    %685 = vector.broadcast %684 : vector<16x1xf32> to vector<16x32xf32>
    %686 = arith.mulf %676, %685 : vector<16x32xf32>
    %687 = vector.broadcast %669 : vector<1x32xf32> to vector<16x32xf32>
    %688 = arith.mulf %686, %687 : vector<16x32xf32>
    %689 = vector.broadcast %670 : vector<1x32xf32> to vector<16x32xf32>
    %690 = arith.addf %688, %689 : vector<16x32xf32>
    %c0_213 = arith.constant 0 : index
    %c1344 = arith.constant 1344 : index
    %691 = vector.load %arg6[%c0_213, %c1344] : memref<32x1776xbf16, #tpu.memory_space<vmem>>, vector<32x64xbf16>
    %692 = arith.truncf %62 : vector<16x32xf32> to vector<16x32xbf16>
    %cst_214 = arith.constant dense<0.000000e+00> : vector<16x64xf32>
    %693 = tpu.matmul %692, %691, %cst_214 {dimension_numbers = #tpu.dot_dimension_numbers<[1], [0], [0], [1], [0, 0, 1, 1], [], []>} : vector<16x32xbf16>, vector<32x64xbf16>, vector<16x64xf32> -> vector<16x64xf32>
    %c0_215 = arith.constant 0 : index
    %c1312 = arith.constant 1312 : index
    %694 = vector.load %arg6[%c0_215, %c1312] : memref<32x1776xbf16, #tpu.memory_space<vmem>>, vector<32x32xbf16>
    %695 = arith.truncf %690 : vector<16x32xf32> to vector<16x32xbf16>
    %cst_216 = arith.constant dense<0.000000e+00> : vector<16x32xf32>
    %696 = tpu.matmul %695, %694, %cst_216 {dimension_numbers = #tpu.dot_dimension_numbers<[1], [0], [0], [1], [0, 0, 1, 1], [], []>} : vector<16x32xbf16>, vector<32x32xbf16>, vector<16x32xf32> -> vector<16x32xf32>
    %697 = vector.extract_strided_slice %693 {offsets = [0, 0], sizes = [16, 32], strides = [1, 1]} : vector<16x64xf32> to vector<16x32xf32>
    %698 = arith.truncf %696 : vector<16x32xf32> to vector<16x32xbf16>
    %699 = arith.truncf %697 : vector<16x32xf32> to vector<16x32xbf16>
    %cst_217 = arith.constant dense<0.000000e+00> : vector<16x16xf32>
    %700 = tpu.matmul %698, %699, %cst_217 {dimension_numbers = #tpu.dot_dimension_numbers<[1], [1], [0], [0], [0, 0, 1, 0], [], []>} : vector<16x32xbf16>, vector<16x32xbf16>, vector<16x16xf32> -> vector<16x16xf32>
    %cst_218 = arith.constant dense<0xFF800000> : vector<16xf32>
    %701 = vector.multi_reduction <maximumf>, %700, %cst_218 [1] : vector<16x16xf32> to vector<16xf32>
    %702 = vector.shape_cast %701 : vector<16xf32> to vector<16x1xf32>
    %703 = vector.broadcast %702 : vector<16x1xf32> to vector<16x16xf32>
    %704 = arith.subf %700, %703 : vector<16x16xf32>
    %705 = math.exp %704 : vector<16x16xf32>
    %cst_219 = arith.constant dense<0.000000e+00> : vector<16xf32>
    %706 = vector.multi_reduction <add>, %705, %cst_219 [1] : vector<16x16xf32> to vector<16xf32>
    %707 = vector.shape_cast %706 : vector<16xf32> to vector<16x1xf32>
    %708 = tpu.reciprocal %707 {approx = true} : vector<16x1xf32> -> vector<16x1xf32>
    %709 = vector.broadcast %708 : vector<16x1xf32> to vector<16x16xf32>
    %710 = arith.mulf %705, %709 : vector<16x16xf32>
    %711 = vector.extract_strided_slice %693 {offsets = [0, 32], sizes = [16, 32], strides = [1, 1]} : vector<16x64xf32> to vector<16x32xf32>
    %712 = arith.truncf %710 : vector<16x16xf32> to vector<16x16xbf16>
    %713 = arith.truncf %711 : vector<16x32xf32> to vector<16x32xbf16>
    %cst_220 = arith.constant dense<0.000000e+00> : vector<16x32xf32>
    %714 = tpu.matmul %712, %713, %cst_220 {dimension_numbers = #tpu.dot_dimension_numbers<[1], [0], [0], [1], [0, 0, 1, 1], [], []>} : vector<16x16xbf16>, vector<16x32xbf16>, vector<16x32xf32> -> vector<16x32xf32>
    %c0_221 = arith.constant 0 : index
    %c1408 = arith.constant 1408 : index
    %715 = vector.load %arg6[%c0_221, %c1408] : memref<32x1776xbf16, #tpu.memory_space<vmem>>, vector<32x32xbf16>
    %716 = arith.truncf %714 : vector<16x32xf32> to vector<16x32xbf16>
    %cst_222 = arith.constant dense<0.000000e+00> : vector<16x32xf32>
    %717 = tpu.matmul %716, %715, %cst_222 {dimension_numbers = #tpu.dot_dimension_numbers<[1], [0], [0], [1], [0, 0, 1, 1], [], []>} : vector<16x32xbf16>, vector<32x32xbf16>, vector<16x32xf32> -> vector<16x32xf32>
    %718 = arith.addf %690, %717 : vector<16x32xf32>
    %719 = vector.extract_strided_slice %641 {offsets = [2, 0], sizes = [1, 32], strides = [1, 1]} : vector<6x32xf32> to vector<1x32xf32>
    %720 = vector.extract_strided_slice %641 {offsets = [3, 0], sizes = [1, 32], strides = [1, 1]} : vector<6x32xf32> to vector<1x32xf32>
    %cst_223 = arith.constant dense<0.000000e+00> : vector<16xf32>
    %721 = vector.multi_reduction <add>, %718, %cst_223 [1] : vector<16x32xf32> to vector<16xf32>
    %722 = vector.shape_cast %721 : vector<16xf32> to vector<16x1xf32>
    %cst_224 = arith.constant 3.200000e+01 : f32
    %723 = vector.broadcast %cst_224 : f32 to vector<16x1xf32>
    %724 = arith.divf %722, %723 : vector<16x1xf32>
    %725 = vector.broadcast %724 : vector<16x1xf32> to vector<16x32xf32>
    %726 = arith.subf %718, %725 : vector<16x32xf32>
    %727 = arith.mulf %726, %726 : vector<16x32xf32>
    %cst_225 = arith.constant dense<0.000000e+00> : vector<16xf32>
    %728 = vector.multi_reduction <add>, %727, %cst_225 [1] : vector<16x32xf32> to vector<16xf32>
    %729 = vector.shape_cast %728 : vector<16xf32> to vector<16x1xf32>
    %cst_226 = arith.constant 3.200000e+01 : f32
    %730 = vector.broadcast %cst_226 : f32 to vector<16x1xf32>
    %731 = arith.divf %729, %730 : vector<16x1xf32>
    %cst_227 = arith.constant 9.99999974E-6 : f32
    %732 = vector.broadcast %cst_227 : f32 to vector<16x1xf32>
    %733 = arith.addf %731, %732 : vector<16x1xf32>
    %734 = math.rsqrt %733 : vector<16x1xf32>
    %735 = vector.broadcast %734 : vector<16x1xf32> to vector<16x32xf32>
    %736 = arith.mulf %726, %735 : vector<16x32xf32>
    %737 = vector.broadcast %719 : vector<1x32xf32> to vector<16x32xf32>
    %738 = arith.mulf %736, %737 : vector<16x32xf32>
    %739 = vector.broadcast %720 : vector<1x32xf32> to vector<16x32xf32>
    %740 = arith.addf %738, %739 : vector<16x32xf32>
    %c0_228 = arith.constant 0 : index
    %c1440 = arith.constant 1440 : index
    %741 = vector.load %arg6[%c0_228, %c1440] : memref<32x1776xbf16, #tpu.memory_space<vmem>>, vector<32x128xbf16>
    %742 = arith.truncf %740 : vector<16x32xf32> to vector<16x32xbf16>
    %cst_229 = arith.constant dense<0.000000e+00> : vector<16x128xf32>
    %743 = tpu.matmul %742, %741, %cst_229 {dimension_numbers = #tpu.dot_dimension_numbers<[1], [0], [0], [1], [0, 0, 1, 1], [], []>} : vector<16x32xbf16>, vector<32x128xbf16>, vector<16x128xf32> -> vector<16x128xf32>
    %c84 = arith.constant 84 : index
    %c0_230 = arith.constant 0 : index
    %744 = vector.load %arg8[%c84, %c0_230] : memref<96x128xf32, #tpu.memory_space<vmem>>, vector<1x128xf32>
    %745 = vector.broadcast %744 : vector<1x128xf32> to vector<16x128xf32>
    %746 = arith.addf %743, %745 : vector<16x128xf32>
    %747 = arith.mulf %746, %746 : vector<16x128xf32>
    %748 = arith.mulf %746, %747 : vector<16x128xf32>
    %cst_231 = arith.constant 4.471500e-02 : f32
    %749 = vector.broadcast %cst_231 : f32 to vector<16x128xf32>
    %750 = arith.mulf %749, %748 : vector<16x128xf32>
    %751 = arith.addf %746, %750 : vector<16x128xf32>
    %cst_232 = arith.constant 0.797884583 : f32
    %752 = vector.broadcast %cst_232 : f32 to vector<16x128xf32>
    %753 = arith.mulf %752, %751 : vector<16x128xf32>
    %754 = math.tanh %753 : vector<16x128xf32>
    %cst_233 = arith.constant 1.000000e+00 : f32
    %755 = vector.broadcast %cst_233 : f32 to vector<16x128xf32>
    %756 = arith.addf %755, %754 : vector<16x128xf32>
    %cst_234 = arith.constant 5.000000e-01 : f32
    %757 = vector.broadcast %cst_234 : f32 to vector<16x128xf32>
    %758 = arith.mulf %757, %756 : vector<16x128xf32>
    %759 = arith.mulf %746, %758 : vector<16x128xf32>
    %c576_235 = arith.constant 576 : index
    %c0_236 = arith.constant 0 : index
    %760 = vector.load %arg7[%c576_235, %c0_236] : memref<704x32xbf16, #tpu.memory_space<vmem>>, vector<128x32xbf16>
    %761 = arith.truncf %759 : vector<16x128xf32> to vector<16x128xbf16>
    %cst_237 = arith.constant dense<0.000000e+00> : vector<16x32xf32>
    %762 = tpu.matmul %761, %760, %cst_237 {dimension_numbers = #tpu.dot_dimension_numbers<[1], [0], [0], [1], [0, 0, 1, 1], [], []>} : vector<16x128xbf16>, vector<128x32xbf16>, vector<16x32xf32> -> vector<16x32xf32>
    %c85 = arith.constant 85 : index
    %c0_238 = arith.constant 0 : index
    %763 = vector.load %arg8[%c85, %c0_238] : memref<96x128xf32, #tpu.memory_space<vmem>>, vector<1x32xf32>
    %764 = vector.broadcast %763 : vector<1x32xf32> to vector<16x32xf32>
    %765 = arith.addf %762, %764 : vector<16x32xf32>
    %766 = arith.addf %740, %765 : vector<16x32xf32>
    %767 = vector.extract_strided_slice %641 {offsets = [4, 0], sizes = [1, 32], strides = [1, 1]} : vector<6x32xf32> to vector<1x32xf32>
    %768 = vector.extract_strided_slice %641 {offsets = [5, 0], sizes = [1, 32], strides = [1, 1]} : vector<6x32xf32> to vector<1x32xf32>
    %cst_239 = arith.constant dense<0.000000e+00> : vector<16xf32>
    %769 = vector.multi_reduction <add>, %766, %cst_239 [1] : vector<16x32xf32> to vector<16xf32>
    %770 = vector.shape_cast %769 : vector<16xf32> to vector<16x1xf32>
    %cst_240 = arith.constant 3.200000e+01 : f32
    %771 = vector.broadcast %cst_240 : f32 to vector<16x1xf32>
    %772 = arith.divf %770, %771 : vector<16x1xf32>
    %773 = vector.broadcast %772 : vector<16x1xf32> to vector<16x32xf32>
    %774 = arith.subf %766, %773 : vector<16x32xf32>
    %775 = arith.mulf %774, %774 : vector<16x32xf32>
    %cst_241 = arith.constant dense<0.000000e+00> : vector<16xf32>
    %776 = vector.multi_reduction <add>, %775, %cst_241 [1] : vector<16x32xf32> to vector<16xf32>
    %777 = vector.shape_cast %776 : vector<16xf32> to vector<16x1xf32>
    %cst_242 = arith.constant 3.200000e+01 : f32
    %778 = vector.broadcast %cst_242 : f32 to vector<16x1xf32>
    %779 = arith.divf %777, %778 : vector<16x1xf32>
    %cst_243 = arith.constant 9.99999974E-6 : f32
    %780 = vector.broadcast %cst_243 : f32 to vector<16x1xf32>
    %781 = arith.addf %779, %780 : vector<16x1xf32>
    %782 = math.rsqrt %781 : vector<16x1xf32>
    %783 = vector.broadcast %782 : vector<16x1xf32> to vector<16x32xf32>
    %784 = arith.mulf %774, %783 : vector<16x32xf32>
    %785 = vector.broadcast %767 : vector<1x32xf32> to vector<16x32xf32>
    %786 = arith.mulf %784, %785 : vector<16x32xf32>
    %787 = vector.broadcast %768 : vector<1x32xf32> to vector<16x32xf32>
    %788 = arith.addf %786, %787 : vector<16x32xf32>
    %789 = vector.extract_strided_slice %788 {offsets = [0, 0], sizes = [8, 32], strides = [1, 1]} : vector<16x32xf32> to vector<8x32xf32>
    %790 = vector.extract_strided_slice %788 {offsets = [8, 0], sizes = [8, 32], strides = [1, 1]} : vector<16x32xf32> to vector<8x32xf32>
    %c0_244 = arith.constant 0 : index
    %c1568 = arith.constant 1568 : index
    %791 = vector.load %arg6[%c0_244, %c1568] : memref<32x1776xbf16, #tpu.memory_space<vmem>>, vector<32x48xbf16>
    %792 = arith.truncf %790 : vector<8x32xf32> to vector<8x32xbf16>
    %cst_245 = arith.constant dense<0.000000e+00> : vector<8x48xf32>
    %793 = tpu.matmul %792, %791, %cst_245 {dimension_numbers = #tpu.dot_dimension_numbers<[1], [0], [0], [1], [0, 0, 1, 1], [], []>} : vector<8x32xbf16>, vector<32x48xbf16>, vector<8x48xf32> -> vector<8x48xf32>
    %794 = vector.extract_strided_slice %793 {offsets = [0, 0], sizes = [8, 16], strides = [1, 1]} : vector<8x48xf32> to vector<8x16xf32>
    %795 = vector.extract_strided_slice %793 {offsets = [0, 16], sizes = [8, 32], strides = [1, 1]} : vector<8x48xf32> to vector<8x32xf32>
    %c87 = arith.constant 87 : index
    %c0_246 = arith.constant 0 : index
    %796 = vector.load %arg8[%c87, %c0_246] : memref<96x128xf32, #tpu.memory_space<vmem>>, vector<1x32xf32>
    %797 = vector.broadcast %796 : vector<1x32xf32> to vector<8x32xf32>
    %798 = arith.addf %795, %797 : vector<8x32xf32>
    %c0_247 = arith.constant 0 : index
    %c1616 = arith.constant 1616 : index
    %799 = vector.load %arg6[%c0_247, %c1616] : memref<32x1776xbf16, #tpu.memory_space<vmem>>, vector<32x160xbf16>
    %800 = arith.truncf %789 : vector<8x32xf32> to vector<8x32xbf16>
    %cst_248 = arith.constant dense<0.000000e+00> : vector<8x160xf32>
    %801 = tpu.matmul %800, %799, %cst_248 {dimension_numbers = #tpu.dot_dimension_numbers<[1], [0], [0], [1], [0, 0, 1, 1], [], []>} : vector<8x32xbf16>, vector<32x160xbf16>, vector<8x160xf32> -> vector<8x160xf32>
    %802 = vector.extract_strided_slice %801 {offsets = [0, 0], sizes = [8, 32], strides = [1, 1]} : vector<8x160xf32> to vector<8x32xf32>
    %c86 = arith.constant 86 : index
    %c0_249 = arith.constant 0 : index
    %803 = vector.load %arg8[%c86, %c0_249] : memref<96x128xf32, #tpu.memory_space<vmem>>, vector<1x32xf32>
    %804 = vector.broadcast %803 : vector<1x32xf32> to vector<8x32xf32>
    %805 = arith.addf %802, %804 : vector<8x32xf32>
    %806 = vector.extract_strided_slice %801 {offsets = [0, 32], sizes = [8, 128], strides = [1, 1]} : vector<8x160xf32> to vector<8x128xf32>
    %c89 = arith.constant 89 : index
    %c0_250 = arith.constant 0 : index
    %807 = vector.load %arg8[%c89, %c0_250] : memref<96x128xf32, #tpu.memory_space<vmem>>, vector<1x128xf32>
    %808 = vector.broadcast %807 : vector<1x128xf32> to vector<8x128xf32>
    %809 = arith.addf %806, %808 : vector<8x128xf32>
    %810 = arith.mulf %809, %809 : vector<8x128xf32>
    %811 = arith.mulf %809, %810 : vector<8x128xf32>
    %cst_251 = arith.constant 4.471500e-02 : f32
    %812 = vector.broadcast %cst_251 : f32 to vector<8x128xf32>
    %813 = arith.mulf %812, %811 : vector<8x128xf32>
    %814 = arith.addf %809, %813 : vector<8x128xf32>
    %cst_252 = arith.constant 0.797884583 : f32
    %815 = vector.broadcast %cst_252 : f32 to vector<8x128xf32>
    %816 = arith.mulf %815, %814 : vector<8x128xf32>
    %817 = math.tanh %816 : vector<8x128xf32>
    %cst_253 = arith.constant 1.000000e+00 : f32
    %818 = vector.broadcast %cst_253 : f32 to vector<8x128xf32>
    %819 = arith.addf %818, %817 : vector<8x128xf32>
    %cst_254 = arith.constant 5.000000e-01 : f32
    %820 = vector.broadcast %cst_254 : f32 to vector<8x128xf32>
    %821 = arith.mulf %820, %819 : vector<8x128xf32>
    %822 = arith.mulf %809, %821 : vector<8x128xf32>
    %c88 = arith.constant 88 : index
    %c0_255 = arith.constant 0 : index
    %823 = vector.load %arg8[%c88, %c0_255] : memref<96x128xf32, #tpu.memory_space<vmem>>, vector<1x32xf32>
    %824 = tpu.concatenate %805, %823 in 0 : vector<8x32xf32>, vector<1x32xf32> -> vector<9x32xf32>
    %825 = arith.truncf %824 : vector<9x32xf32> to vector<9x32xbf16>
    %826 = arith.truncf %798 : vector<8x32xf32> to vector<8x32xbf16>
    %cst_256 = arith.constant dense<0.000000e+00> : vector<9x8xf32>
    %827 = tpu.matmul %825, %826, %cst_256 {dimension_numbers = #tpu.dot_dimension_numbers<[1], [1], [0], [0], [0, 0, 1, 0], [], []>} : vector<9x32xbf16>, vector<8x32xbf16>, vector<9x8xf32> -> vector<9x8xf32>
    %cst_257 = arith.constant 1.000000e+01 : f32
    %828 = vector.broadcast %cst_257 : f32 to vector<9x8xf32>
    %829 = arith.mulf %827, %828 : vector<9x8xf32>
    %830 = vector.extract_strided_slice %822 {offsets = [0, 0], sizes = [8, 64], strides = [1, 1]} : vector<8x128xf32> to vector<8x64xf32>
    %c64 = arith.constant 64 : index
    %c0_258 = arith.constant 0 : index
    %831 = vector.load %arg7[%c64, %c0_258] : memref<704x32xbf16, #tpu.memory_space<vmem>>, vector<64x32xbf16>
    %832 = arith.truncf %830 : vector<8x64xf32> to vector<8x64xbf16>
    %cst_259 = arith.constant dense<0.000000e+00> : vector<8x32xf32>
    %833 = tpu.matmul %832, %831, %cst_259 {dimension_numbers = #tpu.dot_dimension_numbers<[1], [0], [0], [1], [0, 0, 1, 1], [], []>} : vector<8x64xbf16>, vector<64x32xbf16>, vector<8x32xf32> -> vector<8x32xf32>
    %c90 = arith.constant 90 : index
    %c0_260 = arith.constant 0 : index
    %834 = vector.load %arg8[%c90, %c0_260] : memref<96x128xf32, #tpu.memory_space<vmem>>, vector<1x32xf32>
    %835 = vector.broadcast %834 : vector<1x32xf32> to vector<8x32xf32>
    %836 = arith.addf %833, %835 : vector<8x32xf32>
    %c91 = arith.constant 91 : index
    %c0_261 = arith.constant 0 : index
    %837 = vector.load %arg8[%c91, %c0_261] : memref<96x128xf32, #tpu.memory_space<vmem>>, vector<1x32xf32>
    %c92 = arith.constant 92 : index
    %c0_262 = arith.constant 0 : index
    %838 = vector.load %arg8[%c92, %c0_262] : memref<96x128xf32, #tpu.memory_space<vmem>>, vector<1x32xf32>
    %cst_263 = arith.constant dense<0.000000e+00> : vector<8xf32>
    %839 = vector.multi_reduction <add>, %836, %cst_263 [1] : vector<8x32xf32> to vector<8xf32>
    %840 = vector.shape_cast %839 : vector<8xf32> to vector<8x1xf32>
    %cst_264 = arith.constant 3.200000e+01 : f32
    %841 = vector.broadcast %cst_264 : f32 to vector<8x1xf32>
    %842 = arith.divf %840, %841 : vector<8x1xf32>
    %843 = vector.broadcast %842 : vector<8x1xf32> to vector<8x32xf32>
    %844 = arith.subf %836, %843 : vector<8x32xf32>
    %845 = arith.mulf %844, %844 : vector<8x32xf32>
    %cst_265 = arith.constant dense<0.000000e+00> : vector<8xf32>
    %846 = vector.multi_reduction <add>, %845, %cst_265 [1] : vector<8x32xf32> to vector<8xf32>
    %847 = vector.shape_cast %846 : vector<8xf32> to vector<8x1xf32>
    %cst_266 = arith.constant 3.200000e+01 : f32
    %848 = vector.broadcast %cst_266 : f32 to vector<8x1xf32>
    %849 = arith.divf %847, %848 : vector<8x1xf32>
    %cst_267 = arith.constant 9.99999974E-6 : f32
    %850 = vector.broadcast %cst_267 : f32 to vector<8x1xf32>
    %851 = arith.addf %849, %850 : vector<8x1xf32>
    %852 = math.rsqrt %851 : vector<8x1xf32>
    %853 = vector.broadcast %852 : vector<8x1xf32> to vector<8x32xf32>
    %854 = arith.mulf %844, %853 : vector<8x32xf32>
    %855 = vector.broadcast %837 : vector<1x32xf32> to vector<8x32xf32>
    %856 = arith.mulf %854, %855 : vector<8x32xf32>
    %857 = vector.broadcast %838 : vector<1x32xf32> to vector<8x32xf32>
    %858 = arith.addf %856, %857 : vector<8x32xf32>
    %859 = arith.mulf %858, %858 : vector<8x32xf32>
    %cst_268 = arith.constant dense<0.000000e+00> : vector<8xf32>
    %860 = vector.multi_reduction <add>, %859, %cst_268 [1] : vector<8x32xf32> to vector<8xf32>
    %861 = vector.shape_cast %860 : vector<8xf32> to vector<8x1xf32>
    %cst_269 = arith.constant 1.000000e-24 : f32
    %862 = vector.broadcast %cst_269 : f32 to vector<8x1xf32>
    %863 = arith.maximumf %861, %862 : vector<8x1xf32>
    %864 = math.rsqrt %863 : vector<8x1xf32>
    %865 = vector.broadcast %864 : vector<8x1xf32> to vector<8x32xf32>
    %866 = arith.mulf %858, %865 : vector<8x32xf32>
    %867 = vector.extract_strided_slice %822 {offsets = [0, 64], sizes = [8, 64], strides = [1, 1]} : vector<8x128xf32> to vector<8x64xf32>
    %c128_270 = arith.constant 128 : index
    %c0_271 = arith.constant 0 : index
    %868 = vector.load %arg7[%c128_270, %c0_271] : memref<704x32xbf16, #tpu.memory_space<vmem>>, vector<64x32xbf16>
    %869 = arith.truncf %867 : vector<8x64xf32> to vector<8x64xbf16>
    %cst_272 = arith.constant dense<0.000000e+00> : vector<8x32xf32>
    %870 = tpu.matmul %869, %868, %cst_272 {dimension_numbers = #tpu.dot_dimension_numbers<[1], [0], [0], [1], [0, 0, 1, 1], [], []>} : vector<8x64xbf16>, vector<64x32xbf16>, vector<8x32xf32> -> vector<8x32xf32>
    %c93 = arith.constant 93 : index
    %c0_273 = arith.constant 0 : index
    %871 = vector.load %arg8[%c93, %c0_273] : memref<96x128xf32, #tpu.memory_space<vmem>>, vector<1x32xf32>
    %872 = vector.broadcast %871 : vector<1x32xf32> to vector<8x32xf32>
    %873 = arith.addf %870, %872 : vector<8x32xf32>
    %c94 = arith.constant 94 : index
    %c0_274 = arith.constant 0 : index
    %874 = vector.load %arg8[%c94, %c0_274] : memref<96x128xf32, #tpu.memory_space<vmem>>, vector<1x32xf32>
    %c95 = arith.constant 95 : index
    %c0_275 = arith.constant 0 : index
    %875 = vector.load %arg8[%c95, %c0_275] : memref<96x128xf32, #tpu.memory_space<vmem>>, vector<1x32xf32>
    %cst_276 = arith.constant dense<0.000000e+00> : vector<8xf32>
    %876 = vector.multi_reduction <add>, %873, %cst_276 [1] : vector<8x32xf32> to vector<8xf32>
    %877 = vector.shape_cast %876 : vector<8xf32> to vector<8x1xf32>
    %cst_277 = arith.constant 3.200000e+01 : f32
    %878 = vector.broadcast %cst_277 : f32 to vector<8x1xf32>
    %879 = arith.divf %877, %878 : vector<8x1xf32>
    %880 = vector.broadcast %879 : vector<8x1xf32> to vector<8x32xf32>
    %881 = arith.subf %873, %880 : vector<8x32xf32>
    %882 = arith.mulf %881, %881 : vector<8x32xf32>
    %cst_278 = arith.constant dense<0.000000e+00> : vector<8xf32>
    %883 = vector.multi_reduction <add>, %882, %cst_278 [1] : vector<8x32xf32> to vector<8xf32>
    %884 = vector.shape_cast %883 : vector<8xf32> to vector<8x1xf32>
    %cst_279 = arith.constant 3.200000e+01 : f32
    %885 = vector.broadcast %cst_279 : f32 to vector<8x1xf32>
    %886 = arith.divf %884, %885 : vector<8x1xf32>
    %cst_280 = arith.constant 9.99999974E-6 : f32
    %887 = vector.broadcast %cst_280 : f32 to vector<8x1xf32>
    %888 = arith.addf %886, %887 : vector<8x1xf32>
    %889 = math.rsqrt %888 : vector<8x1xf32>
    %890 = vector.broadcast %889 : vector<8x1xf32> to vector<8x32xf32>
    %891 = arith.mulf %881, %890 : vector<8x32xf32>
    %892 = vector.broadcast %874 : vector<1x32xf32> to vector<8x32xf32>
    %893 = arith.mulf %891, %892 : vector<8x32xf32>
    %894 = vector.broadcast %875 : vector<1x32xf32> to vector<8x32xf32>
    %895 = arith.addf %893, %894 : vector<8x32xf32>
    %896 = arith.mulf %895, %895 : vector<8x32xf32>
    %cst_281 = arith.constant dense<0.000000e+00> : vector<8xf32>
    %897 = vector.multi_reduction <add>, %896, %cst_281 [1] : vector<8x32xf32> to vector<8xf32>
    %898 = vector.shape_cast %897 : vector<8xf32> to vector<8x1xf32>
    %cst_282 = arith.constant 1.000000e-24 : f32
    %899 = vector.broadcast %cst_282 : f32 to vector<8x1xf32>
    %900 = arith.maximumf %898, %899 : vector<8x1xf32>
    %901 = math.rsqrt %900 : vector<8x1xf32>
    %902 = vector.broadcast %901 : vector<8x1xf32> to vector<8x32xf32>
    %903 = arith.mulf %895, %902 : vector<8x32xf32>
    %cst_283 = arith.constant dense<0.000000e+00> : vector<8xf32>
    %904 = vector.multi_reduction <add>, %64, %cst_283 [1] : vector<8x4xf32> to vector<8xf32>
    %905 = vector.shape_cast %904 : vector<8xf32> to vector<8x1xf32>
    %cst_284 = arith.constant 0.000000e+00 : f32
    %906 = vector.broadcast %cst_284 : f32 to vector<8x1xf32>
    %907 = arith.cmpf one, %905, %906 : vector<8x1xf32>
    %908 = arith.extui %907 : vector<8x1xi1> to vector<8x1xi32>
    %909 = arith.sitofp %908 : vector<8x1xi32> to vector<8x1xf32>
    %910 = tpu.iota {dimensions = array<i32: 0>} : vector<8x8xi32>
    %911 = tpu.iota {dimensions = array<i32: 1>} : vector<8x8xi32>
    %912 = arith.cmpi ne, %910, %911 : vector<8x8xi32>
    %913 = arith.extui %912 : vector<8x8xi1> to vector<8x8xi32>
    %914 = arith.sitofp %913 : vector<8x8xi32> to vector<8x8xf32>
    %915 = vector.broadcast %909 : vector<8x1xf32> to vector<8x32xf32>
    %916 = arith.mulf %866, %915 : vector<8x32xf32>
    %917 = vector.broadcast %909 : vector<8x1xf32> to vector<8x32xf32>
    %918 = arith.mulf %903, %917 : vector<8x32xf32>
    %919 = arith.truncf %916 : vector<8x32xf32> to vector<8x32xbf16>
    %920 = arith.truncf %916 : vector<8x32xf32> to vector<8x32xbf16>
    %cst_285 = arith.constant dense<0.000000e+00> : vector<8x8xf32>
    %921 = tpu.matmul %919, %920, %cst_285 {dimension_numbers = #tpu.dot_dimension_numbers<[1], [1], [0], [0], [0, 0, 1, 0], [], []>} : vector<8x32xbf16>, vector<8x32xbf16>, vector<8x8xf32> -> vector<8x8xf32>
    %922 = arith.mulf %921, %914 : vector<8x8xf32>
    %923 = arith.truncf %918 : vector<8x32xf32> to vector<8x32xbf16>
    %924 = arith.truncf %918 : vector<8x32xf32> to vector<8x32xbf16>
    %cst_286 = arith.constant dense<0.000000e+00> : vector<8x8xf32>
    %925 = tpu.matmul %923, %924, %cst_286 {dimension_numbers = #tpu.dot_dimension_numbers<[1], [1], [0], [0], [0, 0, 1, 0], [], []>} : vector<8x32xbf16>, vector<8x32xbf16>, vector<8x8xf32> -> vector<8x8xf32>
    %926 = arith.mulf %925, %914 : vector<8x8xf32>
    %cst_287 = arith.constant 0.000000e+00 : f32
    %927 = vector.broadcast %cst_287 : f32 to vector<8x16xf32>
    %928 = tpu.concatenate %794, %927 in 0 : vector<8x16xf32>, vector<8x16xf32> -> vector<16x16xf32>
    %cst_288 = arith.constant 0.000000e+00 : f32
    %929 = vector.broadcast %cst_288 : f32 to vector<7x8xf32>
    %930 = tpu.concatenate %829, %929 in 0 : vector<9x8xf32>, vector<7x8xf32> -> vector<16x8xf32>
    %cst_289 = arith.constant 0.000000e+00 : f32
    %931 = vector.broadcast %cst_289 : f32 to vector<8x8xf32>
    %932 = tpu.concatenate %922, %931 in 0 : vector<8x8xf32>, vector<8x8xf32> -> vector<16x8xf32>
    %cst_290 = arith.constant 0.000000e+00 : f32
    %933 = vector.broadcast %cst_290 : f32 to vector<8x8xf32>
    %934 = tpu.concatenate %926, %933 in 0 : vector<8x8xf32>, vector<8x8xf32> -> vector<16x8xf32>
    %cst_291 = arith.constant 0.000000e+00 : f32
    %935 = vector.broadcast %cst_291 : f32 to vector<16x88xf32>
    %936 = tpu.concatenate %928, %930, %932, %934, %935 in 1 : vector<16x16xf32>, vector<16x8xf32>, vector<16x8xf32>, vector<16x8xf32>, vector<16x88xf32> -> vector<16x128xf32>
    %c0_292 = arith.constant 0 : index
    %c0_293 = arith.constant 0 : index
    %c0_294 = arith.constant 0 : index
    %937 = vector.load %arg9[%c0_292, %c0_293, %c0_294] : memref<1x16x128xf32, #tpu.memory_space<vmem>>, vector<1x16x128xf32>
    %938 = vector.shape_cast %937 : vector<1x16x128xf32> to vector<16x128xf32>
    %939 = vector.shape_cast %936 : vector<16x128xf32> to vector<1x16x128xf32>
    tpu.vector_store %arg9[%c0_292, %c0_293, %c0_294], %939 {strides = array<i32>} : memref<1x16x128xf32, #tpu.memory_space<vmem>>, vector<1x16x128xf32>,
    return
  }
  func.func @transform_0(%arg0: i32, %arg1: memref<2x8xi32, #tpu.memory_space<smem>>) -> (i32, i32, i32) {
    %c0_i32 = arith.constant 0 : i32
    %c0_i32_0 = arith.constant 0 : i32
    %c0_i32_1 = arith.constant 0 : i32
    return %arg0, %c0_i32, %c0_i32_0 : i32, i32, i32
  }
  func.func @transform_1(%arg0: i32, %arg1: memref<2x8xi32, #tpu.memory_space<smem>>) -> (i32, i32, i32) {
    %c0_i32 = arith.constant 0 : i32
    %c0_i32_0 = arith.constant 0 : i32
    %c0_i32_1 = arith.constant 0 : i32
    return %arg0, %c0_i32, %c0_i32_0 : i32, i32, i32
  }
  func.func @transform_2(%arg0: i32, %arg1: memref<2x8xi32, #tpu.memory_space<smem>>) -> (i32, i32) {
    %c0_i32 = arith.constant 0 : i32
    %c0_i32_0 = arith.constant 0 : i32
    %c0_i32_1 = arith.constant 0 : i32
    return %c0_i32, %c0_i32_0 : i32, i32
  }
  func.func @transform_3(%arg0: i32, %arg1: memref<2x8xi32, #tpu.memory_space<smem>>) -> (i32, i32) {
    %c0_i32 = arith.constant 0 : i32
    %c0_i32_0 = arith.constant 0 : i32
    %c0_i32_1 = arith.constant 0 : i32
    return %c0_i32, %c0_i32_0 : i32, i32
  }
  func.func @transform_4(%arg0: i32, %arg1: memref<2x8xi32, #tpu.memory_space<smem>>) -> (i32, i32) {
    %c0_i32 = arith.constant 0 : i32
    %c0_i32_0 = arith.constant 0 : i32
    %c0_i32_1 = arith.constant 0 : i32
    return %c0_i32, %c0_i32_0 : i32, i32
  }
  func.func @transform_5(%arg0: i32, %arg1: memref<2x8xi32, #tpu.memory_space<smem>>) -> (i32, i32) {
    %c0_i32 = arith.constant 0 : i32
    %c0_i32_0 = arith.constant 0 : i32
    %c0_i32_1 = arith.constant 0 : i32
    return %c0_i32, %c0_i32_0 : i32, i32
  }
  func.func @transform_6(%arg0: i32, %arg1: memref<2x8xi32, #tpu.memory_space<smem>>) -> (i32, i32) {
    %c0_i32 = arith.constant 0 : i32
    %c0_i32_0 = arith.constant 0 : i32
    %c0_i32_1 = arith.constant 0 : i32
    return %c0_i32, %c0_i32_0 : i32, i32
  }
  func.func @transform_7(%arg0: i32, %arg1: memref<2x8xi32, #tpu.memory_space<smem>>) -> (i32, i32, i32) {
    %c0_i32 = arith.constant 0 : i32
    %c0_i32_0 = arith.constant 0 : i32
    %c0_i32_1 = arith.constant 0 : i32
    return %arg0, %c0_i32, %c0_i32_0 : i32, i32, i32
  }
}

</mosaic_0001>

<bundles_post_ra>
// kernel: tflop_forward.1
= control target key start
LH: loop header
LB: loop body
LE: loop exit
PB: predicated region body
PF: predicated region fallthrough
CT: control target
= control target key end

     0   :  { %s4623_s30 = smov [#allocation3]   ;;  %s5798_s0 = inlined_call_operand.vmem [shape: s32[2,8], index: 0, kind: input, shape index: {}]   ;;  %s5799_s1 = inlined_call_operand.vmem [shape: f32[2,16,192], index: 1, kind: input, shape index: {}]   ;;  %s5800_s2 = inlined_call_operand.vmem [shape: f32[2,8,4], index: 2, kind: input, shape index: {}]   ;;  %s5801_s3 = inlined_call_operand.vmem [shape: bf16[192,48], index: 3, kind: input, shape index: {}]   ;;  %s5802_s4 = inlined_call_operand.vmem [shape: bf16[48,64], index: 4, kind: input, shape index: {}]   ;;  %s5803_s5 = inlined_call_operand.vmem [shape: bf16[32,1776], index: 5, kind: input, shape index: {}]   ;;  %s5804_s6 = inlined_call_operand.vmem [shape: bf16[704,32], index: 6, kind: input, shape index: {}]   ;;  %s5805_s7 = inlined_call_operand.vmem [shape: f32[96,128], index: 7, kind: input, shape index: {}]   ;;  %s5806_s8 = inlined_call_operand.vmem [shape: f32[2,16,128], index: 8, kind: output, shape index: {}]  }
   0x1   :  { %s14_s29 = sshll.u32 %s5798_s0, 4  ;;  %s15_s29 = int_to_ptr.vmem [resolvable:$true] %s14_s29 }
   0x2   :  { %17 = dma.vmem_to_smem %s15_s29, 32, %s4623_s30, [#allocation2] }
   0x3   :  { %4617 = dma.done.wait [#allocation2], 32 }
   0x4   :  { %4618 = vsyncadd [#allocation2], 4294967264 }
   0x5   :  { %20 = sfence }
   0x6   :  { %s4688_s9 = smov 0  }
   0x7 LB: > { %s4694_s10 = sadd.s32 4294967295, %s4621_s9   ;;  %p3790_p0 = scmp.ge.s32.totalorder %s4621_s9, 1  ;;  %s4621_s9 = sphi %s4688_s9, %s26_s9  }
   0x8   : > { %p255_p1 = scmp.lt.s32.totalorder %s4621_s9, 3 }
   0xa   : > { %p256_p2 = pnand %p3790_p0, %p255_p1 }
   0xb   : > { %p291_p3 = scmp.lt.s32.totalorder (!%p256_p2), %s4694_s10, 1  ;;  %s4635_s11 = smov (!%p256_p2), 48  }
   0xc   : > { %259 = sbr.rel (%p256_p2) target bundleno = 14123 (0x372b), region = 48 }
  0x11   : > { %v4284_v0 = vld [vmem:[%s5801_s3 + $0x38] sm:$0xff]  ;;  %v4283_v2 = vld [vmem:[%s5801_s3 + $0x30] sm:$0xff]  ;;  %s4709_s16 = scalar_select %p291_p3, %s4694_s10, 1  ;;  %v4282_v4 = vld [vmem:[%s5801_s3 + $0x28] sm:$0xff]  ;;  %vm410_vm0 = vcmask 523264   ;;  %vm469_vm1 = vcmask 392192  }
  0x12   : > { %v4288_v1 = vld [vmem:[%s5801_s3 + $0x58] sm:$0xff]  ;;  %414 = vmatpush.bf16.msra.mxu0 %v4284_v0  ;;  %v4287_v3 = vld [vmem:[%s5801_s3 + $0x50] sm:$0xff]  ;;  %v4286_v5 = vld [vmem:[%s5801_s3 + $0x48] sm:$0xff]  ;;  %vm559_vm2 = vcmask 261120   ;;  %vm784_vm4 = vcmask 1040384   ;;  %vm786_vm5 = vcmask 1041408  }
  0x13   : > { %432 = vmatpush.bf16.msra.mxu1 %v4288_v1  ;;  %s4275_s19 = sshll.u32 %s4709_s16, 5  ;;  %v4281_v6 = vld [vmem:[%s5801_s3 + $0x20] sm:$0xff]  ;;  %v4280_v10 = vld [vmem:[%s5801_s3 + $0x18] sm:$0xff]  ;;  %v4279_v12 = vld [vmem:[%s5801_s3 + $0x10] sm:$0xff]  ;;  %vm788_vm6 = vcmask 1042432   ;;  %vm790_vm7 = vcmask 1043456  }
  0x14   : > { %s295_s24 = scalar_lea.vmem %s5799_s1, %s4275_s19  ;;  %v4285_v7 = vld [vmem:[%s5801_s3 + $0x40] sm:$0xff]  ;;  %v4278_v13 = vld [vmem:[%s5801_s3 + $0x8] sm:$0xff]  ;;  %v4291_v18 = vld [vmem:[%s5802_s4 + $0x10] sm:$0xff]  ;;  %s3884_s19 = sshll.u32 %s4694_s10, 7  ;;  %vm792_vm8 = vcmask 1044480   ;;  %vm794_vm9 = vcmask 1045504  }
  0x15   : > { %v307_v8 = vld [vmem:[%s295_s24 + $0x8] sm:$0xff]  ;;  %v309_v9 = vld [vmem:[%s295_s24 + $0x18] sm:$0xff]  ;;  %v4277_v14 = vld [vmem:[%s5801_s3] sm:$0xff]  ;;  %478 = vmatpush.bf16.msra.mxu2 %v4291_v18  ;;  %s766_s20 = sadd.s32 1, %s3884_s19  ;;  %s769_s21 = sadd.s32 2, %s3884_s19  ;;  %vm796_vm10 = vcmask 1046528  }
  0x16   : > { %415 = vmatpush.bf16.msra.mxu0 %v4283_v2  ;;  %v335_v11 = vpack.c.bf16 %v309_v9, %v307_v8  ;;  %v306_v15 = vld [vmem:[%s295_s24] sm:$0xff]  ;;  %v308_v16 = vld [vmem:[%s295_s24 + $0x10] sm:$0xff]  ;;  %v4290_v19 = vld [vmem:[%s5802_s4 + $0x8] sm:$0xff]  ;;  %v4624_v2 = vmov 32.0   ;;  %s4792_s22 = sld [smem:[#allocation3 + %s3884_s19]]  ;;  %s772_s23 = sadd.s32 3, %s3884_s19 }
  0x17   : > { %433 = vmatpush.bf16.msra.mxu1 %v4287_v3  ;;  %v334_v17 = vpack.c.bf16 %v308_v16, %v306_v15  ;;  %v4289_v20 = vld [vmem:[%s5802_s4] sm:$0xff]  ;;  %v4295_v31 = vld [vmem:[%s5804_s6 + $0x18] sm:$0xff]  ;;  %v4294_v32 = vld [vmem:[%s5804_s6 + $0x10] sm:$0xff]  ;;  %s4795_s25 = sld [smem:[#allocation3 + %s766_s20]]  ;;  %s775_s24 = sadd.s32 4, %s3884_s19 }
  0x18   : > { %v4412_v23 = vld [vmem:[%s5805_s7] ss:$0 sm:$0xff]  ;;  %547 = vmatpush.bf16.msra.mxu3 %v4295_v31  ;;  %v4293_v33 = vld [vmem:[%s5804_s6 + $0x8] sm:$0xff]  ;;  %v4413_v34 = vld [vmem:[%s5805_s7 + $0x1] ss:$0 sm:$0xff]  ;;  %s4797_s26 = sld [smem:[#allocation3 + %s769_s21]] }
  0x19   : > { %479 = vmatpush.bf16.msra.mxu2 %v4290_v19  ;;  %v4292_v35 = vld [vmem:[%s5804_s6] sm:$0xff]  ;;  %s778_s27 = sadd.s32 5, %s3884_s19  ;;  %s4799_s28 = sld [smem:[#allocation3 + %s772_s23]] }
  0x1a   : > { %416 = vmatpush.bf16.msra.mxu0 %v4282_v4  ;;  %v4414_v59 = vld [vmem:[%s5805_s7 + $0x2] ss:$0 sm:$0xff]  ;;  %s781_s10 = sadd.s32 6, %s3884_s19  ;;  %s4801_s29 = sld [smem:[#allocation3 + %s775_s24]] }
  0x1b   : > { %434 = vmatpush.bf16.msra.mxu1 %v4286_v5  ;;  %s4803_s30 = sld [smem:[#allocation3 + %s778_s27]]  ;;  %s3793_s27 = sshll.u32 %s4709_s16, 3 }
  0x1c   : > { %548 = vmatpush.bf16.msra.mxu3 %v4294_v32  ;;  %s4805_s0 = sld [smem:[#allocation3 + %s781_s10]]  ;;  %s4870_s12 = scalar_lea.vmem %s5800_s2, %s3793_s27 }
  0x1d   : > { %480 = vmatpush.bf16.msra.mxu2 %v4289_v20  ;;  %s4631_s19 = smov 96   ;;  %s4637_s21 = smov 16  }
  0x1e   : > { %417 = vmatpush.bf16.msra.mxu0 %v4281_v6  ;;  %s4638_s10 = smov 112   ;;  %s4276_s17 = sshll.u32 %s4709_s16, 4 }
  0x1f   : > { %435 = vmatpush.bf16.msra.mxu1 %v4285_v7 }
  0x20   : > { %549 = vmatpush.bf16.msra.mxu3 %v4293_v33  ;;  %v777_v33 = vstv %s4801_s29 }
  0x22   : > { %418 = vmatpush.bf16.msra.mxu0 %v4280_v10  ;;  %3844 = vmatmul.msk.bf16.vlgmr.msra.gmra.mxu1 %vm410_vm0, %v335_v11 }
  0x24   : > { %550 = vmatpush.bf16.msra.mxu3 %v4292_v35  ;;  %v780_v35 = vstv %s4803_s30  ;;  %s4636_s30 = smov 32  }
  0x26   : > { %419 = vmatpush.bf16.msra.mxu0 %v4279_v12 }
  0x2a   : > { %420 = vmatpush.bf16.msra.mxu0 %v4278_v13 }
  0x2e   : > { %421 = vmatpush.bf16.msra.mxu0 %v4277_v14 }
  0x31   : > { %422 = vmatmul.bf16.vlgmr.msra.gmra.mxu0 %v334_v17 }
  0x9f   : > { %v437_v21 = vpop.f32.mrf.mxu1 }
  0xa7   : > { %v439_v27 = vpop.f32.mrf.mxu1 }
  0xae   : > { %v423_v22 = vpop.f32.mrf.mxu0 }
  0xaf   : > { %v424_v24 = vadd.f32 %v4412_v23, %v423_v22 }
  0xb1   : > { %v438_v28 = vadd.f32 %v437_v21, %v424_v24 }
  0xb6   : > { %v425_v25 = vpop.f32.mrf.mxu0 }
  0xb7   : > { %v426_v26 = vadd.f32 %v4412_v23, %v425_v25  ;;  %v765_v23 = vstv %s4792_s22  ;;  %v4625_v25 = vmov 0   ;;  %s4633_s22 = smov 8  }
  0xb8   : > { %4407 = vset.pattern.permute.xlu0 %v4625_v25  ;;  %4408 = vset.pattern.permute.xlu1 %v4625_v25  ;;  %v785_v31 = vsel %vm784_vm4, 1, %v765_v23  ;;  %v819_v25 = vld [vmem:[%s5805_s7 + $0x1c] sm:$0xff] }
  0xb9   : > { %v440_v29 = vadd.f32 %v439_v27, %v426_v26  ;;  %v768_v26 = vstv %s4795_s25  ;;  %v771_v27 = vstv %s4797_s26  ;;  %s4634_s25 = smov 64  }
  0xbb   : > { %v448_v30 = vpack.c.bf16 %v440_v29, %v438_v28 }
  0xbd   : > { %3857 = vmatmul.msk.bf16.vlgmr.msra.gmra.mxu2 %vm469_vm1, %v448_v30  ;;  %v774_v30 = vstv %s4799_s28 }
 0x140   : > { %v482_v36 = vpop.f32.mrf.mxu2 }
 0x141   : > { %v483_v37 = vadd.f32 %v4413_v34, %v482_v36 }
 0x143   : > { %v487_v38 = vmul.f32 %v483_v37, %v483_v37 }
 0x145   : > { %v489_v39 = vmul.f32 %v487_v38, %v483_v37  ;;  %v783_v38 = vstv %s4805_s0 }
 0x147   : > { %v491_v40 = vmul.f32 0.044715, %v489_v39 }
 0x148   : > { %v484_v41 = vpop.f32.mrf.mxu2 }
 0x149   : > { %v493_v42 = vadd.f32 %v491_v40, %v483_v37  ;;  %v485_v43 = vadd.f32 %v4413_v34, %v484_v41  ;;  %v787_v34 = vsel %vm786_vm5, %v785_v31, %v768_v26 }
 0x14a   : > { %v789_v36 = vsel %vm788_vm6, %v787_v34, %v771_v27 }
 0x14b   : > { %v495_v44 = vmul.f32 0.7978846, %v493_v42  ;;  %v488_v45 = vmul.f32 %v485_v43, %v485_v43  ;;  %v791_v39 = vsel %vm790_vm7, %v789_v36, %v774_v30  ;;  %v4627_v36 = vmov 1  }
 0x14c   : > { %v793_v40 = vsel %vm792_vm8, %v791_v39, %v777_v33  ;;  %4409 = vset.pattern.permute.xlu2 %v4627_v36  ;;  %v4628_v39 = vmov 0.0  }
 0x14d   : > { %v490_v46 = vmul.f32 %v488_v45, %v485_v43  ;;  %4438 = vtanh.f32 %v495_v44  ;;  %v795_v42 = vsel %vm794_vm9, %v793_v40, %v780_v35 }
 0x14f   : > { %v492_v47 = vmul.f32 0.044715, %v490_v46 }
 0x151   : > { %v494_v48 = vadd.f32 %v492_v47, %v485_v43 }
 0x153   : > { %v496_v49 = vmul.f32 0.7978846, %v494_v48  ;;  %v4439_v50 = vpop.eup %4438  ;;  %v4415_v48 = vld [vmem:[%s5805_s7 + $0x3] ss:$0 sm:$0xff] }
 0x154   : > { %v499_v51 = vadd.f32 1.0, %v4439_v50 }
 0x155   : > { %4440 = vtanh.f32 %v496_v49 }
 0x156   : > { %v501_v54 = vmul.f32 0.5, %v499_v51  ;;  %4442 = vrcp.f32 %v4624_v2 }
 0x158   : > { %v503_v56 = vmul.f32 %v501_v54, %v483_v37 }
 0x15b   : > { %v4441_v52 = vpop.eup %4440 }
 0x15c   : > { %v500_v53 = vadd.f32 1.0, %v4441_v52  ;;  %v4443_v3 = vpop.eup %4442  ;;  %v4416_v52 = vld [vmem:[%s5805_s7 + $0x4] ss:$0 sm:$0xff] }
 0x15d   : > { %v567_v4 = vmul.f32 32.0, %v4443_v3  ;;  %vm571_vm3 = vweird.f32 %v4443_v3 }
 0x15e   : > { %v502_v55 = vmul.f32 0.5, %v500_v53 }
 0x15f   : > { %v568_v5 = vsub.f32 1.0, %v567_v4  ;;  %v3881_v4 = vld [vmem:[%s5803_s5 + $0x70] sm:$0xf] }
 0x160   : > { %v504_v57 = vmul.f32 %v502_v55, %v485_v43  ;;  %v797_v43 = vsel %vm796_vm10, %v795_v42, %v783_v38  ;;  %vm824_vm10 = vcmask 130048  }
 0x161   : > { %v569_v6 = vmul.f32 %v4443_v3, %v568_v5  ;;  %v4297_v5 = vld [vmem:[%s5803_s5 + $0xa4] sm:$0xf0] }
 0x162   : > { %v513_v58 = vpack.c.bf16 %v504_v57, %v503_v56 }
 0x163   : > { %v570_v7 = vadd.f32 %v4443_v3, %v569_v6  ;;  %v3877_v6 = vld [vmem:[%s5803_s5] sm:$0xf] }
 0x164   : > { %3874 = vmatmul.msk.bf16.vlgmr.msra.gmra.mxu3 %vm410_vm0, %v513_v58 }
 0x165   : > { %v4777_v8 = vsel %vm571_vm3, %v4443_v3, %v570_v7  ;;  %v4857_v7 = vor.u32 %v4297_v5, %v3881_v4 }
 0x167   : > { %695 = vmatpush.bf16.msrb.mxu2 %v4857_v7 }
 0x1e7   : > { %v552_v60 = vpop.f32.mrf.mxu3 }
 0x1e8   : > { %v553_v61 = vadd.f32 %v4414_v59, %v552_v60 }
 0x1ea   : > { %v560_v62 = vsel %vm559_vm2, %v553_v61, 0.0 }
 0x1eb   : > { %561 = vadd.xlane.f32.xlu0 %v560_v62 }
 0x1ef   : > { %v554_v63 = vpop.f32.mrf.mxu3 }
 0x1f0   : > { %v555_v0 = vadd.f32 %v4414_v59, %v554_v63 }
 0x1f2   : > { %v563_v1 = vsel %vm559_vm2, %v555_v0, 0.0 }
 0x1f3   : > { %564 = vadd.xlane.f32.xlu0 %v563_v1 }
 0x207   : > { %815 = vperm.xlu0 %4407, %v797_v43  }
 0x25e   : > { %v562_v9 = vpop.xlane.xlu0 %561 }
 0x25f   : > { %v573_v10 = vmul.f32 %v4777_v8, %v562_v9  ;;  %v4296_v9 = vld [vmem:[%s5803_s5 + $0x34] sm:$0xf0] }
 0x261   : > { %v4780_v11 = vsub.f32 %v553_v61, %v573_v10  ;;  %v4863_v10 = vor.u32 %v4296_v9, %v3877_v6 }
 0x263   : > { %v577_v12 = vmul.f32 %v4780_v11, %v4780_v11  ;;  %696 = vmatpush.bf16.msrb.mxu2 %v4863_v10 }
 0x265   : > { %v579_v13 = vsel %vm559_vm2, %v577_v12, 0.0 }
 0x266   : > { %580 = vadd.xlane.f32.xlu1 %v579_v13  ;;  %v565_v14 = vpop.xlane.xlu0 %564 }
 0x267   : > { %v574_v15 = vmul.f32 %v4777_v8, %v565_v14 }
 0x269   : > { %v4786_v16 = vsub.f32 %v555_v0, %v574_v15 }
 0x26b   : > { %v578_v17 = vmul.f32 %v4786_v16, %v4786_v16 }
 0x26d   : > { %v582_v18 = vsel %vm559_vm2, %v578_v17, 0.0 }
 0x26e   : > { %583 = vadd.xlane.f32.xlu1 %v582_v18 }
 0x2d9   : > { %v581_v19 = vpop.xlane.xlu1 %580 }
 0x2da   : > { %v585_v20 = vmul.f32 %v581_v19, %v4777_v8 }
 0x2dc   : > { %v587_v21 = vadd.f32 1e-05, %v585_v20  ;;  %v4626_v20 = vmov 16.0  }
 0x2de   : > { %4444 = vrsqrt.f32 %v587_v21  ;;  %vm595_vm12 = vweird.f32 %v587_v21 }
 0x2e1   : > { %v584_v22 = vpop.xlane.xlu1 %583 }
 0x2e2   : > { %v586_v24 = vmul.f32 %v584_v22, %v4777_v8  ;;  %v812_v22 = vlaneseq }
 0x2e4   : > { %v4445_v28 = vpop.eup %4444  ;;  %v588_v29 = vadd.f32 1e-05, %v586_v24  ;;  %v818_v24 = vld [vmem:[%s5805_s7 + $0x14] sm:$0xff]  ;;  %v4880_v34 = vand.u32 127, %v812_v22 }
 0x2e5   : > { %v590_v32 = vmul.f32 %v4445_v28, %v587_v21  ;;  %vm596_vm11 = vweird.f32 %v4445_v28  ;;  %v649_v21 = vld [vmem:[%s4870_s12] sm:$0xff]  ;;  %v823_v31 = vpack.c.bf16 %v819_v25, %v818_v24 }
 0x2e6   : > { %4446 = vrsqrt.f32 %v588_v29  ;;  %vm597_vm13 = vmor %vm595_vm12, %vm596_vm11  ;;  %vm605_vm15 = vweird.f32 %v588_v29  ;;  %705 = vperm.xlu1 %4408, %v649_v21  }
 0x2e7   : > { %v591_v37 = vmul.f32 %v4445_v28, %v590_v32  ;;  %835 = vmatpush.bf16.msrb.mxu1 %v823_v31 }
 0x2e9   : > { %v592_v41 = vmul.f32 0.5, %v591_v37 }
 0x2eb   : > { %v593_v44 = vsub.f32 1.5, %v592_v41 }
 0x2ec   : > { %v4447_v45 = vpop.eup %4446 }
 0x2ed   : > { %v594_v46 = vmul.f32 %v4445_v28, %v593_v44  ;;  %v600_v47 = vmul.f32 %v4447_v45, %v588_v29  ;;  %vm606_vm14 = vweird.f32 %v4447_v45  ;;  %v816_v29 = vpop.permute.xlu0 %815 }
 0x2ee   : > { %vm607_vm3 = vmor %vm605_vm15, %vm606_vm14  ;;  %vm817_vm7 = vcmp.eq.s32.totalorder %v4880_v34, %v816_v29 }
 0x2ef   : > { %v601_v49 = vmul.f32 %v4447_v45, %v600_v47  ;;  %v598_v50 = vsel %vm597_vm13, %v4445_v28, %v594_v46  ;;  %v3885_v40 = vsel %vm817_vm7, 1.0, %v4628_v39 }
 0x2f0   : > { %v609_v51 = vmul.f32 %v598_v50, %v4780_v11  ;;  %v822_v44 = vpack.c.bf16 %v3885_v40, %v3885_v40  ;;  %v733_v40 = vld [vmem:[%s5805_s7 + $0xa] sm:$0xff] }
 0x2f1   : > { %v602_v53 = vmul.f32 0.5, %v601_v49 }
 0x2f2   : > { %v612_v54 = vmul.f32 %v4415_v48, %v609_v51  ;;  %3886 = vmatmul.msk.bf16.vlgmr.msrb.gmra.mxu1 %vm824_vm10, %v822_v44  ;;  %v4630_v51 = vmov 2  }
 0x2f3   : > { %v603_v55 = vsub.f32 1.5, %v602_v53 }
 0x2f4   : > { %v4837_v56 = vadd.f32 %v4416_v52, %v612_v54 }
 0x2f5   : > { %v604_v57 = vmul.f32 %v4447_v45, %v603_v55 }
 0x2f6   : > { %v617_v58 = vmul.f32 %v4837_v56, %v4837_v56 }
 0x2f7   : > { %v608_v59 = vsel %vm607_vm3, %v4447_v45, %v604_v57 }
 0x2f8   : > { %v619_v60 = vsel %vm559_vm2, %v617_v58, 0.0  ;;  %v610_v61 = vmul.f32 %v608_v59, %v4786_v16 }
 0x2f9   : > { %620 = vadd.xlane.f32.xlu2 %v619_v60 }
 0x2fa   : > { %v613_v62 = vmul.f32 %v4415_v48, %v610_v61  ;;  %v4629_v48 = vmov 3  }
 0x2fb   : > { %4411 = vset.pattern.permute.xlu1 %v4629_v48 }
 0x2fc   : > { %v4843_v63 = vadd.f32 %v4416_v52, %v613_v62  ;;  %727 = vperm.xlu1 %4411, %v649_v21  }
 0x2fe   : > { %v618_v0 = vmul.f32 %v4843_v63, %v4843_v63 }
 0x300   : > { %v622_v1 = vsel %vm559_vm2, %v618_v0, 0.0 }
 0x301   : > { %623 = vadd.xlane.f32.xlu2 %v622_v1 }
 0x319   : > { %713 = vperm.xlu2 %4409, %v649_v21  }
 0x321   : > { %4410 = vset.pattern.permute.xlu2 %v4630_v51 }
 0x322   : > { %720 = vperm.xlu2 %4410, %v649_v21  }
 0x358   : > { %v706_v9 = vpop.permute.xlu1 %705 }
 0x36c   : > { %v621_v2 = vpop.xlane.xlu2 %620 }
 0x36d   : > { %v625_v3 = vmax.f32 %v621_v2, 1e-24 }
 0x36e   : > { %v728_v24 = vpop.permute.xlu1 %727 }
 0x36f   : > { %4448 = vrsqrt.f32 %v625_v3  ;;  %vm633_vm6 = vweird.f32 %v625_v3  ;;  %v837_v4 = vpop.f32.mrf.mxu1 }
 0x374   : > { %v624_v11 = vpop.xlane.xlu2 %623 }
 0x375   : > { %v4449_v12 = vpop.eup %4448  ;;  %v626_v13 = vmax.f32 %v624_v11, 1e-24  ;;  %v650_v11 = vld [vmem:[%s5805_s7 + $0x5] sm:$0xf] }
 0x376   : > { %v628_v14 = vmul.f32 %v4449_v12, %v625_v3  ;;  %vm634_vm5 = vweird.f32 %v4449_v12  ;;  %v730_v21 = vperm.slane %v650_v11, 3 }
 0x377   : > { %4450 = vrsqrt.f32 %v626_v13  ;;  %vm635_vm8 = vmor %vm633_vm6, %vm634_vm5  ;;  %vm643_vm11 = vweird.f32 %v626_v13  ;;  %v839_v6 = vpop.f32.mrf.mxu1 }
 0x378   : > { %v629_v15 = vmul.f32 %v4449_v12, %v628_v14  ;;  %4452 = vrcp.f32 %v4626_v20  ;;  %v4418_v6 = vld [vmem:[%s5805_s7 + $0x13] ss:$0 sm:$0xff] }
 0x37a   : > { %v630_v16 = vmul.f32 0.5, %v629_v15  ;;  %v716_v15 = vperm.slane %v650_v11, 1 }
 0x37c   : > { %v631_v17 = vsub.f32 1.5, %v630_v16  ;;  %v714_v5 = vpop.permute.xlu2 %713 }
 0x37d   : > { %v4451_v18 = vpop.eup %4450  ;;  %v717_v25 = vmul.f32 %v716_v15, %v714_v5 }
 0x37e   : > { %v638_v19 = vmul.f32 %v4451_v18, %v626_v13  ;;  %v632_v28 = vmul.f32 %v4449_v12, %v631_v17  ;;  %vm644_vm9 = vweird.f32 %v4451_v18  ;;  %v4453_v41 = vpop.eup %4452  ;;  %v708_v13 = vperm.slane %v650_v11, 0 }
 0x37f   : > { %vm645_vm12 = vmor %vm643_vm11, %vm644_vm9  ;;  %v662_v47 = vmul.f32 16.0, %v4453_v41  ;;  %vm666_vm13 = vweird.f32 %v4453_v41  ;;  %v723_v17 = vperm.slane %v650_v11, 2  ;;  %v841_v11 = vld [vmem:[%s5805_s7 + $0x24] sm:$0xff] }
 0x380   : > { %v639_v32 = vmul.f32 %v4451_v18, %v638_v19  ;;  %v636_v42 = vsel %vm635_vm8, %v4449_v12, %v632_v28  ;;  %v651_v12 = vld [vmem:[%s5805_s7 + $0x9] sm:$0x1]  ;;  %v709_v19 = vmul.f32 %v708_v13, %v706_v9 }
 0x381   : > { %v647_v46 = vmul.f32 %v636_v42, %v4837_v56  ;;  %v663_v54 = vsub.f32 1.0, %v662_v47 }
 0x382   : > { %v640_v37 = vmul.f32 0.5, %v639_v32  ;;  %v731_v32 = vmul.f32 %v730_v21, %v728_v24 }
 0x383   : > { %v652_v52 = vsel %vm559_vm2, %v647_v46, 0.0  ;;  %v664_v58 = vmul.f32 %v4453_v41, %v663_v54 }
 0x384   : > { %v641_v43 = vsub.f32 1.5, %v640_v37 }
 0x385   : > { %v665_v61 = vadd.f32 %v4453_v41, %v664_v58 }
 0x386   : > { %v642_v45 = vmul.f32 %v4451_v18, %v641_v43  ;;  %v842_v43 = vld [vmem:[%s5805_s7 + $0x2c] sm:$0xff] }
 0x388   : > { %v646_v49 = vsel %vm645_vm12, %v4451_v18, %v642_v45  ;;  %v721_v18 = vpop.permute.xlu2 %720  ;;  %v844_v45 = vadd.f32 %v842_v43, %v837_v4  ;;  %vm798_vm12 = vcmask 7168  }
 0x389   : > { %v648_v50 = vmul.f32 %v646_v49, %v4843_v63  ;;  %v667_v63 = vsel %vm666_vm13, %v4453_v41, %v665_v61  ;;  %v724_v29 = vmul.f32 %v723_v17, %v721_v18  ;;  %vm800_vm13 = vcmask 15360  }
 0x38b   : > { %v653_v53 = vsel %vm559_vm2, %v648_v50, 0.0  ;;  %v4889_v55 = vpack.c.bf16 %v648_v50, %v647_v46  ;;  %v850_v46 = vsel %vm559_vm2, %v844_v45, 0.0 }
 0x38c   : > { %v654_v57 = vadd.f32 %v653_v53, %v652_v52 }
 0x38e   : > { %v655_v56 = vrot.slane %v654_v57, 4 }
 0x390   : > { %v656_v59 = vadd.f32 %v655_v56, %v654_v57 }
 0x392   : > { %v657_v60 = vrot.slane %v656_v59, 2 }
 0x394   : > { %v658_v62 = vadd.f32 %v657_v60, %v656_v59 }
 0x396   : > { %v659_v0 = vrot.slane %v658_v62, 1 }
 0x398   : > { %v660_v1 = vadd.f32 %v659_v0, %v658_v62 }
 0x39a   : > { %v668_v2 = vmul.f32 %v667_v63, %v660_v1 }
 0x39c   : > { %v673_v3 = vpack.c.bf16 %v668_v2, %v668_v2 }
 0x39e   : > { %3883 = vmatmul.msk.bf16.vlgmr.msrb.gmra.mxu2 %vm559_vm2, %v673_v3  ;;  %v4417_v3 = vld [vmem:[%s5805_s7 + $0x12] ss:$0 sm:$0xff] }
 0x421   : > { %v698_v14 = vpop.f32.mrf.mxu2 }
 0x422   : > { %v702_v16 = vadd.f32 %v698_v14, %v651_v12 }
 0x424   : > { %v710_v20 = vperm.slane %v702_v16, 0 }
 0x426   : > { %v711_v28 = vadd.f32 %v710_v20, %v709_v19 }
 0x428   : > { %v718_v31 = vadd.f32 %v717_v25, %v711_v28 }
 0x429   : > { %v700_v36 = vpop.f32.mrf.mxu2 }
 0x42a   : > { %v725_v37 = vadd.f32 %v724_v29, %v718_v31 }
 0x42c   : > { %v732_v41 = vadd.f32 %v731_v32, %v725_v37 }
 0x42e   : > { %v734_v42 = vadd.f32 %v733_v40, %v732_v41 }
 0x430   : > { %v737_v44 = vsel %vm559_vm2, %v734_v42, 0.0 }
 0x431   : > { %738 = vadd.xlane.f32.xlu2 %v737_v44 }
 0x439   : > { %851 = vadd.xlane.f32.xlu2 %v850_v46 }
 0x4a4   : > { %v739_v47 = vpop.xlane.xlu2 %738 }
 0x4a5   : > { %v740_v48 = vmul.f32 %v739_v47, %v4777_v8 }
 0x4a7   : > { %v741_v49 = vsub.f32 %v734_v42, %v740_v48  ;;  %v4419_v48 = vld [vmem:[%s5805_s7 + $0x34] ss:$0 sm:$0xff] }
 0x4a9   : > { %v742_v50 = vmul.f32 %v741_v49, %v741_v49 }
 0x4ab   : > { %v743_v51 = vsel %vm559_vm2, %v742_v50, 0.0 }
 0x4ac   : > { %744 = vadd.xlane.f32.xlu1 %v743_v51  ;;  %v852_v52 = vpop.xlane.xlu2 %851 }
 0x4ad   : > { %v854_v53 = vmul.f32 %v852_v52, %v4777_v8 }
 0x4af   : > { %v856_v54 = vsub.f32 %v844_v45, %v854_v53  ;;  %v4420_v53 = vld [vmem:[%s5805_s7 + $0x35] ss:$0 sm:$0xff] }
 0x4b1   : > { %v858_v57 = vmul.f32 %v856_v54, %v856_v54 }
 0x4b3   : > { %v862_v56 = vsel %vm559_vm2, %v858_v57, 0.0 }
 0x4b4   : > { %863 = vadd.xlane.f32.xlu2 %v862_v56 }
 0x51f   : > { %v745_v58 = vpop.xlane.xlu1 %744 }
 0x520   : > { %v746_v59 = vmul.f32 %v745_v58, %v4777_v8 }
 0x522   : > { %v747_v60 = vadd.f32 1e-05, %v746_v59 }
 0x524   : > { %4454 = vrsqrt.f32 %v747_v60  ;;  %vm754_vm15 = vweird.f32 %v747_v60 }
 0x527   : > { %v864_v20 = vpop.xlane.xlu2 %863 }
 0x528   : > { %v866_v21 = vmul.f32 %v864_v20, %v4777_v8 }
 0x52a   : > { %v4455_v61 = vpop.eup %4454  ;;  %v868_v24 = vadd.f32 1e-05, %v866_v21 }
 0x52b   : > { %v749_v62 = vmul.f32 %v4455_v61, %v747_v60  ;;  %vm755_vm14 = vweird.f32 %v4455_v61 }
 0x52c   : > { %vm756_vm3 = vmor %vm754_vm15, %vm755_vm14  ;;  %4456 = vrsqrt.f32 %v868_v24  ;;  %vm885_vm5 = vweird.f32 %v868_v24  ;;  %vm802_vm14 = vcmask 23552   ;;  %vm804_vm15 = vcmask 31744  }
 0x52d   : > { %v750_v0 = vmul.f32 %v4455_v61, %v749_v62 }
 0x52f   : > { %v751_v63 = vmul.f32 0.5, %v750_v0  ;;  %v799_v0 = vsel %vm798_vm12, 1, %v765_v23 }
 0x531   : > { %v752_v1 = vsub.f32 1.5, %v751_v63  ;;  %v801_v63 = vsel %vm800_vm13, %v799_v0, %v768_v26 }
 0x532   : > { %v4457_v28 = vpop.eup %4456 }
 0x533   : > { %v753_v2 = vmul.f32 %v4455_v61, %v752_v1  ;;  %vm886_vm6 = vweird.f32 %v4457_v28  ;;  %v803_v1 = vsel %vm802_vm14, %v801_v63, %v771_v27  ;;  %v4961_v27 = vshrl.u32 %v812_v22, 7 }
 0x534   : > { %vm887_vm7 = vmor %vm885_vm5, %vm886_vm6  ;;  %vm808_vm5 = vcmask 48128   ;;  %vm810_vm6 = vcmask 56320  }
 0x535   : > { %v757_v4 = vsel %vm756_vm3, %v4455_v61, %v753_v2  ;;  %vm806_vm3 = vcmask 39936   ;;  %v805_v2 = vsel %vm804_vm15, %v803_v1, %v774_v30 }
 0x536   : > { %v758_v5 = vmul.f32 %v757_v4, %v741_v49 }
 0x538   : > { %v760_v9 = vmul.f32 %v4417_v3, %v758_v5  ;;  %v807_v3 = vsel %vm806_vm3, %v805_v2, %v777_v33 }
 0x539   : > { %v809_v4 = vsel %vm808_vm5, %v807_v3, %v780_v35 }
 0x53a   : > { %v762_v12 = vadd.f32 %v4418_v6, %v760_v9  ;;  %v811_v5 = vsel %vm810_vm6, %v809_v4, %v783_v38  ;;  %v4632_v6 = vmov -1e+09  }
 0x53c   : > { %v843_v13 = vadd.f32 %v841_v11, %v762_v12  ;;  %v899_v11 = vadd.s32 8, %v4961_v27 }
 0x53e   : > { %v847_v14 = vsel %vm559_vm2, %v843_v13, 0.0 }
 0x53f   : > { %848 = vadd.xlane.f32.xlu0 %v847_v14 }
 0x553   : > { %919 = vrot.lane.b32.xlu0 %v4857_v7, %s4631_s19  ;;  %v880_v7 = vmul.f32 %v4457_v28, %v868_v24 }
 0x555   : > { %v881_v29 = vmul.f32 %v4457_v28, %v880_v7 }
 0x557   : > { %v882_v37 = vmul.f32 0.5, %v881_v29 }
 0x559   : > { %v883_v40 = vsub.f32 1.5, %v882_v37 }
 0x55b   : > { %v884_v41 = vmul.f32 %v4457_v28, %v883_v40 }
 0x55d   : > { %v888_v44 = vsel %vm887_vm7, %v4457_v28, %v884_v41  ;;  %vm904_vm7 = vcmp.ne.s32.totalorder %v811_v5, 0 }
 0x55e   : > { %v890_v47 = vmul.f32 %v888_v44, %v856_v54  ;;  %v905_v23 = vsel %vm904_vm7, 0.0, %v4632_v6 }
 0x55f   : > { %907 = vrot.lane.b32.xlu0 %v905_v23, %s4633_s22 }
 0x560   : > { %v893_v52 = vmul.f32 %v4419_v48, %v890_v47  ;;  %v4299_v47 = vld [vmem:[%s5803_s5 + $0xa8] sm:$0xf0] }
 0x562   : > { %v4937_v58 = vadd.f32 %v4420_v53, %v893_v52 }
 0x5b2   : > { %v849_v15 = vpop.xlane.xlu0 %848 }
 0x5b3   : > { %v853_v16 = vmul.f32 %v849_v15, %v4777_v8 }
 0x5b5   : > { %v855_v17 = vsub.f32 %v843_v13, %v853_v16 }
 0x5b7   : > { %v857_v18 = vmul.f32 %v855_v17, %v855_v17 }
 0x5b9   : > { %v859_v19 = vsel %vm559_vm2, %v857_v18, 0.0 }
 0x5ba   : > { %860 = vadd.xlane.f32.xlu1 %v859_v19 }
 0x5c5   : > { %v920_v25 = vpop.permute.xlu0 %919 }
 0x5c6   : > { %932 = vmatpush.bf16.msrb.mxu3 %v920_v25 }
 0x5d1   : > { %v908_v30 = vpop.permute.xlu0 %907 }
 0x5d3   : > { %917 = vrot.lane.b32.xlu1 %v4863_v10, %s4631_s19 }
 0x62d   : > { %v861_v31 = vpop.xlane.xlu1 %860 }
 0x62e   : > { %v865_v32 = vmul.f32 %v861_v31, %v4777_v8 }
 0x630   : > { %v867_v36 = vadd.f32 1e-05, %v865_v32 }
 0x632   : > { %4458 = vrsqrt.f32 %v867_v36  ;;  %vm875_vm9 = vweird.f32 %v867_v36 }
 0x638   : > { %v4459_v10 = vpop.eup %4458 }
 0x639   : > { %v870_v42 = vmul.f32 %v4459_v10, %v867_v36  ;;  %vm876_vm8 = vweird.f32 %v4459_v10 }
 0x63a   : > { %vm877_vm11 = vmor %vm875_vm9, %vm876_vm8  ;;  %vm910_vm8 = vcmask 64512   ;;  %vm900_vm9 = vcmp.ge.s32.totalorder %v4961_v27, %v4880_v34 }
 0x63b   : > { %v871_v43 = vmul.f32 %v4459_v10, %v870_v42  ;;  %v911_v33 = vsel %vm910_vm8, 0.0, %v908_v30  ;;  %v902_v38 = vsel %vm900_vm9, 0.0, %v4632_v6 }
 0x63c   : > { %v912_v35 = vperm.slane %v911_v33, 0 }
 0x63d   : > { %v872_v45 = vmul.f32 0.5, %v871_v43 }
 0x63e   : > { %v4966_v12 = vadd.f32 %v912_v35, %v902_v38 }
 0x63f   : > { %v873_v46 = vsub.f32 1.5, %v872_v45 }
 0x641   : > { %v874_v49 = vmul.f32 %v4459_v10, %v873_v46  ;;  %v3896_v46 = vld [vmem:[%s5803_s5 + $0x74] sm:$0xf] }
 0x643   : > { %v878_v50 = vsel %vm877_vm11, %v4459_v10, %v874_v49  ;;  %vm901_vm11 = vcmp.ge.s32.totalorder %v899_v11, %v4880_v34  ;;  %v3892_v49 = vld [vmem:[%s5803_s5 + $0x4] sm:$0xf] }
 0x644   : > { %v889_v51 = vmul.f32 %v878_v50, %v855_v17  ;;  %v903_v15 = vsel %vm901_vm11, 0.0, %v4632_v6  ;;  %v4298_v50 = vld [vmem:[%s5803_s5 + $0x38] sm:$0xf0] }
 0x645   : > { %v918_v57 = vpop.permute.xlu1 %917  ;;  %v4971_v16 = vadd.f32 %v912_v35, %v903_v15 }
 0x646   : > { %933 = vmatpush.bf16.msrb.mxu3 %v918_v57  ;;  %v892_v56 = vmul.f32 %v4419_v48, %v889_v51  ;;  %v3897_v48 = vor.u32 %v4299_v47, %v3896_v46  ;;  %v3893_v51 = vor.u32 %v4298_v50, %v3892_v49 }
 0x648   : > { %v4935_v54 = vadd.f32 %v4420_v53, %v892_v56  ;;  %1033 = vmatpush.bf16.msra.mxu1 %v3897_v48 }
 0x64a   : > { %v916_v59 = vpack.c.bf16 %v4937_v58, %v4935_v54 }
 0x64c   : > { %3887 = vmatmul.msk.bf16.vlgmr.msrb.gmra.mxu3 %vm559_vm2, %v916_v59  ;;  %1034 = vmatpush.bf16.msra.mxu1 %v3893_v51 }
 0x6cf   : > { %v935_v60 = vpop.f32.mrf.mxu3 }
 0x6d7   : > { %v937_v61 = vpop.f32.mrf.mxu3 }
 0x6d8   : > { %v940_v62 = vpack.c.bf16 %v937_v61, %v935_v60 }
 0x6da   : > { %942 = vrot.lane.b32.xlu2 %v940_v62, %s4631_s19 }
 0x734   : > { %v943_v26 = vpop.permute.xlu2 %942 }
 0x735   : > { %v948_v9 = vsel %vm559_vm2, %v943_v26, 0 }
 0x736   : > { %957 = vmatpush.bf16.xpose.msra.mxu2 %v948_v9 }
 0x73d   : > { %3888 = vmatmul.msk.bf16.vlgmr.msra.gmra.mxu2 %vm559_vm2, %v940_v62 }
 0x7c0   : > { %v959_v13 = vpop.f32.mrf.mxu2 }
 0x7c1   : > { %v960_v14 = vadd.f32 %v959_v13, %v4966_v12 }
 0x7c3   : > { %v964_v22 = vsel %vm824_vm10, %v960_v14, -inf }
 0x7c4   : > { %965 = vmax.xlane.f32.xlu1 %v964_v22 }
 0x7c8   : > { %v961_v17 = vpop.f32.mrf.mxu2 }
 0x7c9   : > { %v962_v18 = vadd.f32 %v961_v17, %v4971_v16 }
 0x7cb   : > { %v967_v19 = vsel %vm824_vm10, %v962_v18, -inf }
 0x7cc   : > { %968 = vmax.xlane.f32.xlu0 %v967_v19 }
 0x7e0   : > { %987 = vrot.lane.b32.xlu0 %v940_v62, %s4634_s25 }
 0x7e8   : > { %1094 = vrot.lane.b32.xlu0 %v3893_v51, %s4634_s25 }
 0x7f0   : > { %1118 = vrot.lane.b32.xlu0 %v3893_v51, %s4631_s19 }
 0x837   : > { %v966_v20 = vpop.xlane.xlu1 %965 }
 0x838   : > { %v970_v21 = vsub.f32 %v960_v14, %v966_v20 }
 0x83a   : > { %v972_v24 = vmul.f32 1.442695, %v970_v21 }
 0x83c   : > { %4460 = vpow2.f32 %v972_v24 }
 0x83f   : > { %v969_v25 = vpop.xlane.xlu0 %968 }
 0x840   : > { %v971_v28 = vsub.f32 %v962_v18, %v969_v25  ;;  %v5011_v25 = vld [vmem:[%s5805_s7 + $0x36] sm:$0x3f] }
 0x842   : > { %v4461_v7 = vpop.eup %4460  ;;  %v974_v29 = vmul.f32 1.442695, %v971_v28 }
 0x843   : > { %v976_v31 = vsel %vm824_vm10, %v4461_v7, 0.0 }
 0x844   : > { %4462 = vpow2.f32 %v974_v29  ;;  %977 = vadd.xlane.f32.xlu2 %v976_v31  ;;  %v1087_v31 = vperm.slane %v5011_v25, 0 }
 0x84a   : > { %v4463_v32 = vpop.eup %4462 }
 0x84b   : > { %v979_v36 = vsel %vm824_vm10, %v4463_v32, 0.0 }
 0x84c   : > { %980 = vadd.xlane.f32.xlu1 %v979_v36 }
 0x852   : > { %v988_v37 = vpop.permute.xlu0 %987 }
 0x853   : > { %1000 = vmatpush.bf16.msrb.mxu0 %v988_v37 }
 0x85a   : > { %v1095_v11 = vpop.permute.xlu0 %1094 }
 0x8b7   : > { %v978_v40 = vpop.xlane.xlu2 %977 }
 0x8b8   : > { %4464 = vrcp.f32 %v978_v40  ;;  %v1090_v40 = vperm.slane %v5011_v25, 1 }
 0x8be   : > { %v4465_v41 = vpop.eup %4464 }
 0x8bf   : > { %v981_v10 = vpop.xlane.xlu1 %980  ;;  %v984_v43 = vmul.f32 %v4465_v41, %v4461_v7 }
 0x8c0   : > { %4466 = vrcp.f32 %v981_v10 }
 0x8c6   : > { %v4467_v42 = vpop.eup %4466 }
 0x8c7   : > { %v985_v44 = vmul.f32 %v4467_v42, %v4463_v32 }
 0x8c9   : > { %v986_v45 = vpack.c.bf16 %v985_v44, %v984_v43  ;;  %v1119_v44 = vpop.permute.xlu0 %1118 }
 0x8cb   : > { %3889 = vmatmul.msk.bf16.vlgmr.msrb.gmra.mxu0 %vm824_vm10, %v986_v45 }
 0x948   : > { %v1002_v52 = vpop.f32.mrf.mxu0 }
 0x950   : > { %v1004_v53 = vpop.f32.mrf.mxu0 }
 0x951   : > { %v1011_v57 = vpack.c.bf16 %v1004_v53, %v1002_v52 }
 0x953   : > { %3898 = vmatmul.msk.bf16.vlgmr.msra.gmra.mxu1 %vm559_vm2, %v1011_v57 }
 0x9d0   : > { %v1036_v56 = vpop.f32.mrf.mxu1 }
 0x9d1   : > { %v1041_v59 = vadd.f32 %v1036_v56, %v4935_v54 }
 0x9d3   : > { %v1043_v60 = vsel %vm559_vm2, %v1041_v59, 0.0 }
 0x9d4   : > { %1044 = vadd.xlane.f32.xlu2 %v1043_v60 }
 0x9d8   : > { %v1038_v61 = vpop.f32.mrf.mxu1 }
 0x9d9   : > { %v1042_v62 = vadd.f32 %v1038_v61, %v4937_v58 }
 0x9db   : > { %v1046_v0 = vsel %vm559_vm2, %v1042_v62, 0.0 }
 0x9dc   : > { %1047 = vadd.xlane.f32.xlu1 %v1046_v0 }
 0xa47   : > { %v1045_v63 = vpop.xlane.xlu2 %1044 }
 0xa48   : > { %v1049_v1 = vmul.f32 %v1045_v63, %v4777_v8 }
 0xa4a   : > { %v1051_v2 = vsub.f32 %v1041_v59, %v1049_v1 }
 0xa4c   : > { %v1053_v3 = vmul.f32 %v1051_v2, %v1051_v2 }
 0xa4e   : > { %v1055_v4 = vsel %vm559_vm2, %v1053_v3, 0.0 }
 0xa4f   : > { %1056 = vadd.xlane.f32.xlu2 %v1055_v4  ;;  %v1048_v5 = vpop.xlane.xlu1 %1047 }
 0xa50   : > { %v1050_v54 = vmul.f32 %v1048_v5, %v4777_v8 }
 0xa52   : > { %v1052_v6 = vsub.f32 %v1042_v62, %v1050_v54 }
 0xa54   : > { %v1054_v23 = vmul.f32 %v1052_v6, %v1052_v6 }
 0xa56   : > { %v1058_v26 = vsel %vm559_vm2, %v1054_v23, 0.0 }
 0xa57   : > { %1059 = vadd.xlane.f32.xlu1 %v1058_v26 }
 0xa67   : > { %1096 = vrot.lane.b32.xlu2 %v3897_v48, %s4634_s25 }
 0xa70   : > { %1120 = vrot.lane.b32.xlu1 %v3897_v48, %s4631_s19 }
 0xac2   : > { %v1057_v58 = vpop.xlane.xlu2 %1056 }
 0xac3   : > { %v1061_v9 = vmul.f32 %v1057_v58, %v4777_v8 }
 0xac5   : > { %v1063_v30 = vadd.f32 1e-05, %v1061_v9 }
 0xac7   : > { %4468 = vrsqrt.f32 %v1063_v30  ;;  %vm1071_vm13 = vweird.f32 %v1063_v30 }
 0xaca   : > { %v1097_v33 = vpop.permute.xlu2 %1096  ;;  %v1060_v35 = vpop.xlane.xlu1 %1059 }
 0xacb   : > { %v1062_v38 = vmul.f32 %v1060_v35, %v4777_v8  ;;  %1109 = vmatpush.bf16.msra.mxu3 %v1097_v33 }
 0xacd   : > { %v4469_v13 = vpop.eup %4468  ;;  %v1064_v14 = vadd.f32 1e-05, %v1062_v38 }
 0xace   : > { %v1066_v15 = vmul.f32 %v4469_v13, %v1063_v30  ;;  %vm1072_vm12 = vweird.f32 %v4469_v13 }
 0xacf   : > { %4470 = vrsqrt.f32 %v1064_v14  ;;  %1110 = vmatpush.bf16.msra.mxu3 %v1095_v11  ;;  %vm1073_vm14 = vmor %vm1071_vm13, %vm1072_vm12  ;;  %vm1081_vm5 = vweird.f32 %v1064_v14  ;;  %v3909_v11 = vld [vmem:[%s5803_s5 + $0x78] sm:$0xf] }
 0xad0   : > { %v1067_v22 = vmul.f32 %v4469_v13, %v1066_v15  ;;  %v3905_v15 = vld [vmem:[%s5803_s5 + $0x8] sm:$0xf] }
 0xad2   : > { %v1068_v17 = vmul.f32 0.5, %v1067_v22  ;;  %3899 = vmatmul.msk.bf16.vlgmr.msra.gmra.mxu3 %vm559_vm2, %v4889_v55  ;;  %v4300_v22 = vld [vmem:[%s5803_s5 + $0x3c] sm:$0xf0] }
 0xad4   : > { %v1069_v18 = vsub.f32 1.5, %v1068_v17  ;;  %v3906_v17 = vor.u32 %v4300_v22, %v3905_v15 }
 0xad5   : > { %v4471_v19 = vpop.eup %4470 }
 0xad6   : > { %v1070_v20 = vmul.f32 %v4469_v13, %v1069_v18  ;;  %v1076_v21 = vmul.f32 %v4471_v19, %v1064_v14  ;;  %vm1082_vm3 = vweird.f32 %v4471_v19 }
 0xad7   : > { %vm1083_vm6 = vmor %vm1081_vm5, %vm1082_vm3 }
 0xad8   : > { %v1077_v24 = vmul.f32 %v4471_v19, %v1076_v21  ;;  %v1074_v28 = vsel %vm1073_vm14, %v4469_v13, %v1070_v20  ;;  %v4301_v13 = vld [vmem:[%s5803_s5 + $0xac] sm:$0xf0]  ;;  %vm1324_vm14 = vcmask 785408  }
 0xad9   : > { %v1085_v32 = vmul.f32 %v1074_v28, %v1051_v2  ;;  %v3910_v14 = vor.u32 %v4301_v13, %v3909_v11  ;;  %v1287_v13 = vperm.slane %v5011_v25, 2 }
 0xada   : > { %v1078_v7 = vmul.f32 0.5, %v1077_v24 }
 0xadb   : > { %v1088_v10 = vmul.f32 %v1087_v31, %v1085_v32  ;;  %1233 = vmatpush.bf16.msrb.mxu3 %v3910_v14 }
 0xadc   : > { %v1079_v29 = vsub.f32 1.5, %v1078_v7 }
 0xadd   : > { %v1091_v45 = vadd.f32 %v1090_v40, %v1088_v10 }
 0xade   : > { %v1080_v36 = vmul.f32 %v4471_v19, %v1079_v29 }
 0xadf   : > { %1234 = vmatpush.bf16.msrb.mxu3 %v3906_v17 }
 0xae0   : > { %v1084_v37 = vsel %vm1083_vm6, %v4471_v19, %v1080_v36 }
 0xae1   : > { %v1086_v41 = vmul.f32 %v1084_v37, %v1052_v6 }
 0xae2   : > { %v1121_v42 = vpop.permute.xlu1 %1120 }
 0xae3   : > { %v1089_v43 = vmul.f32 %v1087_v31, %v1086_v41  ;;  %1133 = vmatpush.bf16.msrb.mxu2 %v1121_v42 }
 0xae5   : > { %v5015_v46 = vadd.f32 %v1090_v40, %v1089_v43  ;;  %v3914_v43 = vld [vmem:[%s5803_s5 + $0x8] sm:$0xf] }
 0xae7   : > { %1134 = vmatpush.bf16.msrb.mxu2 %v1119_v44  ;;  %v1117_v47 = vpack.c.bf16 %v5015_v46, %v1091_v45  ;;  %v4303_v44 = vld [vmem:[%s5803_s5 + $0x3c] sm:$0xf0] }
 0xaea   : > { %3900 = vmatmul.msk.bf16.vlgmr.msrb.gmra.mxu2 %vm559_vm2, %v1117_v47 }
 0xb55   : > { %v1112_v48 = vpop.f32.mrf.mxu3 }
 0xb5d   : > { %v1114_v49 = vpop.f32.mrf.mxu3 }
 0xb5e   : > { %v1142_v50 = vpack.c.bf16 %v1114_v49, %v1112_v48  ;;  %v4302_v48 = vld [vmem:[%s5803_s5 + $0xc] sm:$0xf]  ;;  %v3916_v49 = vld [vmem:[%s5803_s5 + $0x40] sm:$0xf0] }
 0xb60   : > { %v1147_v51 = vsel %vm559_vm2, %v1142_v50, 0 }
 0xb61   : > { %1156 = vmatpush.bf16.xpose.msra.mxu0 %v1147_v51  ;;  %v3919_v51 = vor.u32 %v4302_v48, %v3916_v49 }
 0xb6d   : > { %v1136_v52 = vpop.f32.mrf.mxu2 }
 0xb75   : > { %v1138_v53 = vpop.f32.mrf.mxu2 }
 0xb76   : > { %v1141_v57 = vpack.c.bf16 %v1138_v53, %v1136_v52  ;;  %v3922_v52 = vld [vmem:[%s5803_s5 + $0x78] sm:$0xf]  ;;  %v4305_v53 = vld [vmem:[%s5803_s5 + $0xac] sm:$0xf0] }
 0xb78   : > { %3901 = vmatmul.msk.bf16.vlgmr.msra.gmra.mxu0 %vm559_vm2, %v1141_v57  ;;  %v3923_v57 = vor.u32 %v4305_v53, %v3922_v52 }
 0xbf5   : > { %v1158_v56 = vpop.f32.mrf.mxu0 }
 0xbf6   : > { %v1163_v59 = vsel %vm824_vm10, %v1158_v56, -inf }
 0xbf7   : > { %1164 = vmax.xlane.f32.xlu0 %v1163_v59  ;;  %v3924_v59 = vld [vmem:[%s5803_s5 + $0xb0] sm:$0xf0] }
 0xbfd   : > { %v1160_v60 = vpop.f32.mrf.mxu0 }
 0xbfe   : > { %v1166_v61 = vsel %vm824_vm10, %v1160_v60, -inf }
 0xbff   : > { %1167 = vmax.xlane.f32.xlu2 %v1166_v61 }
 0xc17   : > { %1187 = vrot.lane.b32.xlu2 %v1142_v50, %s4631_s19 }
 0xc6a   : > { %v1165_v62 = vpop.xlane.xlu0 %1164 }
 0xc6b   : > { %v1169_v0 = vsub.f32 %v1158_v56, %v1165_v62  ;;  %v4304_v56 = vld [vmem:[%s5803_s5 + $0x7c] sm:$0xf] }
 0xc6d   : > { %v1171_v63 = vmul.f32 1.442695, %v1169_v0 }
 0xc6f   : > { %4472 = vpow2.f32 %v1171_v63 }
 0xc72   : > { %v1168_v1 = vpop.xlane.xlu2 %1167 }
 0xc73   : > { %v1170_v2 = vsub.f32 %v1160_v60, %v1168_v1  ;;  %v3927_v60 = vor.u32 %v4304_v56, %v3924_v59 }
 0xc75   : > { %v4473_v3 = vpop.eup %4472  ;;  %v1173_v4 = vmul.f32 1.442695, %v1170_v2 }
 0xc76   : > { %v1175_v5 = vsel %vm824_vm10, %v4473_v3, 0.0 }
 0xc77   : > { %4474 = vpow2.f32 %v1173_v4  ;;  %1176 = vadd.xlane.f32.xlu1 %v1175_v5 }
 0xc7a   : > { %v1188_v54 = vpop.permute.xlu2 %1187 }
 0xc7b   : > { %1200 = vmatpush.bf16.msrb.mxu1 %v1188_v54 }
 0xc7d   : > { %v4475_v6 = vpop.eup %4474 }
 0xc7e   : > { %v1178_v23 = vsel %vm824_vm10, %v4475_v6, 0.0 }
 0xc7f   : > { %1179 = vadd.xlane.f32.xlu0 %v1178_v23 }
 0xcea   : > { %v1177_v26 = vpop.xlane.xlu1 %1176 }
 0xceb   : > { %4476 = vrcp.f32 %v1177_v26 }
 0xcf1   : > { %v4477_v9 = vpop.eup %4476 }
 0xcf2   : > { %v1180_v58 = vpop.xlane.xlu0 %1179  ;;  %v1183_v33 = vmul.f32 %v4477_v9, %v4473_v3 }
 0xcf3   : > { %4478 = vrcp.f32 %v1180_v58 }
 0xcf9   : > { %v4479_v30 = vpop.eup %4478 }
 0xcfa   : > { %v1184_v35 = vmul.f32 %v4479_v30, %v4475_v6 }
 0xcfc   : > { %v1185_v38 = vpack.c.bf16 %v1184_v35, %v1183_v33 }
 0xcfe   : > { %3902 = vmatmul.msk.bf16.vlgmr.msrb.gmra.mxu1 %vm824_vm10, %v1185_v38 }
 0xd7b   : > { %v1202_v18 = vpop.f32.mrf.mxu1 }
 0xd83   : > { %v1204_v19 = vpop.f32.mrf.mxu1 }
 0xd84   : > { %v1211_v20 = vpack.c.bf16 %v1204_v19, %v1202_v18  ;;  %v1290_v19 = vperm.slane %v5011_v25, 3 }
 0xd86   : > { %3911 = vmatmul.msk.bf16.vlgmr.msrb.gmra.mxu3 %vm559_vm2, %v1211_v20 }
 0xe09   : > { %v1236_v21 = vpop.f32.mrf.mxu3 }
 0xe0a   : > { %v1241_v24 = vadd.f32 %v1236_v21, %v1091_v45  ;;  %v3915_v45 = vor.u32 %v4303_v44, %v3914_v43  ;;  %v4307_v43 = vld [vmem:[%s5804_s6 + $0x68] sm:$0xff]  ;;  %v4421_v44 = vld [vmem:[%s5805_s7 + $0x3c] ss:$0 sm:$0xff] }
 0xe0c   : > { %v1243_v28 = vsel %vm559_vm2, %v1241_v24, 0.0  ;;  %1316 = vrot.lane.b32.xlu2 %v3915_v45, %s4631_s19  ;;  %v4306_v45 = vld [vmem:[%s5804_s6 + $0x60] sm:$0xff] }
 0xe0d   : > { %1244 = vadd.xlane.f32.xlu0 %v1243_v28 }
 0xe11   : > { %v1238_v7 = vpop.f32.mrf.mxu3 }
 0xe12   : > { %v1242_v29 = vadd.f32 %v1238_v7, %v5015_v46 }
 0xe14   : > { %v1246_v31 = vsel %vm559_vm2, %v1242_v29, 0.0  ;;  %1318 = vrot.lane.b32.xlu2 %v3919_v51, %s4631_s19 }
 0xe15   : > { %1247 = vadd.xlane.f32.xlu1 %v1246_v31 }
 0xe66   : > { %v1317_v33 = vpop.permute.xlu2 %1316 }
 0xe6e   : > { %v1319_v28 = vpop.permute.xlu2 %1318 }
 0xe6f   : > { %v1325_v31 = vsel %vm1324_vm14, %v1317_v33, %v1319_v28 }
 0xe80   : > { %v1245_v32 = vpop.xlane.xlu0 %1244 }
 0xe81   : > { %v1249_v36 = vmul.f32 %v1245_v32, %v4777_v8 }
 0xe83   : > { %v1251_v37 = vsub.f32 %v1241_v24, %v1249_v36  ;;  %v4313_v36 = vld [vmem:[%s5804_s6 + $0x98] sm:$0xff] }
 0xe84   : > { %1431 = vmatpush.bf16.msrb.mxu0 %v4313_v36 }
 0xe85   : > { %v1253_v40 = vmul.f32 %v1251_v37, %v1251_v37 }
 0xe87   : > { %v1255_v10 = vsel %vm559_vm2, %v1253_v40, 0.0  ;;  %v4311_v40 = vld [vmem:[%s5804_s6 + $0x88] sm:$0xff] }
 0xe88   : > { %1256 = vadd.xlane.f32.xlu0 %v1255_v10  ;;  %v1248_v41 = vpop.xlane.xlu1 %1247  ;;  %v4310_v10 = vld [vmem:[%s5804_s6 + $0x80] sm:$0xff] }
 0xe89   : > { %v1250_v42 = vmul.f32 %v1248_v41, %v4777_v8  ;;  %v4309_v41 = vld [vmem:[%s5804_s6 + $0x78] sm:$0xff] }
 0xe8b   : > { %v1252_v46 = vsub.f32 %v1242_v29, %v1250_v42  ;;  %v4308_v42 = vld [vmem:[%s5804_s6 + $0x70] sm:$0xff] }
 0xe8d   : > { %v1254_v47 = vmul.f32 %v1252_v46, %v1252_v46 }
 0xe8f   : > { %v1258_v50 = vsel %vm559_vm2, %v1254_v47, 0.0 }
 0xe90   : > { %1259 = vadd.xlane.f32.xlu1 %v1258_v50 }
 0xe9c   : > { %1320 = vrot.lane.b32.xlu0 %v3923_v57, %s4631_s19 }
 0xea9   : > { %1322 = vrot.lane.b32.xlu1 %v3927_v60, %s4631_s19 }
 0xefb   : > { %v1257_v61 = vpop.xlane.xlu0 %1256 }
 0xefc   : > { %v1261_v62 = vmul.f32 %v1257_v61, %v4777_v8 }
 0xefe   : > { %v1263_v0 = vadd.f32 1e-05, %v1261_v62 }
 0xf00   : > { %4480 = vrsqrt.f32 %v1263_v0  ;;  %vm1271_vm8 = vweird.f32 %v1263_v0 }
 0xf03   : > { %v1260_v63 = vpop.xlane.xlu1 %1259 }
 0xf04   : > { %v1262_v1 = vmul.f32 %v1260_v63, %v4777_v8 }
 0xf06   : > { %v4481_v2 = vpop.eup %4480  ;;  %v1264_v3 = vadd.f32 1e-05, %v1262_v1 }
 0xf07   : > { %v1266_v4 = vmul.f32 %v4481_v2, %v1263_v0  ;;  %vm1272_vm7 = vweird.f32 %v4481_v2 }
 0xf08   : > { %4482 = vrsqrt.f32 %v1264_v3  ;;  %vm1273_vm9 = vmor %vm1271_vm8, %vm1272_vm7  ;;  %vm1281_vm12 = vweird.f32 %v1264_v3 }
 0xf09   : > { %v1267_v5 = vmul.f32 %v4481_v2, %v1266_v4 }
 0xf0b   : > { %v1268_v54 = vmul.f32 0.5, %v1267_v5 }
 0xf0d   : > { %v1269_v6 = vsub.f32 1.5, %v1268_v54 }
 0xf0e   : > { %v4483_v23 = vpop.eup %4482  ;;  %v1321_v22 = vpop.permute.xlu0 %1320 }
 0xf0f   : > { %v1276_v26 = vmul.f32 %v4483_v23, %v1264_v3  ;;  %v1270_v58 = vmul.f32 %v4481_v2, %v1269_v6  ;;  %vm1282_vm11 = vweird.f32 %v4483_v23 }
 0xf10   : > { %vm1283_vm13 = vmor %vm1281_vm12, %vm1282_vm11 }
 0xf11   : > { %v1277_v9 = vmul.f32 %v4483_v23, %v1276_v26  ;;  %v1274_v35 = vsel %vm1273_vm9, %v4481_v2, %v1270_v58 }
 0xf12   : > { %v1285_v14 = vmul.f32 %v1274_v35, %v1251_v37  ;;  %v4312_v37 = vld [vmem:[%s5804_s6 + $0x90] sm:$0xff] }
 0xf13   : > { %v1278_v30 = vmul.f32 0.5, %v1277_v9  ;;  %1432 = vmatpush.bf16.msrb.mxu0 %v4312_v37 }
 0xf14   : > { %v1288_v20 = vmul.f32 %v1287_v13, %v1285_v14 }
 0xf15   : > { %v1279_v38 = vsub.f32 1.5, %v1278_v30 }
 0xf16   : > { %v1291_v29 = vadd.f32 %v1290_v19, %v1288_v20 }
 0xf17   : > { %v1280_v11 = vmul.f32 %v4483_v23, %v1279_v38  ;;  %1433 = vmatpush.bf16.msrb.mxu0 %v4311_v40 }
 0xf19   : > { %v1284_v15 = vsel %vm1283_vm13, %v4483_v23, %v1280_v11  ;;  %v4422_v23 = vld [vmem:[%s5805_s7 + $0x3d] ss:$0 sm:$0xff] }
 0xf1a   : > { %v1286_v17 = vmul.f32 %v1284_v15, %v1252_v46 }
 0xf1b   : > { %v1323_v18 = vpop.permute.xlu1 %1322  ;;  %1434 = vmatpush.bf16.msrb.mxu0 %v4310_v10 }
 0xf1c   : > { %v1289_v21 = vmul.f32 %v1287_v13, %v1286_v17  ;;  %v1326_v24 = vsel %vm1324_vm14, %v1321_v22, %v1323_v18  ;;  %v3967_v22 = vld [vmem:[%s5803_s5 + $0x7c] sm:$0xf]  ;;  %v4315_v17 = vld [vmem:[%s5803_s5 + $0xb0] sm:$0xf0] }
 0xf1d   : > { %1338 = vmatpush.bf16.msra.mxu2 %v1326_v24 }
 0xf1e   : > { %v1292_v7 = vadd.f32 %v1290_v19, %v1289_v21  ;;  %v3968_v19 = vor.u32 %v4315_v17, %v3967_v22 }
 0xf1f   : > { %1435 = vmatpush.bf16.msrb.mxu0 %v4309_v41 }
 0xf20   : > { %v1297_v32 = vpack.c.bf16 %v1292_v7, %v1291_v29 }
 0xf21   : > { %1339 = vmatpush.bf16.msra.mxu2 %v1325_v31  ;;  %v3963_v31 = vld [vmem:[%s5803_s5 + $0xc] sm:$0xf] }
 0xf23   : > { %1436 = vmatpush.bf16.msrb.mxu0 %v4308_v42 }
 0xf24   : > { %3928 = vmatmul.msk.bf16.vlgmr.msra.gmra.mxu2 %vm559_vm2, %v1297_v32  ;;  %v4314_v32 = vld [vmem:[%s5803_s5 + $0x40] sm:$0xf0] }
 0xf25   : > { %v3964_v36 = vor.u32 %v4314_v32, %v3963_v31 }
 0xf27   : > { %1437 = vmatpush.bf16.msrb.mxu0 %v4307_v43 }
 0xf2b   : > { %1438 = vmatpush.bf16.msrb.mxu0 %v4306_v45 }
 0xfa7   : > { %v1341_v46 = vpop.f32.mrf.mxu2 }
 0xfa8   : > { %v1342_v47 = vadd.f32 %v4421_v44, %v1341_v46 }
 0xfaa   : > { %v1346_v48 = vmul.f32 %v1342_v47, %v1342_v47 }
 0xfac   : > { %v1348_v49 = vmul.f32 %v1346_v48, %v1342_v47 }
 0xfae   : > { %v1350_v50 = vmul.f32 0.044715, %v1348_v49 }
 0xfaf   : > { %v1343_v51 = vpop.f32.mrf.mxu2 }
 0xfb0   : > { %v1352_v52 = vadd.f32 %v1350_v50, %v1342_v47  ;;  %v1344_v53 = vadd.f32 %v4421_v44, %v1343_v51 }
 0xfb2   : > { %v1354_v57 = vmul.f32 0.7978846, %v1352_v52  ;;  %v1347_v56 = vmul.f32 %v1344_v53, %v1344_v53 }
 0xfb4   : > { %v1349_v59 = vmul.f32 %v1347_v56, %v1344_v53  ;;  %4484 = vtanh.f32 %v1354_v57 }
 0xfb6   : > { %v1351_v60 = vmul.f32 0.044715, %v1349_v59 }
 0xfb8   : > { %v1353_v61 = vadd.f32 %v1351_v60, %v1344_v53  ;;  %v1491_v60 = vperm.slane %v5011_v25, 4 }
 0xfba   : > { %v1355_v62 = vmul.f32 0.7978846, %v1353_v61  ;;  %v4485_v0 = vpop.eup %4484 }
 0xfbb   : > { %v1358_v63 = vadd.f32 1.0, %v4485_v0 }
 0xfbc   : > { %4486 = vtanh.f32 %v1355_v62 }
 0xfbd   : > { %v1360_v2 = vmul.f32 0.5, %v1358_v63 }
 0xfbf   : > { %v1362_v5 = vmul.f32 %v1360_v2, %v1342_v47 }
 0xfc2   : > { %v4487_v1 = vpop.eup %4486 }
 0xfc3   : > { %v1359_v3 = vadd.f32 1.0, %v4487_v1  ;;  %v1494_v1 = vperm.slane %v5011_v25, 5 }
 0xfc5   : > { %v1361_v4 = vmul.f32 0.5, %v1359_v3 }
 0xfc7   : > { %v1363_v54 = vmul.f32 %v1361_v4, %v1344_v53 }
 0xfc9   : > { %v1380_v6 = vpack.c.bf16 %v1363_v54, %v1362_v5 }
 0xfcb   : > { %1439 = vmatmul.bf16.vlgmr.msrb.gmra.mxu0 %v1380_v6 }
0x1048   : > { %v1440_v26 = vpop.f32.mrf.mxu0 }
0x1049   : > { %v1441_v58 = vadd.f32 %v4422_v23, %v1440_v26 }
0x104b   : > { %v1445_v9 = vadd.f32 %v1441_v58, %v1291_v29 }
0x104d   : > { %v1447_v30 = vsel %vm559_vm2, %v1445_v9, 0.0 }
0x104e   : > { %1448 = vadd.xlane.f32.xlu0 %v1447_v30 }
0x1050   : > { %v1442_v33 = vpop.f32.mrf.mxu0 }
0x1051   : > { %v1443_v35 = vadd.f32 %v4422_v23, %v1442_v33 }
0x1053   : > { %v1446_v38 = vadd.f32 %v1443_v35, %v1292_v7 }
0x1055   : > { %v1450_v11 = vsel %vm559_vm2, %v1446_v38, 0.0 }
0x1056   : > { %1451 = vadd.xlane.f32.xlu2 %v1450_v11 }
0x106e   : > { %1515 = vrot.lane.b32.xlu2 %v3968_v19, %s4631_s19 }
0x10c1   : > { %v1449_v13 = vpop.xlane.xlu0 %1448 }
0x10c2   : > { %v1453_v14 = vmul.f32 %v1449_v13, %v4777_v8 }
0x10c4   : > { %v1455_v15 = vsub.f32 %v1445_v9, %v1453_v14 }
0x10c6   : > { %v1457_v18 = vmul.f32 %v1455_v15, %v1455_v15 }
0x10c8   : > { %v1459_v20 = vsel %vm559_vm2, %v1457_v18, 0.0 }
0x10c9   : > { %v1452_v21 = vpop.xlane.xlu2 %1451  ;;  %1460 = vadd.xlane.f32.xlu1 %v1459_v20 }
0x10ca   : > { %v1454_v24 = vmul.f32 %v1452_v21, %v4777_v8 }
0x10cc   : > { %v1456_v28 = vsub.f32 %v1446_v38, %v1454_v24 }
0x10ce   : > { %v1458_v7 = vmul.f32 %v1456_v28, %v1456_v28 }
0x10d0   : > { %v1462_v29 = vsel %vm559_vm2, %v1458_v7, 0.0 }
0x10d1   : > { %1463 = vadd.xlane.f32.xlu0 %v1462_v29  ;;  %v1516_v37 = vpop.permute.xlu2 %1515 }
0x10d2   : > { %1528 = vmatpush.bf16.msra.mxu1 %v1516_v37 }
0x10e5   : > { %1513 = vrot.lane.b32.xlu0 %v3964_v36, %s4631_s19 }
0x113c   : > { %v1461_v40 = vpop.xlane.xlu1 %1460 }
0x113d   : > { %v1465_v10 = vmul.f32 %v1461_v40, %v4777_v8 }
0x113f   : > { %v1467_v41 = vadd.f32 1e-05, %v1465_v10 }
0x1141   : > { %4488 = vrsqrt.f32 %v1467_v41  ;;  %vm1475_vm5 = vweird.f32 %v1467_v41 }
0x1144   : > { %v1464_v42 = vpop.xlane.xlu0 %1463 }
0x1145   : > { %v1466_v43 = vmul.f32 %v1464_v42, %v4777_v8  ;;  %v4317_v42 = vld [vmem:[%s5803_s5 + $0xb4] sm:$0xf0] }
0x1147   : > { %v4489_v44 = vpop.eup %4488  ;;  %v1468_v45 = vadd.f32 1e-05, %v1466_v43 }
0x1148   : > { %v1470_v46 = vmul.f32 %v4489_v44, %v1467_v41  ;;  %vm1476_vm3 = vweird.f32 %v4489_v44  ;;  %v3978_v41 = vld [vmem:[%s5803_s5 + $0x80] sm:$0xf] }
0x1149   : > { %4490 = vrsqrt.f32 %v1468_v45  ;;  %vm1477_vm6 = vmor %vm1475_vm5, %vm1476_vm3  ;;  %vm1485_vm8 = vweird.f32 %v1468_v45  ;;  %v3979_v43 = vor.u32 %v4317_v42, %v3978_v41 }
0x114a   : > { %v1471_v47 = vmul.f32 %v4489_v44, %v1470_v46 }
0x114c   : > { %v1472_v48 = vmul.f32 0.5, %v1471_v47 }
0x114e   : > { %v1473_v49 = vsub.f32 1.5, %v1472_v48 }
0x114f   : > { %v4491_v50 = vpop.eup %4490 }
0x1150   : > { %v1474_v51 = vmul.f32 %v4489_v44, %v1473_v49  ;;  %v1480_v52 = vmul.f32 %v4491_v50, %v1468_v45  ;;  %vm1486_vm7 = vweird.f32 %v4491_v50  ;;  %v4316_v45 = vld [vmem:[%s5803_s5 + $0x44] sm:$0xf0] }
0x1151   : > { %vm1487_vm9 = vmor %vm1485_vm8, %vm1486_vm7 }
0x1152   : > { %v1481_v53 = vmul.f32 %v4491_v50, %v1480_v52  ;;  %v1478_v57 = vsel %vm1477_vm6, %v4489_v44, %v1474_v51  ;;  %v3974_v44 = vld [vmem:[%s5803_s5 + $0x10] sm:$0xf] }
0x1153   : > { %v1489_v61 = vmul.f32 %v1478_v57, %v1455_v15  ;;  %v3975_v46 = vor.u32 %v4316_v45, %v3974_v44 }
0x1154   : > { %v1482_v56 = vmul.f32 0.5, %v1481_v53 }
0x1155   : > { %v1492_v2 = vmul.f32 %v1491_v60, %v1489_v61 }
0x1156   : > { %v1483_v59 = vsub.f32 1.5, %v1482_v56 }
0x1157   : > { %v1514_v62 = vpop.permute.xlu0 %1513  ;;  %v1495_v5 = vadd.f32 %v1494_v1, %v1492_v2 }
0x1158   : > { %v1484_v0 = vmul.f32 %v4491_v50, %v1483_v59  ;;  %1529 = vmatpush.bf16.msra.mxu1 %v1514_v62 }
0x115a   : > { %v1488_v63 = vsel %vm1487_vm9, %v4491_v50, %v1484_v0 }
0x115b   : > { %v1490_v3 = vmul.f32 %v1488_v63, %v1456_v28 }
0x115c   : > { %1629 = vmatpush.bf16.msrb.mxu1 %v3979_v43 }
0x115d   : > { %v1493_v4 = vmul.f32 %v1491_v60, %v1490_v3 }
0x115f   : > { %v5136_v54 = vadd.f32 %v1494_v1, %v1493_v4 }
0x1160   : > { %1630 = vmatpush.bf16.msrb.mxu1 %v3975_v46 }
0x1161   : > { %v1502_v6 = vpack.c.bf16 %v5136_v54, %v1495_v5 }
0x1163   : > { %3969 = vmatmul.msk.bf16.vlgmr.msra.gmra.mxu1 %vm559_vm2, %v1502_v6 }
0x11e0   : > { %v1531_v23 = vpop.f32.mrf.mxu1 }
0x11e8   : > { %v1533_v26 = vpop.f32.mrf.mxu1 }
0x11e9   : > { %v1536_v58 = vpack.c.bf16 %v1533_v26, %v1531_v23 }
0x11eb   : > { %1538 = vrot.lane.b32.xlu1 %v1536_v58, %s4631_s19 }
0x125d   : > { %v1539_v9 = vpop.permute.xlu1 %1538 }
0x125e   : > { %v1544_v30 = vsel %vm559_vm2, %v1539_v9, 0 }
0x125f   : > { %1553 = vmatpush.bf16.xpose.msra.mxu3 %v1544_v30 }
0x1266   : > { %3970 = vmatmul.msk.bf16.vlgmr.msra.gmra.mxu3 %vm559_vm2, %v1536_v58 }
0x12e9   : > { %v1555_v25 = vpop.f32.mrf.mxu3 }
0x12ea   : > { %v1556_v33 = vadd.f32 %v1555_v25, %v4966_v12 }
0x12ec   : > { %v1560_v35 = vsel %vm824_vm10, %v1556_v33, -inf }
0x12ed   : > { %1561 = vmax.xlane.f32.xlu2 %v1560_v35 }
0x12f1   : > { %v1557_v38 = vpop.f32.mrf.mxu3 }
0x12f2   : > { %v1558_v11 = vadd.f32 %v1557_v38, %v4971_v16 }
0x12f4   : > { %v1563_v13 = vsel %vm824_vm10, %v1558_v11, -inf }
0x12f5   : > { %1564 = vmax.xlane.f32.xlu0 %v1563_v13 }
0x1309   : > { %1583 = vrot.lane.b32.xlu0 %v1536_v58, %s4634_s25 }
0x1311   : > { %1689 = vrot.lane.b32.xlu0 %v3975_v46, %s4634_s25 }
0x1319   : > { %1710 = vrot.lane.b32.xlu0 %v3975_v46, %s4631_s19 }
0x1360   : > { %v1562_v14 = vpop.xlane.xlu2 %1561 }
0x1361   : > { %v1566_v15 = vsub.f32 %v1556_v33, %v1562_v14 }
0x1363   : > { %v1568_v22 = vmul.f32 1.442695, %v1566_v15 }
0x1365   : > { %4492 = vpow2.f32 %v1568_v22 }
0x1368   : > { %v1565_v17 = vpop.xlane.xlu0 %1564 }
0x1369   : > { %v1567_v18 = vsub.f32 %v1558_v11, %v1565_v17  ;;  %v5182_v17 = vld [vmem:[%s5805_s7 + $0x3e] sm:$0x3f] }
0x136b   : > { %v4493_v19 = vpop.eup %4492  ;;  %v1570_v20 = vmul.f32 1.442695, %v1567_v18 }
0x136c   : > { %v1572_v21 = vsel %vm824_vm10, %v4493_v19, 0.0 }
0x136d   : > { %4494 = vpow2.f32 %v1570_v20  ;;  %1573 = vadd.xlane.f32.xlu1 %v1572_v21  ;;  %v1683_v21 = vperm.slane %v5182_v17, 0 }
0x1373   : > { %v4495_v24 = vpop.eup %4494 }
0x1374   : > { %v1575_v28 = vsel %vm824_vm10, %v4495_v24, 0.0 }
0x1375   : > { %1576 = vadd.xlane.f32.xlu2 %v1575_v28 }
0x137b   : > { %v1584_v7 = vpop.permute.xlu0 %1583 }
0x137c   : > { %1596 = vmatpush.bf16.msrb.mxu2 %v1584_v7 }
0x1383   : > { %v1690_v9 = vpop.permute.xlu0 %1689 }
0x13e0   : > { %v1574_v29 = vpop.xlane.xlu1 %1573 }
0x13e1   : > { %4496 = vrcp.f32 %v1574_v29  ;;  %v1686_v29 = vperm.slane %v5182_v17, 1 }
0x13e7   : > { %v4497_v32 = vpop.eup %4496 }
0x13e8   : > { %v1577_v31 = vpop.xlane.xlu2 %1576  ;;  %v1580_v37 = vmul.f32 %v4497_v32, %v4493_v19 }
0x13e9   : > { %4498 = vrcp.f32 %v1577_v31 }
0x13ef   : > { %v4499_v36 = vpop.eup %4498 }
0x13f0   : > { %v1581_v40 = vmul.f32 %v4499_v36, %v4495_v24 }
0x13f2   : > { %v1582_v10 = vpack.c.bf16 %v1581_v40, %v1580_v37  ;;  %v1711_v40 = vpop.permute.xlu0 %1710 }
0x13f4   : > { %3971 = vmatmul.msk.bf16.vlgmr.msrb.gmra.mxu2 %vm824_vm10, %v1582_v10 }
0x1477   : > { %v1598_v47 = vpop.f32.mrf.mxu2 }
0x147f   : > { %v1600_v48 = vpop.f32.mrf.mxu2 }
0x1480   : > { %v1607_v49 = vpack.c.bf16 %v1600_v48, %v1598_v47 }
0x1482   : > { %3980 = vmatmul.msk.bf16.vlgmr.msrb.gmra.mxu1 %vm559_vm2, %v1607_v49 }
0x14ff   : > { %v1632_v50 = vpop.f32.mrf.mxu1 }
0x1500   : > { %v1637_v51 = vadd.f32 %v1632_v50, %v1495_v5 }
0x1502   : > { %v1639_v52 = vsel %vm559_vm2, %v1637_v51, 0.0 }
0x1503   : > { %1640 = vadd.xlane.f32.xlu2 %v1639_v52 }
0x1507   : > { %v1634_v53 = vpop.f32.mrf.mxu1 }
0x1508   : > { %v1638_v57 = vadd.f32 %v1634_v53, %v5136_v54 }
0x150a   : > { %v1642_v56 = vsel %vm559_vm2, %v1638_v57, 0.0 }
0x150b   : > { %1643 = vadd.xlane.f32.xlu1 %v1642_v56 }
0x1576   : > { %v1641_v59 = vpop.xlane.xlu2 %1640 }
0x1577   : > { %v1645_v60 = vmul.f32 %v1641_v59, %v4777_v8 }
0x1579   : > { %v1647_v61 = vsub.f32 %v1637_v51, %v1645_v60 }
0x157b   : > { %v1649_v62 = vmul.f32 %v1647_v61, %v1647_v61 }
0x157d   : > { %v1651_v0 = vsel %vm559_vm2, %v1649_v62, 0.0 }
0x157e   : > { %1652 = vadd.xlane.f32.xlu2 %v1651_v0  ;;  %v1644_v63 = vpop.xlane.xlu1 %1643 }
0x157f   : > { %v1646_v1 = vmul.f32 %v1644_v63, %v4777_v8 }
0x1581   : > { %v1648_v2 = vsub.f32 %v1638_v57, %v1646_v1 }
0x1583   : > { %v1650_v3 = vmul.f32 %v1648_v2, %v1648_v2 }
0x1585   : > { %v1654_v4 = vsel %vm559_vm2, %v1650_v3, 0.0 }
0x1586   : > { %1655 = vadd.xlane.f32.xlu1 %v1654_v4 }
0x1596   : > { %1691 = vrot.lane.b32.xlu2 %v3979_v43, %s4634_s25 }
0x159f   : > { %1712 = vrot.lane.b32.xlu1 %v3979_v43, %s4631_s19 }
0x15f1   : > { %v1653_v5 = vpop.xlane.xlu2 %1652 }
0x15f2   : > { %v1657_v54 = vmul.f32 %v1653_v5, %v4777_v8 }
0x15f4   : > { %v1659_v6 = vadd.f32 1e-05, %v1657_v54 }
0x15f6   : > { %4500 = vrsqrt.f32 %v1659_v6  ;;  %vm1667_vm12 = vweird.f32 %v1659_v6 }
0x15f9   : > { %v1692_v23 = vpop.permute.xlu2 %1691  ;;  %v1656_v26 = vpop.xlane.xlu1 %1655 }
0x15fa   : > { %v1658_v58 = vmul.f32 %v1656_v26, %v4777_v8  ;;  %1701 = vmatpush.bf16.msrb.mxu3 %v1692_v23 }
0x15fc   : > { %v4501_v30 = vpop.eup %4500  ;;  %v1660_v25 = vadd.f32 1e-05, %v1658_v58 }
0x15fd   : > { %v1662_v33 = vmul.f32 %v4501_v30, %v1659_v6  ;;  %vm1668_vm11 = vweird.f32 %v4501_v30 }
0x15fe   : > { %4502 = vrsqrt.f32 %v1660_v25  ;;  %1702 = vmatpush.bf16.msrb.mxu3 %v1690_v9  ;;  %vm1669_vm13 = vmor %vm1667_vm12, %vm1668_vm11  ;;  %vm1677_vm5 = vweird.f32 %v1660_v25  ;;  %v3991_v9 = vld [vmem:[%s5803_s5 + $0x84] sm:$0xf] }
0x15ff   : > { %v1663_v35 = vmul.f32 %v4501_v30, %v1662_v33  ;;  %v3987_v33 = vld [vmem:[%s5803_s5 + $0x14] sm:$0xf] }
0x1601   : > { %v1664_v38 = vmul.f32 0.5, %v1663_v35  ;;  %3981 = vmatmul.msk.bf16.vlgmr.msrb.gmra.mxu3 %vm559_vm2, %v4889_v55  ;;  %v4318_v35 = vld [vmem:[%s5803_s5 + $0x48] sm:$0xf0] }
0x1603   : > { %v1665_v11 = vsub.f32 1.5, %v1664_v38  ;;  %v3988_v38 = vor.u32 %v4318_v35, %v3987_v33 }
0x1604   : > { %v4503_v13 = vpop.eup %4502 }
0x1605   : > { %v1666_v14 = vmul.f32 %v4501_v30, %v1665_v11  ;;  %v1672_v15 = vmul.f32 %v4503_v13, %v1660_v25  ;;  %vm1678_vm3 = vweird.f32 %v4503_v13 }
0x1606   : > { %vm1679_vm6 = vmor %vm1677_vm5, %vm1678_vm3 }
0x1607   : > { %v1673_v22 = vmul.f32 %v4503_v13, %v1672_v15  ;;  %v1670_v18 = vsel %vm1669_vm13, %v4501_v30, %v1666_v14  ;;  %v4319_v30 = vld [vmem:[%s5803_s5 + $0xb8] sm:$0xf0] }
0x1608   : > { %v1681_v24 = vmul.f32 %v1670_v18, %v1647_v61  ;;  %v3992_v25 = vor.u32 %v4319_v30, %v3991_v9  ;;  %v1879_v30 = vperm.slane %v5182_v17, 2 }
0x1609   : > { %v1674_v19 = vmul.f32 0.5, %v1673_v22 }
0x160a   : > { %v1684_v31 = vmul.f32 %v1683_v21, %v1681_v24  ;;  %1825 = vmatpush.bf16.msra.mxu3 %v3992_v25 }
0x160b   : > { %v1675_v20 = vsub.f32 1.5, %v1674_v19 }
0x160c   : > { %v1687_v10 = vadd.f32 %v1686_v29, %v1684_v31 }
0x160d   : > { %v1676_v28 = vmul.f32 %v4503_v13, %v1675_v20 }
0x160e   : > { %1826 = vmatpush.bf16.msra.mxu3 %v3988_v38 }
0x160f   : > { %v1680_v7 = vsel %vm1679_vm6, %v4503_v13, %v1676_v28 }
0x1610   : > { %v1682_v32 = vmul.f32 %v1680_v7, %v1648_v2 }
0x1611   : > { %v1713_v36 = vpop.permute.xlu1 %1712 }
0x1612   : > { %v1685_v37 = vmul.f32 %v1683_v21, %v1682_v32  ;;  %1725 = vmatpush.bf16.msra.mxu2 %v1713_v36 }
0x1614   : > { %v5186_v41 = vadd.f32 %v1686_v29, %v1685_v37  ;;  %v3996_v37 = vld [vmem:[%s5803_s5 + $0x14] sm:$0xf] }
0x1616   : > { %1726 = vmatpush.bf16.msra.mxu2 %v1711_v40  ;;  %v1709_v42 = vpack.c.bf16 %v5186_v41, %v1687_v10  ;;  %v4321_v40 = vld [vmem:[%s5803_s5 + $0x48] sm:$0xf0] }
0x1619   : > { %3982 = vmatmul.msk.bf16.vlgmr.msra.gmra.mxu2 %vm559_vm2, %v1709_v42 }
0x1684   : > { %v1704_v43 = vpop.f32.mrf.mxu3 }
0x168c   : > { %v1706_v44 = vpop.f32.mrf.mxu3 }
0x168d   : > { %v1734_v45 = vpack.c.bf16 %v1706_v44, %v1704_v43  ;;  %v4320_v43 = vld [vmem:[%s5803_s5 + $0x18] sm:$0xf]  ;;  %v3998_v44 = vld [vmem:[%s5803_s5 + $0x4c] sm:$0xf0] }
0x168f   : > { %v1739_v46 = vsel %vm559_vm2, %v1734_v45, 0 }
0x1690   : > { %1748 = vmatpush.bf16.xpose.msra.mxu0 %v1739_v46  ;;  %v4001_v46 = vor.u32 %v4320_v43, %v3998_v44 }
0x169c   : > { %v1728_v47 = vpop.f32.mrf.mxu2 }
0x16a4   : > { %v1730_v48 = vpop.f32.mrf.mxu2 }
0x16a5   : > { %v1733_v49 = vpack.c.bf16 %v1730_v48, %v1728_v47  ;;  %v4004_v47 = vld [vmem:[%s5803_s5 + $0x84] sm:$0xf]  ;;  %v4323_v48 = vld [vmem:[%s5803_s5 + $0xb8] sm:$0xf0] }
0x16a7   : > { %3983 = vmatmul.msk.bf16.vlgmr.msra.gmra.mxu0 %vm559_vm2, %v1733_v49  ;;  %v4005_v49 = vor.u32 %v4323_v48, %v4004_v47 }
0x1724   : > { %v1750_v50 = vpop.f32.mrf.mxu0 }
0x1725   : > { %v1755_v51 = vsel %vm824_vm10, %v1750_v50, -inf }
0x1726   : > { %1756 = vmax.xlane.f32.xlu0 %v1755_v51  ;;  %v4006_v51 = vld [vmem:[%s5803_s5 + $0xbc] sm:$0xf0] }
0x172c   : > { %v1752_v52 = vpop.f32.mrf.mxu0 }
0x172d   : > { %v1758_v53 = vsel %vm824_vm10, %v1752_v52, -inf }
0x172e   : > { %1759 = vmax.xlane.f32.xlu2 %v1758_v53 }
0x1746   : > { %1779 = vrot.lane.b32.xlu2 %v1734_v45, %s4631_s19 }
0x1799   : > { %v1757_v57 = vpop.xlane.xlu0 %1756 }
0x179a   : > { %v1761_v56 = vsub.f32 %v1750_v50, %v1757_v57  ;;  %v4322_v50 = vld [vmem:[%s5803_s5 + $0x88] sm:$0xf] }
0x179c   : > { %v1763_v59 = vmul.f32 1.442695, %v1761_v56 }
0x179e   : > { %4504 = vpow2.f32 %v1763_v59 }
0x17a1   : > { %v1760_v60 = vpop.xlane.xlu2 %1759 }
0x17a2   : > { %v1762_v61 = vsub.f32 %v1752_v52, %v1760_v60  ;;  %v4009_v52 = vor.u32 %v4322_v50, %v4006_v51 }
0x17a4   : > { %v4505_v62 = vpop.eup %4504  ;;  %v1765_v0 = vmul.f32 1.442695, %v1762_v61 }
0x17a5   : > { %v1767_v63 = vsel %vm824_vm10, %v4505_v62, 0.0 }
0x17a6   : > { %4506 = vpow2.f32 %v1765_v0  ;;  %1768 = vadd.xlane.f32.xlu1 %v1767_v63 }
0x17a9   : > { %v1780_v1 = vpop.permute.xlu2 %1779 }
0x17aa   : > { %1792 = vmatpush.bf16.msra.mxu1 %v1780_v1 }
0x17ac   : > { %v4507_v2 = vpop.eup %4506 }
0x17ad   : > { %v1770_v3 = vsel %vm824_vm10, %v4507_v2, 0.0 }
0x17ae   : > { %1771 = vadd.xlane.f32.xlu0 %v1770_v3 }
0x1819   : > { %v1769_v4 = vpop.xlane.xlu1 %1768 }
0x181a   : > { %4508 = vrcp.f32 %v1769_v4 }
0x1820   : > { %v4509_v54 = vpop.eup %4508 }
0x1821   : > { %v1772_v5 = vpop.xlane.xlu0 %1771  ;;  %v1775_v23 = vmul.f32 %v4509_v54, %v4505_v62 }
0x1822   : > { %4510 = vrcp.f32 %v1772_v5 }
0x1828   : > { %v4511_v6 = vpop.eup %4510 }
0x1829   : > { %v1776_v26 = vmul.f32 %v4511_v6, %v4507_v2 }
0x182b   : > { %v1777_v58 = vpack.c.bf16 %v1776_v26, %v1775_v23 }
0x182d   : > { %3984 = vmatmul.msk.bf16.vlgmr.msra.gmra.mxu1 %vm824_vm10, %v1777_v58 }
0x18aa   : > { %v1794_v11 = vpop.f32.mrf.mxu1 }
0x18b2   : > { %v1796_v13 = vpop.f32.mrf.mxu1 }
0x18b3   : > { %v1803_v14 = vpack.c.bf16 %v1796_v13, %v1794_v11  ;;  %v1882_v13 = vperm.slane %v5182_v17, 3 }
0x18b5   : > { %3993 = vmatmul.msk.bf16.vlgmr.msra.gmra.mxu3 %vm559_vm2, %v1803_v14 }
0x1938   : > { %v1828_v15 = vpop.f32.mrf.mxu3 }
0x1939   : > { %v1833_v22 = vadd.f32 %v1828_v15, %v1687_v10  ;;  %v3997_v10 = vor.u32 %v4321_v40, %v3996_v37  ;;  %v4325_v37 = vld [vmem:[%s5804_s6 + $0xa8] sm:$0xff]  ;;  %v4423_v40 = vld [vmem:[%s5805_s7 + $0x44] ss:$0 sm:$0xff] }
0x193b   : > { %v1835_v18 = vsel %vm559_vm2, %v1833_v22, 0.0  ;;  %1908 = vrot.lane.b32.xlu2 %v3997_v10, %s4631_s19  ;;  %v4324_v10 = vld [vmem:[%s5804_s6 + $0xa0] sm:$0xff] }
0x193c   : > { %1836 = vadd.xlane.f32.xlu0 %v1835_v18 }
0x1940   : > { %v1830_v19 = vpop.f32.mrf.mxu3 }
0x1941   : > { %v1834_v20 = vadd.f32 %v1830_v19, %v5186_v41 }
0x1943   : > { %v1838_v21 = vsel %vm559_vm2, %v1834_v20, 0.0  ;;  %1910 = vrot.lane.b32.xlu2 %v4001_v46, %s4631_s19 }
0x1944   : > { %1839 = vadd.xlane.f32.xlu1 %v1838_v21 }
0x1995   : > { %v1909_v23 = vpop.permute.xlu2 %1908 }
0x199d   : > { %v1911_v18 = vpop.permute.xlu2 %1910 }
0x199e   : > { %v1916_v21 = vsel %vm1324_vm14, %v1909_v23, %v1911_v18 }
0x19af   : > { %v1837_v24 = vpop.xlane.xlu0 %1836 }
0x19b0   : > { %v1841_v28 = vmul.f32 %v1837_v24, %v4777_v8 }
0x19b2   : > { %v1843_v7 = vsub.f32 %v1833_v22, %v1841_v28  ;;  %v4331_v28 = vld [vmem:[%s5804_s6 + $0xd8] sm:$0xff] }
0x19b3   : > { %2022 = vmatpush.bf16.msrb.mxu0 %v4331_v28 }
0x19b4   : > { %v1845_v29 = vmul.f32 %v1843_v7, %v1843_v7 }
0x19b6   : > { %v1847_v31 = vsel %vm559_vm2, %v1845_v29, 0.0  ;;  %v4329_v29 = vld [vmem:[%s5804_s6 + $0xc8] sm:$0xff] }
0x19b7   : > { %1848 = vadd.xlane.f32.xlu0 %v1847_v31  ;;  %v1840_v32 = vpop.xlane.xlu1 %1839  ;;  %v4328_v31 = vld [vmem:[%s5804_s6 + $0xc0] sm:$0xff] }
0x19b8   : > { %v1842_v36 = vmul.f32 %v1840_v32, %v4777_v8  ;;  %v4327_v32 = vld [vmem:[%s5804_s6 + $0xb8] sm:$0xff] }
0x19ba   : > { %v1844_v41 = vsub.f32 %v1834_v20, %v1842_v36  ;;  %v4326_v36 = vld [vmem:[%s5804_s6 + $0xb0] sm:$0xff] }
0x19bc   : > { %v1846_v42 = vmul.f32 %v1844_v41, %v1844_v41 }
0x19be   : > { %v1850_v45 = vsel %vm559_vm2, %v1846_v42, 0.0 }
0x19bf   : > { %1851 = vadd.xlane.f32.xlu1 %v1850_v45 }
0x19cb   : > { %1912 = vrot.lane.b32.xlu0 %v4005_v49, %s4631_s19 }
0x19d8   : > { %1914 = vrot.lane.b32.xlu1 %v4009_v52, %s4631_s19 }
0x1a2a   : > { %v1849_v53 = vpop.xlane.xlu0 %1848 }
0x1a2b   : > { %v1853_v57 = vmul.f32 %v1849_v53, %v4777_v8 }
0x1a2d   : > { %v1855_v56 = vadd.f32 1e-05, %v1853_v57 }
0x1a2f   : > { %4512 = vrsqrt.f32 %v1855_v56  ;;  %vm1863_vm8 = vweird.f32 %v1855_v56 }
0x1a32   : > { %v1852_v59 = vpop.xlane.xlu1 %1851 }
0x1a33   : > { %v1854_v60 = vmul.f32 %v1852_v59, %v4777_v8 }
0x1a35   : > { %v4513_v61 = vpop.eup %4512  ;;  %v1856_v62 = vadd.f32 1e-05, %v1854_v60 }
0x1a36   : > { %v1858_v0 = vmul.f32 %v4513_v61, %v1855_v56  ;;  %vm1864_vm7 = vweird.f32 %v4513_v61 }
0x1a37   : > { %4514 = vrsqrt.f32 %v1856_v62  ;;  %vm1865_vm9 = vmor %vm1863_vm8, %vm1864_vm7  ;;  %vm1873_vm12 = vweird.f32 %v1856_v62 }
0x1a38   : > { %v1859_v63 = vmul.f32 %v4513_v61, %v1858_v0 }
0x1a3a   : > { %v1860_v1 = vmul.f32 0.5, %v1859_v63 }
0x1a3c   : > { %v1861_v2 = vsub.f32 1.5, %v1860_v1 }
0x1a3d   : > { %v4515_v3 = vpop.eup %4514  ;;  %v1913_v35 = vpop.permute.xlu0 %1912 }
0x1a3e   : > { %v1868_v4 = vmul.f32 %v4515_v3, %v1856_v62  ;;  %v1862_v5 = vmul.f32 %v4513_v61, %v1861_v2  ;;  %vm1874_vm11 = vweird.f32 %v4515_v3 }
0x1a3f   : > { %vm1875_vm13 = vmor %vm1873_vm12, %vm1874_vm11 }
0x1a40   : > { %v1869_v54 = vmul.f32 %v4515_v3, %v1868_v4  ;;  %v1866_v26 = vsel %vm1865_vm9, %v4513_v61, %v1862_v5 }
0x1a41   : > { %v1877_v25 = vmul.f32 %v1866_v26, %v1843_v7  ;;  %v4330_v7 = vld [vmem:[%s5804_s6 + $0xd0] sm:$0xff] }
0x1a42   : > { %v1870_v6 = vmul.f32 0.5, %v1869_v54  ;;  %2023 = vmatpush.bf16.msrb.mxu0 %v4330_v7 }
0x1a43   : > { %v1880_v14 = vmul.f32 %v1879_v30, %v1877_v25 }
0x1a44   : > { %v1871_v58 = vsub.f32 1.5, %v1870_v6 }
0x1a45   : > { %v1883_v20 = vadd.f32 %v1882_v13, %v1880_v14 }
0x1a46   : > { %v1872_v9 = vmul.f32 %v4515_v3, %v1871_v58  ;;  %2024 = vmatpush.bf16.msrb.mxu0 %v4329_v29 }
0x1a48   : > { %v1876_v33 = vsel %vm1875_vm13, %v4515_v3, %v1872_v9  ;;  %v4424_v3 = vld [vmem:[%s5805_s7 + $0x45] ss:$0 sm:$0xff] }
0x1a49   : > { %v1878_v38 = vmul.f32 %v1876_v33, %v1844_v41  ;;  %v4049_v33 = vld [vmem:[%s5803_s5 + $0x88] sm:$0xf] }
0x1a4a   : > { %v1915_v11 = vpop.permute.xlu1 %1914  ;;  %2025 = vmatpush.bf16.msrb.mxu0 %v4328_v31 }
0x1a4b   : > { %v1881_v15 = vmul.f32 %v1879_v30, %v1878_v38  ;;  %v1917_v22 = vsel %vm1324_vm14, %v1913_v35, %v1915_v11  ;;  %v4333_v35 = vld [vmem:[%s5803_s5 + $0xbc] sm:$0xf0] }
0x1a4c   : > { %1929 = vmatpush.bf16.msrb.mxu2 %v1917_v22  ;;  %v4050_v38 = vor.u32 %v4333_v35, %v4049_v33 }
0x1a4d   : > { %v1884_v19 = vadd.f32 %v1882_v13, %v1881_v15 }
0x1a4e   : > { %2026 = vmatpush.bf16.msrb.mxu0 %v4327_v32 }
0x1a4f   : > { %v1889_v24 = vpack.c.bf16 %v1884_v19, %v1883_v20 }
0x1a50   : > { %1930 = vmatpush.bf16.msrb.mxu2 %v1916_v21  ;;  %v4045_v21 = vld [vmem:[%s5803_s5 + $0x18] sm:$0xf] }
0x1a52   : > { %2027 = vmatpush.bf16.msrb.mxu0 %v4326_v36 }
0x1a53   : > { %4010 = vmatmul.msk.bf16.vlgmr.msrb.gmra.mxu2 %vm559_vm2, %v1889_v24  ;;  %v4332_v24 = vld [vmem:[%s5803_s5 + $0x4c] sm:$0xf0] }
0x1a54   : > { %v4046_v28 = vor.u32 %v4332_v24, %v4045_v21 }
0x1a56   : > { %2028 = vmatpush.bf16.msrb.mxu0 %v4325_v37 }
0x1a5a   : > { %2029 = vmatpush.bf16.msrb.mxu0 %v4324_v10 }
0x1ad6   : > { %v1932_v41 = vpop.f32.mrf.mxu2 }
0x1ad7   : > { %v1933_v42 = vadd.f32 %v4423_v40, %v1932_v41 }
0x1ad9   : > { %v1937_v43 = vmul.f32 %v1933_v42, %v1933_v42 }
0x1adb   : > { %v1939_v44 = vmul.f32 %v1937_v43, %v1933_v42 }
0x1add   : > { %v1941_v45 = vmul.f32 0.044715, %v1939_v44 }
0x1ade   : > { %v1934_v46 = vpop.f32.mrf.mxu2 }
0x1adf   : > { %v1943_v47 = vadd.f32 %v1941_v45, %v1933_v42  ;;  %v1935_v48 = vadd.f32 %v4423_v40, %v1934_v46 }
0x1ae1   : > { %v1945_v49 = vmul.f32 0.7978846, %v1943_v47  ;;  %v1938_v50 = vmul.f32 %v1935_v48, %v1935_v48 }
0x1ae3   : > { %v1940_v51 = vmul.f32 %v1938_v50, %v1935_v48  ;;  %4516 = vtanh.f32 %v1945_v49 }
0x1ae5   : > { %v1942_v52 = vmul.f32 0.044715, %v1940_v51 }
0x1ae7   : > { %v1944_v53 = vadd.f32 %v1942_v52, %v1935_v48 }
0x1ae9   : > { %v1946_v57 = vmul.f32 0.7978846, %v1944_v53  ;;  %v4517_v56 = vpop.eup %4516  ;;  %v2082_v53 = vperm.slane %v5182_v17, 4 }
0x1aea   : > { %v1949_v59 = vadd.f32 1.0, %v4517_v56 }
0x1aeb   : > { %4518 = vtanh.f32 %v1946_v57 }
0x1aec   : > { %v1951_v61 = vmul.f32 0.5, %v1949_v59 }
0x1aee   : > { %v1953_v63 = vmul.f32 %v1951_v61, %v1933_v42 }
0x1af1   : > { %v4519_v60 = vpop.eup %4518 }
0x1af2   : > { %v1950_v62 = vadd.f32 1.0, %v4519_v60  ;;  %v2085_v60 = vperm.slane %v5182_v17, 5 }
0x1af4   : > { %v1952_v0 = vmul.f32 0.5, %v1950_v62 }
0x1af6   : > { %v1954_v1 = vmul.f32 %v1952_v0, %v1935_v48 }
0x1af8   : > { %v1971_v2 = vpack.c.bf16 %v1954_v1, %v1953_v63 }
0x1afa   : > { %2030 = vmatmul.bf16.vlgmr.msrb.gmra.mxu0 %v1971_v2 }
0x1b77   : > { %v2031_v4 = vpop.f32.mrf.mxu0 }
0x1b78   : > { %v2032_v5 = vadd.f32 %v4424_v3, %v2031_v4 }
0x1b7a   : > { %v2036_v54 = vadd.f32 %v2032_v5, %v1883_v20 }
0x1b7c   : > { %v2038_v6 = vsel %vm559_vm2, %v2036_v54, 0.0 }
0x1b7d   : > { %2039 = vadd.xlane.f32.xlu0 %v2038_v6 }
0x1b7f   : > { %v2033_v23 = vpop.f32.mrf.mxu0 }
0x1b80   : > { %v2034_v26 = vadd.f32 %v4424_v3, %v2033_v23 }
0x1b82   : > { %v2037_v58 = vadd.f32 %v2034_v26, %v1884_v19 }
0x1b84   : > { %v2041_v9 = vsel %vm559_vm2, %v2037_v58, 0.0 }
0x1b85   : > { %2042 = vadd.xlane.f32.xlu2 %v2041_v9 }
0x1b9d   : > { %2106 = vrot.lane.b32.xlu2 %v4050_v38, %s4631_s19 }
0x1bf0   : > { %v2040_v30 = vpop.xlane.xlu0 %2039 }
0x1bf1   : > { %v2044_v25 = vmul.f32 %v2040_v30, %v4777_v8 }
0x1bf3   : > { %v2046_v11 = vsub.f32 %v2036_v54, %v2044_v25 }
0x1bf5   : > { %v2048_v13 = vmul.f32 %v2046_v11, %v2046_v11 }
0x1bf7   : > { %v2050_v14 = vsel %vm559_vm2, %v2048_v13, 0.0 }
0x1bf8   : > { %v2043_v15 = vpop.xlane.xlu2 %2042  ;;  %2051 = vadd.xlane.f32.xlu1 %v2050_v14 }
0x1bf9   : > { %v2045_v22 = vmul.f32 %v2043_v15, %v4777_v8 }
0x1bfb   : > { %v2047_v18 = vsub.f32 %v2037_v58, %v2045_v22 }
0x1bfd   : > { %v2049_v19 = vmul.f32 %v2047_v18, %v2047_v18 }
0x1bff   : > { %v2053_v20 = vsel %vm559_vm2, %v2049_v19, 0.0 }
0x1c00   : > { %2054 = vadd.xlane.f32.xlu0 %v2053_v20  ;;  %v2107_v7 = vpop.permute.xlu2 %2106 }
0x1c01   : > { %2119 = vmatpush.bf16.msrb.mxu1 %v2107_v7 }
0x1c11   : > { %2104 = vrot.lane.b32.xlu1 %v4046_v28, %s4631_s19 }
0x1c6b   : > { %v2052_v29 = vpop.xlane.xlu1 %2051 }
0x1c6c   : > { %v2056_v31 = vmul.f32 %v2052_v29, %v4777_v8 }
0x1c6e   : > { %v2058_v32 = vadd.f32 1e-05, %v2056_v31 }
0x1c70   : > { %4520 = vrsqrt.f32 %v2058_v32  ;;  %vm2066_vm5 = vweird.f32 %v2058_v32 }
0x1c73   : > { %v2055_v36 = vpop.xlane.xlu0 %2054 }
0x1c74   : > { %v2057_v37 = vmul.f32 %v2055_v36, %v4777_v8  ;;  %v4335_v36 = vld [vmem:[%s5803_s5 + $0xc0] sm:$0xf0] }
0x1c76   : > { %v4521_v40 = vpop.eup %4520  ;;  %v2059_v10 = vadd.f32 1e-05, %v2057_v37 }
0x1c77   : > { %v2061_v41 = vmul.f32 %v4521_v40, %v2058_v32  ;;  %vm2067_vm3 = vweird.f32 %v4521_v40  ;;  %v4060_v32 = vld [vmem:[%s5803_s5 + $0x8c] sm:$0xf] }
0x1c78   : > { %4522 = vrsqrt.f32 %v2059_v10  ;;  %vm2068_vm6 = vmor %vm2066_vm5, %vm2067_vm3  ;;  %vm2076_vm8 = vweird.f32 %v2059_v10  ;;  %v4061_v37 = vor.u32 %v4335_v36, %v4060_v32 }
0x1c79   : > { %v2062_v42 = vmul.f32 %v4521_v40, %v2061_v41 }
0x1c7b   : > { %v2063_v43 = vmul.f32 0.5, %v2062_v42 }
0x1c7d   : > { %v2064_v44 = vsub.f32 1.5, %v2063_v43 }
0x1c7e   : > { %v4523_v45 = vpop.eup %4522 }
0x1c7f   : > { %v2065_v46 = vmul.f32 %v4521_v40, %v2064_v44  ;;  %v2071_v47 = vmul.f32 %v4523_v45, %v2059_v10  ;;  %vm2077_vm7 = vweird.f32 %v4523_v45  ;;  %v4334_v10 = vld [vmem:[%s5803_s5 + $0x50] sm:$0xf0] }
0x1c80   : > { %vm2078_vm9 = vmor %vm2076_vm8, %vm2077_vm7 }
0x1c81   : > { %v2072_v48 = vmul.f32 %v4523_v45, %v2071_v47  ;;  %v2069_v49 = vsel %vm2068_vm6, %v4521_v40, %v2065_v46  ;;  %v4056_v40 = vld [vmem:[%s5803_s5 + $0x1c] sm:$0xf] }
0x1c82   : > { %v2080_v57 = vmul.f32 %v2069_v49, %v2046_v11  ;;  %v4057_v41 = vor.u32 %v4334_v10, %v4056_v40 }
0x1c83   : > { %v2073_v50 = vmul.f32 0.5, %v2072_v48  ;;  %v2105_v51 = vpop.permute.xlu1 %2104 }
0x1c84   : > { %2120 = vmatpush.bf16.msrb.mxu1 %v2105_v51  ;;  %v2083_v61 = vmul.f32 %v2082_v53, %v2080_v57 }
0x1c85   : > { %v2074_v52 = vsub.f32 1.5, %v2073_v50 }
0x1c86   : > { %v2086_v63 = vadd.f32 %v2085_v60, %v2083_v61 }
0x1c87   : > { %v2075_v56 = vmul.f32 %v4523_v45, %v2074_v52 }
0x1c88   : > { %2220 = vmatpush.bf16.msra.mxu1 %v4061_v37 }
0x1c89   : > { %v2079_v59 = vsel %vm2078_vm9, %v4523_v45, %v2075_v56 }
0x1c8a   : > { %v2081_v62 = vmul.f32 %v2079_v59, %v2047_v18 }
0x1c8c   : > { %v2084_v0 = vmul.f32 %v2082_v53, %v2081_v62  ;;  %2221 = vmatpush.bf16.msra.mxu1 %v4057_v41 }
0x1c8e   : > { %v5307_v1 = vadd.f32 %v2085_v60, %v2084_v0 }
0x1c90   : > { %v2093_v2 = vpack.c.bf16 %v5307_v1, %v2086_v63 }
0x1c92   : > { %4051 = vmatmul.msk.bf16.vlgmr.msrb.gmra.mxu1 %vm559_vm2, %v2093_v2 }
0x1d0f   : > { %v2122_v3 = vpop.f32.mrf.mxu1 }
0x1d17   : > { %v2124_v4 = vpop.f32.mrf.mxu1 }
0x1d18   : > { %v2127_v5 = vpack.c.bf16 %v2124_v4, %v2122_v3 }
0x1d1a   : > { %2129 = vrot.lane.b32.xlu0 %v2127_v5, %s4631_s19 }
0x1d8c   : > { %v2130_v54 = vpop.permute.xlu0 %2129 }
0x1d8d   : > { %v2135_v6 = vsel %vm559_vm2, %v2130_v54, 0 }
0x1d8e   : > { %2144 = vmatpush.bf16.xpose.msrb.mxu3 %v2135_v6 }
0x1d95   : > { %4052 = vmatmul.msk.bf16.vlgmr.msrb.gmra.mxu3 %vm559_vm2, %v2127_v5 }
0x1e18   : > { %v2146_v17 = vpop.f32.mrf.mxu3 }
0x1e19   : > { %v2147_v23 = vadd.f32 %v2146_v17, %v4966_v12 }
0x1e1b   : > { %v2151_v26 = vsel %vm824_vm10, %v2147_v23, -inf }
0x1e1c   : > { %2152 = vmax.xlane.f32.xlu2 %v2151_v26 }
0x1e20   : > { %v2148_v58 = vpop.f32.mrf.mxu3 }
0x1e21   : > { %v2149_v9 = vadd.f32 %v2148_v58, %v4971_v16 }
0x1e23   : > { %v2154_v30 = vsel %vm824_vm10, %v2149_v9, -inf }
0x1e24   : > { %2155 = vmax.xlane.f32.xlu0 %v2154_v30 }
0x1e38   : > { %2174 = vrot.lane.b32.xlu0 %v2127_v5, %s4634_s25 }
0x1e40   : > { %2282 = vrot.lane.b32.xlu0 %v4061_v37, %s4634_s25 }
0x1e48   : > { %2301 = vrot.lane.b32.xlu0 %v4057_v41, %s4631_s19 }
0x1e8f   : > { %v2153_v25 = vpop.xlane.xlu2 %2152 }
0x1e90   : > { %v2157_v33 = vsub.f32 %v2147_v23, %v2153_v25 }
0x1e92   : > { %v2159_v35 = vmul.f32 1.442695, %v2157_v33 }
0x1e94   : > { %4524 = vpow2.f32 %v2159_v35 }
0x1e97   : > { %v2156_v38 = vpop.xlane.xlu0 %2155 }
0x1e98   : > { %v2158_v11 = vsub.f32 %v2149_v9, %v2156_v38 }
0x1e9a   : > { %v4525_v13 = vpop.eup %4524  ;;  %v2161_v14 = vmul.f32 1.442695, %v2158_v11  ;;  %v5351_v11 = vld [vmem:[%s5805_s7 + $0x46] sm:$0x3f] }
0x1e9b   : > { %v2163_v15 = vsel %vm824_vm10, %v4525_v13, 0.0 }
0x1e9c   : > { %4526 = vpow2.f32 %v2161_v14  ;;  %2164 = vadd.xlane.f32.xlu1 %v2163_v15 }
0x1ea2   : > { %v4527_v22 = vpop.eup %4526 }
0x1ea3   : > { %v2166_v18 = vsel %vm824_vm10, %v4527_v22, 0.0 }
0x1ea4   : > { %2167 = vadd.xlane.f32.xlu2 %v2166_v18  ;;  %v2274_v18 = vperm.slane %v5351_v11, 0 }
0x1eaa   : > { %v2175_v19 = vpop.permute.xlu0 %2174 }
0x1eab   : > { %2187 = vmatpush.bf16.msra.mxu2 %v2175_v19 }
0x1f0f   : > { %v2165_v20 = vpop.xlane.xlu1 %2164 }
0x1f10   : > { %4528 = vrcp.f32 %v2165_v20 }
0x1f16   : > { %v4529_v24 = vpop.eup %4528 }
0x1f17   : > { %v2168_v21 = vpop.xlane.xlu2 %2167  ;;  %v2171_v7 = vmul.f32 %v4529_v24, %v4525_v13  ;;  %v2277_v24 = vperm.slane %v5351_v11, 1 }
0x1f18   : > { %4530 = vrcp.f32 %v2168_v21 }
0x1f1e   : > { %v4531_v28 = vpop.eup %4530 }
0x1f1f   : > { %v2172_v29 = vmul.f32 %v4531_v28, %v4527_v22 }
0x1f21   : > { %v2173_v31 = vpack.c.bf16 %v2172_v29, %v2171_v7 }
0x1f23   : > { %4053 = vmatmul.msk.bf16.vlgmr.msra.gmra.mxu2 %vm824_vm10, %v2173_v31 }
0x1fa6   : > { %v2189_v42 = vpop.f32.mrf.mxu2 }
0x1fae   : > { %v2191_v43 = vpop.f32.mrf.mxu2 }
0x1faf   : > { %v2198_v44 = vpack.c.bf16 %v2191_v43, %v2189_v42 }
0x1fb1   : > { %4062 = vmatmul.msk.bf16.vlgmr.msra.gmra.mxu1 %vm559_vm2, %v2198_v44 }
0x202e   : > { %v2223_v45 = vpop.f32.mrf.mxu1 }
0x202f   : > { %v2228_v46 = vadd.f32 %v2223_v45, %v2086_v63  ;;  %v2283_v63 = vpop.permute.xlu0 %2282 }
0x2030   : > { %2292 = vmatpush.bf16.msra.mxu3 %v2283_v63 }
0x2031   : > { %v2230_v47 = vsel %vm559_vm2, %v2228_v46, 0.0 }
0x2032   : > { %2231 = vadd.xlane.f32.xlu1 %v2230_v47 }
0x2036   : > { %v2225_v48 = vpop.f32.mrf.mxu1 }
0x2037   : > { %v2229_v49 = vadd.f32 %v2225_v48, %v5307_v1  ;;  %v2302_v30 = vpop.permute.xlu0 %2301 }
0x2039   : > { %v2233_v50 = vsel %vm559_vm2, %v2229_v49, 0.0 }
0x203a   : > { %2234 = vadd.xlane.f32.xlu2 %v2233_v50 }
0x20a5   : > { %v2232_v51 = vpop.xlane.xlu1 %2231 }
0x20a6   : > { %v2236_v52 = vmul.f32 %v2232_v51, %v4777_v8 }
0x20a8   : > { %v2238_v53 = vsub.f32 %v2228_v46, %v2236_v52 }
0x20aa   : > { %v2240_v57 = vmul.f32 %v2238_v53, %v2238_v53 }
0x20ac   : > { %v2242_v56 = vsel %vm559_vm2, %v2240_v57, 0.0 }
0x20ad   : > { %2243 = vadd.xlane.f32.xlu1 %v2242_v56  ;;  %v2235_v59 = vpop.xlane.xlu2 %2234 }
0x20ae   : > { %v2237_v60 = vmul.f32 %v2235_v59, %v4777_v8 }
0x20b0   : > { %v2239_v61 = vsub.f32 %v2229_v49, %v2237_v60 }
0x20b2   : > { %v2241_v62 = vmul.f32 %v2239_v61, %v2239_v61 }
0x20b4   : > { %v2245_v0 = vsel %vm559_vm2, %v2241_v62, 0.0 }
0x20b5   : > { %2246 = vadd.xlane.f32.xlu2 %v2245_v0 }
0x20c6   : > { %2280 = vrot.lane.b32.xlu1 %v4057_v41, %s4634_s25 }
0x20cd   : > { %2303 = vrot.lane.b32.xlu2 %v4061_v37, %s4631_s19 }
0x2120   : > { %v2244_v1 = vpop.xlane.xlu1 %2243 }
0x2121   : > { %v2248_v2 = vmul.f32 %v2244_v1, %v4777_v8 }
0x2123   : > { %v2250_v3 = vadd.f32 1e-05, %v2248_v2 }
0x2125   : > { %4532 = vrsqrt.f32 %v2250_v3  ;;  %vm2258_vm12 = vweird.f32 %v2250_v3 }
0x2128   : > { %v2247_v4 = vpop.xlane.xlu2 %2246 }
0x2129   : > { %v2249_v5 = vmul.f32 %v2247_v4, %v4777_v8 }
0x212b   : > { %v4533_v54 = vpop.eup %4532  ;;  %v2251_v6 = vadd.f32 1e-05, %v2249_v5 }
0x212c   : > { %v2253_v17 = vmul.f32 %v4533_v54, %v2250_v3  ;;  %vm2259_vm11 = vweird.f32 %v4533_v54 }
0x212d   : > { %4534 = vrsqrt.f32 %v2251_v6  ;;  %vm2260_vm13 = vmor %vm2258_vm12, %vm2259_vm11  ;;  %vm2268_vm5 = vweird.f32 %v2251_v6 }
0x212e   : > { %v2254_v23 = vmul.f32 %v4533_v54, %v2253_v17 }
0x2130   : > { %v2255_v26 = vmul.f32 0.5, %v2254_v23  ;;  %v2304_v58 = vpop.permute.xlu2 %2303  ;;  %v4069_v23 = vld [vmem:[%s5803_s5 + $0x20] sm:$0xf] }
0x2131   : > { %2316 = vmatpush.bf16.msrb.mxu2 %v2304_v58 }
0x2132   : > { %v2256_v9 = vsub.f32 1.5, %v2255_v26  ;;  %v4336_v26 = vld [vmem:[%s5803_s5 + $0x54] sm:$0xf0] }
0x2133   : > { %v4535_v25 = vpop.eup %4534  ;;  %v4070_v58 = vor.u32 %v4336_v26, %v4069_v23 }
0x2134   : > { %v2257_v33 = vmul.f32 %v4533_v54, %v2256_v9  ;;  %v2263_v35 = vmul.f32 %v4535_v25, %v2251_v6  ;;  %vm2269_vm3 = vweird.f32 %v4535_v25  ;;  %v4337_v6 = vld [vmem:[%s5803_s5 + $0xc4] sm:$0xf0] }
0x2135   : > { %2317 = vmatpush.bf16.msrb.mxu2 %v2302_v30  ;;  %vm2270_vm6 = vmor %vm2268_vm5, %vm2269_vm3 }
0x2136   : > { %v2264_v38 = vmul.f32 %v4535_v25, %v2263_v35  ;;  %v2261_v13 = vsel %vm2260_vm13, %v4533_v54, %v2257_v33  ;;  %v4073_v54 = vld [vmem:[%s5803_s5 + $0x90] sm:$0xf] }
0x2137   : > { %v2272_v19 = vmul.f32 %v2261_v13, %v2238_v53  ;;  %v4074_v17 = vor.u32 %v4337_v6, %v4073_v54  ;;  %v2470_v6 = vperm.slane %v5351_v11, 2 }
0x2138   : > { %v2265_v14 = vmul.f32 0.5, %v2264_v38  ;;  %v2281_v15 = vpop.permute.xlu1 %2280 }
0x2139   : > { %2293 = vmatpush.bf16.msra.mxu3 %v2281_v15  ;;  %v2275_v28 = vmul.f32 %v2274_v18, %v2272_v19 }
0x213a   : > { %v2266_v22 = vsub.f32 1.5, %v2265_v14 }
0x213b   : > { %v2278_v31 = vadd.f32 %v2277_v24, %v2275_v28 }
0x213c   : > { %v2267_v20 = vmul.f32 %v4535_v25, %v2266_v22  ;;  %4063 = vmatmul.msk.bf16.vlgmr.msra.gmra.mxu3 %vm559_vm2, %v4889_v55 }
0x213d   : > { %2416 = vmatpush.bf16.msrb.mxu3 %v4074_v17 }
0x213e   : > { %v2271_v21 = vsel %vm2270_vm6, %v4535_v25, %v2267_v20 }
0x213f   : > { %v2273_v7 = vmul.f32 %v2271_v21, %v2239_v61 }
0x2141   : > { %v2276_v29 = vmul.f32 %v2274_v18, %v2273_v7  ;;  %2417 = vmatpush.bf16.msrb.mxu3 %v4070_v58  ;;  %v4078_v7 = vld [vmem:[%s5803_s5 + $0x20] sm:$0xf] }
0x2143   : > { %v2279_v32 = vadd.f32 %v2277_v24, %v2276_v29  ;;  %v4339_v29 = vld [vmem:[%s5803_s5 + $0x54] sm:$0xf0] }
0x2145   : > { %v2300_v36 = vpack.c.bf16 %v2279_v32, %v2278_v31 }
0x2147   : > { %4064 = vmatmul.msk.bf16.vlgmr.msrb.gmra.mxu2 %vm559_vm2, %v2300_v36 }
0x21bf   : > { %v2295_v37 = vpop.f32.mrf.mxu3 }
0x21c7   : > { %v2297_v40 = vpop.f32.mrf.mxu3 }
0x21c8   : > { %v2325_v10 = vpack.c.bf16 %v2297_v40, %v2295_v37  ;;  %v4338_v37 = vld [vmem:[%s5803_s5 + $0x24] sm:$0xf]  ;;  %v4080_v40 = vld [vmem:[%s5803_s5 + $0x58] sm:$0xf0] }
0x21ca   : > { %v2330_v41 = vsel %vm559_vm2, %v2325_v10, 0  ;;  %v2319_v42 = vpop.f32.mrf.mxu2 }
0x21cb   : > { %2339 = vmatpush.bf16.xpose.msra.mxu0 %v2330_v41  ;;  %v4083_v41 = vor.u32 %v4338_v37, %v4080_v40 }
0x21d2   : > { %v2321_v43 = vpop.f32.mrf.mxu2 }
0x21d3   : > { %v2324_v44 = vpack.c.bf16 %v2321_v43, %v2319_v42  ;;  %v4086_v42 = vld [vmem:[%s5803_s5 + $0x90] sm:$0xf]  ;;  %v4341_v43 = vld [vmem:[%s5803_s5 + $0xc4] sm:$0xf0] }
0x21d5   : > { %4065 = vmatmul.msk.bf16.vlgmr.msra.gmra.mxu0 %vm559_vm2, %v2324_v44  ;;  %v4087_v44 = vor.u32 %v4341_v43, %v4086_v42 }
0x2252   : > { %v2341_v45 = vpop.f32.mrf.mxu0 }
0x2253   : > { %v2346_v46 = vsel %vm824_vm10, %v2341_v45, -inf }
0x2254   : > { %2347 = vmax.xlane.f32.xlu0 %v2346_v46  ;;  %v4088_v46 = vld [vmem:[%s5803_s5 + $0xc8] sm:$0xf0] }
0x225a   : > { %v2343_v47 = vpop.f32.mrf.mxu0 }
0x225b   : > { %v2349_v48 = vsel %vm824_vm10, %v2343_v47, -inf }
0x225c   : > { %2350 = vmax.xlane.f32.xlu2 %v2349_v48 }
0x2274   : > { %2370 = vrot.lane.b32.xlu2 %v2325_v10, %s4631_s19 }
0x22c7   : > { %v2348_v49 = vpop.xlane.xlu0 %2347 }
0x22c8   : > { %v2352_v50 = vsub.f32 %v2341_v45, %v2348_v49  ;;  %v4340_v45 = vld [vmem:[%s5803_s5 + $0x94] sm:$0xf] }
0x22ca   : > { %v2354_v51 = vmul.f32 1.442695, %v2352_v50 }
0x22cc   : > { %4536 = vpow2.f32 %v2354_v51 }
0x22cf   : > { %v2351_v52 = vpop.xlane.xlu2 %2350 }
0x22d0   : > { %v2353_v53 = vsub.f32 %v2343_v47, %v2351_v52  ;;  %v4091_v47 = vor.u32 %v4340_v45, %v4088_v46 }
0x22d2   : > { %v4537_v57 = vpop.eup %4536  ;;  %v2356_v56 = vmul.f32 1.442695, %v2353_v53 }
0x22d3   : > { %v2358_v59 = vsel %vm824_vm10, %v4537_v57, 0.0 }
0x22d4   : > { %4538 = vpow2.f32 %v2356_v56  ;;  %2359 = vadd.xlane.f32.xlu1 %v2358_v59 }
0x22d7   : > { %v2371_v60 = vpop.permute.xlu2 %2370 }
0x22d8   : > { %2383 = vmatpush.bf16.msrb.mxu1 %v2371_v60 }
0x22da   : > { %v4539_v61 = vpop.eup %4538 }
0x22db   : > { %v2361_v62 = vsel %vm824_vm10, %v4539_v61, 0.0 }
0x22dc   : > { %2362 = vadd.xlane.f32.xlu0 %v2361_v62 }
0x2347   : > { %v2360_v0 = vpop.xlane.xlu1 %2359 }
0x2348   : > { %4540 = vrcp.f32 %v2360_v0 }
0x234e   : > { %v4541_v1 = vpop.eup %4540 }
0x234f   : > { %v2363_v63 = vpop.xlane.xlu0 %2362  ;;  %v2366_v3 = vmul.f32 %v4541_v1, %v4537_v57 }
0x2350   : > { %4542 = vrcp.f32 %v2363_v63 }
0x2356   : > { %v4543_v2 = vpop.eup %4542 }
0x2357   : > { %v2367_v4 = vmul.f32 %v4543_v2, %v4539_v61 }
0x2359   : > { %v2368_v5 = vpack.c.bf16 %v2367_v4, %v2366_v3 }
0x235b   : > { %4066 = vmatmul.msk.bf16.vlgmr.msrb.gmra.mxu1 %vm824_vm10, %v2368_v5 }
0x23d8   : > { %v2385_v9 = vpop.f32.mrf.mxu1 }
0x23e0   : > { %v2387_v30 = vpop.f32.mrf.mxu1 }
0x23e1   : > { %v2394_v25 = vpack.c.bf16 %v2387_v30, %v2385_v9  ;;  %v2473_v30 = vperm.slane %v5351_v11, 3 }
0x23e3   : > { %4075 = vmatmul.msk.bf16.vlgmr.msrb.gmra.mxu3 %vm559_vm2, %v2394_v25 }
0x2466   : > { %v2419_v33 = vpop.f32.mrf.mxu3 }
0x2467   : > { %v2424_v35 = vadd.f32 %v2419_v33, %v2278_v31  ;;  %v4079_v31 = vor.u32 %v4339_v29, %v4078_v7  ;;  %v4343_v7 = vld [vmem:[%s5804_s6 + $0xe8] sm:$0xff] }
0x2468   : > { %v4425_v29 = vld [vmem:[%s5805_s7 + $0x4c] ss:$0 sm:$0xff] }
0x2469   : > { %v2426_v38 = vsel %vm559_vm2, %v2424_v35, 0.0  ;;  %2499 = vrot.lane.b32.xlu2 %v4079_v31, %s4631_s19  ;;  %v4342_v31 = vld [vmem:[%s5804_s6 + $0xe0] sm:$0xff] }
0x246a   : > { %2427 = vadd.xlane.f32.xlu0 %v2426_v38 }
0x246e   : > { %v2421_v13 = vpop.f32.mrf.mxu3 }
0x246f   : > { %v2425_v14 = vadd.f32 %v2421_v13, %v2279_v32 }
0x2471   : > { %v2429_v15 = vsel %vm559_vm2, %v2425_v14, 0.0  ;;  %2501 = vrot.lane.b32.xlu2 %v4083_v41, %s4631_s19 }
0x2472   : > { %2430 = vadd.xlane.f32.xlu1 %v2429_v15 }
0x24c3   : > { %v2500_v3 = vpop.permute.xlu2 %2499 }
0x24cb   : > { %v2502_v38 = vpop.permute.xlu2 %2501 }
0x24cc   : > { %v2507_v15 = vsel %vm1324_vm14, %v2500_v3, %v2502_v38 }
0x24dd   : > { %v2428_v22 = vpop.xlane.xlu0 %2427 }
0x24de   : > { %v2432_v18 = vmul.f32 %v2428_v22, %v4777_v8 }
0x24e0   : > { %v2434_v19 = vsub.f32 %v2424_v35, %v2432_v18  ;;  %v4349_v18 = vld [vmem:[%s5804_s6 + $0x118] sm:$0xff] }
0x24e1   : > { %2613 = vmatpush.bf16.msrb.mxu0 %v4349_v18 }
0x24e2   : > { %v2436_v20 = vmul.f32 %v2434_v19, %v2434_v19 }
0x24e4   : > { %v2438_v21 = vsel %vm559_vm2, %v2436_v20, 0.0  ;;  %v4347_v20 = vld [vmem:[%s5804_s6 + $0x108] sm:$0xff] }
0x24e5   : > { %2439 = vadd.xlane.f32.xlu0 %v2438_v21  ;;  %v2431_v24 = vpop.xlane.xlu1 %2430  ;;  %v4346_v21 = vld [vmem:[%s5804_s6 + $0x100] sm:$0xff] }
0x24e6   : > { %v2433_v28 = vmul.f32 %v2431_v24, %v4777_v8  ;;  %v4345_v24 = vld [vmem:[%s5804_s6 + $0xf8] sm:$0xff] }
0x24e8   : > { %v2435_v32 = vsub.f32 %v2425_v14, %v2433_v28  ;;  %v4344_v28 = vld [vmem:[%s5804_s6 + $0xf0] sm:$0xff] }
0x24ea   : > { %v2437_v36 = vmul.f32 %v2435_v32, %v2435_v32 }
0x24ec   : > { %v2441_v10 = vsel %vm559_vm2, %v2437_v36, 0.0 }
0x24ed   : > { %2442 = vadd.xlane.f32.xlu1 %v2441_v10 }
0x24f9   : > { %2503 = vrot.lane.b32.xlu0 %v4087_v44, %s4631_s19 }
0x2506   : > { %2505 = vrot.lane.b32.xlu1 %v4091_v47, %s4631_s19 }
0x2558   : > { %v2440_v48 = vpop.xlane.xlu0 %2439 }
0x2559   : > { %v2444_v49 = vmul.f32 %v2440_v48, %v4777_v8 }
0x255b   : > { %v2446_v50 = vadd.f32 1e-05, %v2444_v49 }
0x255d   : > { %4544 = vrsqrt.f32 %v2446_v50  ;;  %vm2454_vm8 = vweird.f32 %v2446_v50 }
0x2560   : > { %v2443_v51 = vpop.xlane.xlu1 %2442 }
0x2561   : > { %v2445_v52 = vmul.f32 %v2443_v51, %v4777_v8 }
0x2563   : > { %v4545_v53 = vpop.eup %4544  ;;  %v2447_v57 = vadd.f32 1e-05, %v2445_v52 }
0x2564   : > { %v2449_v56 = vmul.f32 %v4545_v53, %v2446_v50  ;;  %vm2455_vm7 = vweird.f32 %v4545_v53 }
0x2565   : > { %4546 = vrsqrt.f32 %v2447_v57  ;;  %vm2456_vm9 = vmor %vm2454_vm8, %vm2455_vm7  ;;  %vm2464_vm12 = vweird.f32 %v2447_v57 }
0x2566   : > { %v2450_v59 = vmul.f32 %v4545_v53, %v2449_v56 }
0x2568   : > { %v2451_v60 = vmul.f32 0.5, %v2450_v59 }
0x256a   : > { %v2452_v61 = vsub.f32 1.5, %v2451_v60 }
0x256b   : > { %v4547_v62 = vpop.eup %4546  ;;  %v2504_v26 = vpop.permute.xlu0 %2503 }
0x256c   : > { %v2459_v0 = vmul.f32 %v4547_v62, %v2447_v57  ;;  %v2453_v63 = vmul.f32 %v4545_v53, %v2452_v61  ;;  %vm2465_vm11 = vweird.f32 %v4547_v62 }
0x256d   : > { %vm2466_vm13 = vmor %vm2464_vm12, %vm2465_vm11 }
0x256e   : > { %v2460_v1 = vmul.f32 %v4547_v62, %v2459_v0  ;;  %v2457_v4 = vsel %vm2456_vm9, %v4545_v53, %v2453_v63 }
0x256f   : > { %v2468_v17 = vmul.f32 %v2457_v4, %v2434_v19  ;;  %v4348_v19 = vld [vmem:[%s5804_s6 + $0x110] sm:$0xff] }
0x2570   : > { %v2461_v2 = vmul.f32 0.5, %v2460_v1  ;;  %2614 = vmatpush.bf16.msrb.mxu0 %v4348_v19 }
0x2571   : > { %v2471_v25 = vmul.f32 %v2470_v6, %v2468_v17 }
0x2572   : > { %v2462_v5 = vsub.f32 1.5, %v2461_v2 }
0x2573   : > { %v2474_v14 = vadd.f32 %v2473_v30, %v2471_v25 }
0x2574   : > { %v2463_v54 = vmul.f32 %v4547_v62, %v2462_v5  ;;  %2615 = vmatpush.bf16.msrb.mxu0 %v4347_v20 }
0x2576   : > { %v2467_v23 = vsel %vm2466_vm13, %v4547_v62, %v2463_v54  ;;  %v4426_v62 = vld [vmem:[%s5805_s7 + $0x4d] ss:$0 sm:$0xff] }
0x2577   : > { %v2469_v58 = vmul.f32 %v2467_v23, %v2435_v32  ;;  %v4131_v23 = vld [vmem:[%s5803_s5 + $0x94] sm:$0xf] }
0x2578   : > { %v2506_v9 = vpop.permute.xlu1 %2505  ;;  %2616 = vmatpush.bf16.msrb.mxu0 %v4346_v21 }
0x2579   : > { %v2472_v33 = vmul.f32 %v2470_v6, %v2469_v58  ;;  %v2508_v35 = vsel %vm1324_vm14, %v2504_v26, %v2506_v9  ;;  %v4351_v26 = vld [vmem:[%s5803_s5 + $0xc8] sm:$0xf0] }
0x257a   : > { %2520 = vmatpush.bf16.msra.mxu2 %v2508_v35  ;;  %v4132_v58 = vor.u32 %v4351_v26, %v4131_v23 }
0x257b   : > { %v2475_v13 = vadd.f32 %v2473_v30, %v2472_v33 }
0x257c   : > { %2617 = vmatpush.bf16.msrb.mxu0 %v4345_v24 }
0x257d   : > { %v2480_v22 = vpack.c.bf16 %v2475_v13, %v2474_v14 }
0x257e   : > { %2521 = vmatpush.bf16.msra.mxu2 %v2507_v15  ;;  %v4127_v15 = vld [vmem:[%s5803_s5 + $0x24] sm:$0xf] }
0x2580   : > { %2618 = vmatpush.bf16.msrb.mxu0 %v4344_v28 }
0x2581   : > { %4092 = vmatmul.msk.bf16.vlgmr.msra.gmra.mxu2 %vm559_vm2, %v2480_v22  ;;  %v4350_v22 = vld [vmem:[%s5803_s5 + $0x58] sm:$0xf0] }
0x2582   : > { %v4128_v18 = vor.u32 %v4350_v22, %v4127_v15 }
0x2584   : > { %2619 = vmatpush.bf16.msrb.mxu0 %v4343_v7 }
0x2588   : > { %2620 = vmatpush.bf16.msrb.mxu0 %v4342_v31 }
0x2604   : > { %v2523_v32 = vpop.f32.mrf.mxu2 }
0x2605   : > { %v2524_v36 = vadd.f32 %v4425_v29, %v2523_v32 }
0x2607   : > { %v2528_v37 = vmul.f32 %v2524_v36, %v2524_v36 }
0x2609   : > { %v2530_v40 = vmul.f32 %v2528_v37, %v2524_v36 }
0x260b   : > { %v2532_v10 = vmul.f32 0.044715, %v2530_v40 }
0x260c   : > { %v2525_v41 = vpop.f32.mrf.mxu2 }
0x260d   : > { %v2534_v42 = vadd.f32 %v2532_v10, %v2524_v36  ;;  %v2526_v43 = vadd.f32 %v4425_v29, %v2525_v41 }
0x260f   : > { %v2536_v44 = vmul.f32 0.7978846, %v2534_v42  ;;  %v2529_v45 = vmul.f32 %v2526_v43, %v2526_v43 }
0x2611   : > { %v2531_v46 = vmul.f32 %v2529_v45, %v2526_v43  ;;  %4548 = vtanh.f32 %v2536_v44 }
0x2613   : > { %v2533_v47 = vmul.f32 0.044715, %v2531_v46 }
0x2615   : > { %v2535_v48 = vadd.f32 %v2533_v47, %v2526_v43 }
0x2617   : > { %v2537_v49 = vmul.f32 0.7978846, %v2535_v48  ;;  %v4549_v50 = vpop.eup %4548  ;;  %v2673_v48 = vperm.slane %v5351_v11, 4 }
0x2618   : > { %v2540_v51 = vadd.f32 1.0, %v4549_v50 }
0x2619   : > { %4550 = vtanh.f32 %v2537_v49 }
0x261a   : > { %v2542_v53 = vmul.f32 0.5, %v2540_v51 }
0x261c   : > { %v2544_v59 = vmul.f32 %v2542_v53, %v2524_v36 }
0x261f   : > { %v4551_v52 = vpop.eup %4550 }
0x2620   : > { %v2541_v57 = vadd.f32 1.0, %v4551_v52  ;;  %v2676_v52 = vperm.slane %v5351_v11, 5 }
0x2622   : > { %v2543_v56 = vmul.f32 0.5, %v2541_v57 }
0x2624   : > { %v2545_v60 = vmul.f32 %v2543_v56, %v2526_v43 }
0x2626   : > { %v2562_v61 = vpack.c.bf16 %v2545_v60, %v2544_v59 }
0x2628   : > { %2621 = vmatmul.bf16.vlgmr.msrb.gmra.mxu0 %v2562_v61 }
0x26a5   : > { %v2622_v0 = vpop.f32.mrf.mxu0 }
0x26a6   : > { %v2623_v63 = vadd.f32 %v4426_v62, %v2622_v0 }
0x26a8   : > { %v2627_v1 = vadd.f32 %v2623_v63, %v2474_v14 }
0x26aa   : > { %v2629_v2 = vsel %vm559_vm2, %v2627_v1, 0.0 }
0x26ab   : > { %2630 = vadd.xlane.f32.xlu0 %v2629_v2 }
0x26ad   : > { %v2624_v3 = vpop.f32.mrf.mxu0 }
0x26ae   : > { %v2625_v4 = vadd.f32 %v4426_v62, %v2624_v3 }
0x26b0   : > { %v2628_v5 = vadd.f32 %v2625_v4, %v2475_v13 }
0x26b2   : > { %v2632_v54 = vsel %vm559_vm2, %v2628_v5, 0.0 }
0x26b3   : > { %2633 = vadd.xlane.f32.xlu2 %v2632_v54 }
0x26cb   : > { %2697 = vrot.lane.b32.xlu2 %v4132_v58, %s4631_s19 }
0x271e   : > { %v2631_v6 = vpop.xlane.xlu0 %2630 }
0x271f   : > { %v2635_v17 = vmul.f32 %v2631_v6, %v4777_v8 }
0x2721   : > { %v2637_v9 = vsub.f32 %v2627_v1, %v2635_v17 }
0x2723   : > { %v2639_v30 = vmul.f32 %v2637_v9, %v2637_v9 }
0x2725   : > { %v2641_v25 = vsel %vm559_vm2, %v2639_v30, 0.0 }
0x2726   : > { %v2634_v33 = vpop.xlane.xlu2 %2633  ;;  %2642 = vadd.xlane.f32.xlu1 %v2641_v25 }
0x2727   : > { %v2636_v35 = vmul.f32 %v2634_v33, %v4777_v8 }
0x2729   : > { %v2638_v38 = vsub.f32 %v2628_v5, %v2636_v35 }
0x272b   : > { %v2640_v13 = vmul.f32 %v2638_v38, %v2638_v38 }
0x272d   : > { %v2644_v14 = vsel %vm559_vm2, %v2640_v13, 0.0 }
0x272e   : > { %2645 = vadd.xlane.f32.xlu0 %v2644_v14  ;;  %v2698_v19 = vpop.permute.xlu2 %2697 }
0x272f   : > { %2710 = vmatpush.bf16.msra.mxu1 %v2698_v19 }
0x273f   : > { %2695 = vrot.lane.b32.xlu1 %v4128_v18, %s4631_s19 }
0x2799   : > { %v2643_v20 = vpop.xlane.xlu1 %2642 }
0x279a   : > { %v2647_v21 = vmul.f32 %v2643_v20, %v4777_v8  ;;  %v4142_v20 = vld [vmem:[%s5803_s5 + $0x98] sm:$0xf] }
0x279c   : > { %v2649_v24 = vadd.f32 1e-05, %v2647_v21  ;;  %v4353_v21 = vld [vmem:[%s5803_s5 + $0xcc] sm:$0xf0] }
0x279e   : > { %4552 = vrsqrt.f32 %v2649_v24  ;;  %vm2657_vm5 = vweird.f32 %v2649_v24 }
0x27a1   : > { %v2646_v28 = vpop.xlane.xlu0 %2645 }
0x27a2   : > { %v2648_v7 = vmul.f32 %v2646_v28, %v4777_v8  ;;  %v4138_v28 = vld [vmem:[%s5803_s5 + $0x28] sm:$0xf] }
0x27a4   : > { %v4553_v29 = vpop.eup %4552  ;;  %v2650_v31 = vadd.f32 1e-05, %v2648_v7  ;;  %v4352_v7 = vld [vmem:[%s5803_s5 + $0x5c] sm:$0xf0] }
0x27a5   : > { %v2652_v32 = vmul.f32 %v4553_v29, %v2649_v24  ;;  %vm2658_vm3 = vweird.f32 %v4553_v29  ;;  %v4143_v24 = vor.u32 %v4353_v21, %v4142_v20 }
0x27a6   : > { %4554 = vrsqrt.f32 %v2650_v31  ;;  %vm2659_vm6 = vmor %vm2657_vm5, %vm2658_vm3  ;;  %vm2667_vm8 = vweird.f32 %v2650_v31 }
0x27a7   : > { %v2653_v36 = vmul.f32 %v4553_v29, %v2652_v32 }
0x27a9   : > { %v2654_v37 = vmul.f32 0.5, %v2653_v36 }
0x27ab   : > { %v2655_v40 = vsub.f32 1.5, %v2654_v37 }
0x27ac   : > { %v4555_v10 = vpop.eup %4554 }
0x27ad   : > { %v2656_v41 = vmul.f32 %v4553_v29, %v2655_v40  ;;  %v2662_v42 = vmul.f32 %v4555_v10, %v2650_v31  ;;  %vm2668_vm7 = vweird.f32 %v4555_v10 }
0x27ae   : > { %vm2669_vm9 = vmor %vm2667_vm8, %vm2668_vm7 }
0x27af   : > { %v2663_v43 = vmul.f32 %v4555_v10, %v2662_v42  ;;  %v2660_v44 = vsel %vm2659_vm6, %v4553_v29, %v2656_v41  ;;  %v4139_v29 = vor.u32 %v4352_v7, %v4138_v28 }
0x27b0   : > { %v2671_v49 = vmul.f32 %v2660_v44, %v2637_v9 }
0x27b1   : > { %v2664_v45 = vmul.f32 0.5, %v2663_v43  ;;  %v2696_v46 = vpop.permute.xlu1 %2695 }
0x27b2   : > { %2711 = vmatpush.bf16.msra.mxu1 %v2696_v46  ;;  %v2674_v53 = vmul.f32 %v2673_v48, %v2671_v49 }
0x27b3   : > { %v2665_v47 = vsub.f32 1.5, %v2664_v45 }
0x27b4   : > { %v2677_v59 = vadd.f32 %v2676_v52, %v2674_v53 }
0x27b5   : > { %v2666_v50 = vmul.f32 %v4555_v10, %v2665_v47 }
0x27b6   : > { %2811 = vmatpush.bf16.msrb.mxu1 %v4143_v24 }
0x27b7   : > { %v2670_v51 = vsel %vm2669_vm9, %v4555_v10, %v2666_v50 }
0x27b8   : > { %v2672_v57 = vmul.f32 %v2670_v51, %v2638_v38 }
0x27ba   : > { %v2675_v56 = vmul.f32 %v2673_v48, %v2672_v57  ;;  %2812 = vmatpush.bf16.msrb.mxu1 %v4139_v29 }
0x27bc   : > { %v5474_v60 = vadd.f32 %v2676_v52, %v2675_v56 }
0x27be   : > { %v2684_v61 = vpack.c.bf16 %v5474_v60, %v2677_v59 }
0x27c0   : > { %4133 = vmatmul.msk.bf16.vlgmr.msra.gmra.mxu1 %vm559_vm2, %v2684_v61 }
0x283d   : > { %v2713_v62 = vpop.f32.mrf.mxu1 }
0x2845   : > { %v2715_v0 = vpop.f32.mrf.mxu1 }
0x2846   : > { %v2718_v63 = vpack.c.bf16 %v2715_v0, %v2713_v62 }
0x2848   : > { %2720 = vrot.lane.b32.xlu0 %v2718_v63, %s4631_s19 }
0x28ba   : > { %v2721_v1 = vpop.permute.xlu0 %2720 }
0x28bb   : > { %v2726_v2 = vsel %vm559_vm2, %v2721_v1, 0 }
0x28bc   : > { %2735 = vmatpush.bf16.xpose.msra.mxu3 %v2726_v2 }
0x28c3   : > { %4134 = vmatmul.msk.bf16.vlgmr.msra.gmra.mxu3 %vm559_vm2, %v2718_v63 }
0x2946   : > { %v2737_v11 = vpop.f32.mrf.mxu3 }
0x2947   : > { %v2738_v3 = vadd.f32 %v2737_v11, %v4966_v12 }
0x2949   : > { %v2742_v4 = vsel %vm824_vm10, %v2738_v3, -inf }
0x294a   : > { %2743 = vmax.xlane.f32.xlu2 %v2742_v4 }
0x294e   : > { %v2739_v5 = vpop.f32.mrf.mxu3 }
0x294f   : > { %v2740_v54 = vadd.f32 %v2739_v5, %v4971_v16 }
0x2951   : > { %v2745_v6 = vsel %vm824_vm10, %v2740_v54, -inf }
0x2952   : > { %2746 = vmax.xlane.f32.xlu0 %v2745_v6 }
0x2966   : > { %2765 = vrot.lane.b32.xlu0 %v2718_v63, %s4634_s25 }
0x296e   : > { %2871 = vrot.lane.b32.xlu0 %v4139_v29, %s4634_s25 }
0x2976   : > { %2892 = vrot.lane.b32.xlu0 %v4139_v29, %s4631_s19 }
0x29bd   : > { %v2744_v17 = vpop.xlane.xlu2 %2743 }
0x29be   : > { %v2748_v23 = vsub.f32 %v2738_v3, %v2744_v17 }
0x29c0   : > { %v2750_v26 = vmul.f32 1.442695, %v2748_v23 }
0x29c2   : > { %4556 = vpow2.f32 %v2750_v26  ;;  %v5518_v26 = vld [vmem:[%s5805_s7 + $0x4e] sm:$0x3f] }
0x29c5   : > { %v2747_v58 = vpop.xlane.xlu0 %2746 }
0x29c6   : > { %v2749_v9 = vsub.f32 %v2740_v54, %v2747_v58 }
0x29c8   : > { %v4557_v30 = vpop.eup %4556  ;;  %v2752_v25 = vmul.f32 1.442695, %v2749_v9 }
0x29c9   : > { %v2754_v12 = vsel %vm824_vm10, %v4557_v30, 0.0 }
0x29ca   : > { %4558 = vpow2.f32 %v2752_v25  ;;  %2755 = vadd.xlane.f32.xlu1 %v2754_v12  ;;  %v2865_v12 = vperm.slane %v5518_v26, 0 }
0x29d0   : > { %v4559_v33 = vpop.eup %4558 }
0x29d1   : > { %v2757_v16 = vsel %vm824_vm10, %v4559_v33, 0.0 }
0x29d2   : > { %2758 = vadd.xlane.f32.xlu2 %v2757_v16 }
0x29d8   : > { %v2766_v35 = vpop.permute.xlu0 %2765 }
0x29d9   : > { %2778 = vmatpush.bf16.msrb.mxu2 %v2766_v35 }
0x29e0   : > { %v2872_v61 = vpop.permute.xlu0 %2871 }
0x29e8   : > { %v2893_v5 = vpop.permute.xlu0 %2892 }
0x2a3d   : > { %v2756_v38 = vpop.xlane.xlu1 %2755 }
0x2a3e   : > { %4560 = vrcp.f32 %v2756_v38  ;;  %v2868_v38 = vperm.slane %v5518_v26, 1 }
0x2a44   : > { %v4561_v14 = vpop.eup %4560 }
0x2a45   : > { %v2759_v13 = vpop.xlane.xlu2 %2758  ;;  %v2762_v22 = vmul.f32 %v4561_v14, %v4557_v30 }
0x2a46   : > { %4562 = vrcp.f32 %v2759_v13 }
0x2a4c   : > { %v4563_v15 = vpop.eup %4562 }
0x2a4d   : > { %v2763_v18 = vmul.f32 %v4563_v15, %v4559_v33 }
0x2a4f   : > { %v2764_v19 = vpack.c.bf16 %v2763_v18, %v2762_v22 }
0x2a51   : > { %4135 = vmatmul.msk.bf16.vlgmr.msrb.gmra.mxu2 %vm824_vm10, %v2764_v19 }
0x2ad4   : > { %v2780_v31 = vpop.f32.mrf.mxu2 }
0x2adc   : > { %v2782_v32 = vpop.f32.mrf.mxu2 }
0x2add   : > { %v2789_v36 = vpack.c.bf16 %v2782_v32, %v2780_v31 }
0x2adf   : > { %4144 = vmatmul.msk.bf16.vlgmr.msrb.gmra.mxu1 %vm559_vm2, %v2789_v36 }
0x2b5c   : > { %v2814_v37 = vpop.f32.mrf.mxu1 }
0x2b5d   : > { %v2819_v40 = vadd.f32 %v2814_v37, %v2677_v59 }
0x2b5f   : > { %v2821_v10 = vsel %vm559_vm2, %v2819_v40, 0.0 }
0x2b60   : > { %2822 = vadd.xlane.f32.xlu1 %v2821_v10 }
0x2b64   : > { %v2816_v41 = vpop.f32.mrf.mxu1 }
0x2b65   : > { %v2820_v42 = vadd.f32 %v2816_v41, %v5474_v60 }
0x2b67   : > { %v2824_v43 = vsel %vm559_vm2, %v2820_v42, 0.0 }
0x2b68   : > { %2825 = vadd.xlane.f32.xlu2 %v2824_v43 }
0x2bd3   : > { %v2823_v44 = vpop.xlane.xlu1 %2822 }
0x2bd4   : > { %v2827_v45 = vmul.f32 %v2823_v44, %v4777_v8 }
0x2bd6   : > { %v2829_v46 = vsub.f32 %v2819_v40, %v2827_v45 }
0x2bd8   : > { %v2831_v47 = vmul.f32 %v2829_v46, %v2829_v46 }
0x2bda   : > { %v2833_v48 = vsel %vm559_vm2, %v2831_v47, 0.0 }
0x2bdb   : > { %2834 = vadd.xlane.f32.xlu1 %v2833_v48  ;;  %v2826_v49 = vpop.xlane.xlu2 %2825 }
0x2bdc   : > { %v2828_v50 = vmul.f32 %v2826_v49, %v4777_v8 }
0x2bde   : > { %v2830_v51 = vsub.f32 %v2820_v42, %v2828_v50 }
0x2be0   : > { %v2832_v52 = vmul.f32 %v2830_v51, %v2830_v51 }
0x2be2   : > { %v2836_v53 = vsel %vm559_vm2, %v2832_v52, 0.0 }
0x2be3   : > { %2837 = vadd.xlane.f32.xlu2 %v2836_v53 }
0x2bf4   : > { %2873 = vrot.lane.b32.xlu1 %v4143_v24, %s4634_s25 }
0x2bfb   : > { %2894 = vrot.lane.b32.xlu2 %v4143_v24, %s4631_s19 }
0x2c4e   : > { %v2835_v57 = vpop.xlane.xlu1 %2834 }
0x2c4f   : > { %v2839_v56 = vmul.f32 %v2835_v57, %v4777_v8 }
0x2c51   : > { %v2841_v59 = vadd.f32 1e-05, %v2839_v56 }
0x2c53   : > { %4564 = vrsqrt.f32 %v2841_v59  ;;  %vm2849_vm12 = vweird.f32 %v2841_v59 }
0x2c56   : > { %v2838_v60 = vpop.xlane.xlu2 %2837 }
0x2c57   : > { %v2840_v62 = vmul.f32 %v2838_v60, %v4777_v8  ;;  %v4155_v60 = vld [vmem:[%s5803_s5 + $0x9c] sm:$0xf] }
0x2c59   : > { %v4565_v0 = vpop.eup %4564  ;;  %v2842_v63 = vadd.f32 1e-05, %v2840_v62 }
0x2c5a   : > { %v2844_v1 = vmul.f32 %v4565_v0, %v2841_v59  ;;  %vm2850_vm11 = vweird.f32 %v4565_v0 }
0x2c5b   : > { %4566 = vrsqrt.f32 %v2842_v63  ;;  %vm2851_vm13 = vmor %vm2849_vm12, %vm2850_vm11  ;;  %vm2859_vm5 = vweird.f32 %v2842_v63 }
0x2c5c   : > { %v2845_v2 = vmul.f32 %v4565_v0, %v2844_v1 }
0x2c5e   : > { %v2846_v11 = vmul.f32 0.5, %v2845_v2  ;;  %v2895_v3 = vpop.permute.xlu2 %2894 }
0x2c5f   : > { %2907 = vmatpush.bf16.msra.mxu2 %v2895_v3 }
0x2c60   : > { %v2847_v4 = vsub.f32 1.5, %v2846_v11 }
0x2c61   : > { %v4567_v54 = vpop.eup %4566 }
0x2c62   : > { %v2848_v6 = vmul.f32 %v4565_v0, %v2847_v4  ;;  %v2854_v17 = vmul.f32 %v4567_v54, %v2842_v63  ;;  %vm2860_vm3 = vweird.f32 %v4567_v54  ;;  %v4354_v63 = vld [vmem:[%s5803_s5 + $0x60] sm:$0xf0] }
0x2c63   : > { %2908 = vmatpush.bf16.msra.mxu2 %v2893_v5  ;;  %vm2861_vm6 = vmor %vm2859_vm5, %vm2860_vm3 }
0x2c64   : > { %v2855_v23 = vmul.f32 %v4567_v54, %v2854_v17  ;;  %v2852_v58 = vsel %vm2851_vm13, %v4565_v0, %v2848_v6  ;;  %v4151_v0 = vld [vmem:[%s5803_s5 + $0x2c] sm:$0xf] }
0x2c65   : > { %v2863_v33 = vmul.f32 %v2852_v58, %v2829_v46  ;;  %v4152_v1 = vor.u32 %v4354_v63, %v4151_v0  ;;  %v4160_v58 = vld [vmem:[%s5803_s5 + $0x2c] sm:$0xf] }
0x2c66   : > { %v2856_v9 = vmul.f32 0.5, %v2855_v23  ;;  %v2874_v30 = vpop.permute.xlu1 %2873 }
0x2c67   : > { %2883 = vmatpush.bf16.msrb.mxu3 %v2874_v30  ;;  %v2866_v13 = vmul.f32 %v2865_v12, %v2863_v33  ;;  %v4162_v33 = vld [vmem:[%s5803_s5 + $0x64] sm:$0xf0] }
0x2c68   : > { %v2857_v25 = vsub.f32 1.5, %v2856_v9  ;;  %v4357_v9 = vld [vmem:[%s5803_s5 + $0x60] sm:$0xf0] }
0x2c69   : > { %v2869_v22 = vadd.f32 %v2868_v38, %v2866_v13  ;;  %v4161_v30 = vor.u32 %v4357_v9, %v4160_v58  ;;  %v4365_v58 = vld [vmem:[%s5804_s6 + $0x148] sm:$0xff]  ;;  %v4364_v9 = vld [vmem:[%s5804_s6 + $0x140] sm:$0xff] }
0x2c6a   : > { %v2858_v16 = vmul.f32 %v4567_v54, %v2857_v25 }
0x2c6b   : > { %2884 = vmatpush.bf16.msrb.mxu3 %v2872_v61  ;;  %v4355_v61 = vld [vmem:[%s5803_s5 + $0xd0] sm:$0xf0] }
0x2c6c   : > { %v2862_v35 = vsel %vm2861_vm6, %v4567_v54, %v2858_v16  ;;  %v4156_v62 = vor.u32 %v4355_v61, %v4155_v60  ;;  %v3061_v61 = vperm.slane %v5518_v26, 2 }
0x2c6d   : > { %v2864_v14 = vmul.f32 %v2862_v35, %v2830_v51 }
0x2c6e   : > { %4145 = vmatmul.msk.bf16.vlgmr.msrb.gmra.mxu3 %vm559_vm2, %v4889_v55 }
0x2c6f   : > { %v2867_v15 = vmul.f32 %v2865_v12, %v2864_v14  ;;  %3007 = vmatpush.bf16.msra.mxu3 %v4156_v62  ;;  %v4356_v12 = vld [vmem:[%s5803_s5 + $0x30] sm:$0xf] }
0x2c70   : > { %v4165_v35 = vor.u32 %v4356_v12, %v4162_v33  ;;  %v4361_v12 = vld [vmem:[%s5804_s6 + $0x128] sm:$0xff]  ;;  %v4427_v33 = vld [vmem:[%s5805_s7 + $0x54] ss:$0 sm:$0xff] }
0x2c71   : > { %v2870_v18 = vadd.f32 %v2868_v38, %v2867_v15 }
0x2c73   : > { %v2891_v19 = vpack.c.bf16 %v2870_v18, %v2869_v22  ;;  %3008 = vmatpush.bf16.msra.mxu3 %v4152_v1 }
0x2c75   : > { %4146 = vmatmul.msk.bf16.vlgmr.msra.gmra.mxu2 %vm559_vm2, %v2891_v19 }
0x2cf1   : > { %v2886_v20 = vpop.f32.mrf.mxu3 }
0x2cf8   : > { %v2910_v21 = vpop.f32.mrf.mxu2 }
0x2cf9   : > { %v2888_v24 = vpop.f32.mrf.mxu3 }
0x2cfa   : > { %v2916_v28 = vpack.c.bf16 %v2888_v24, %v2886_v20  ;;  %v4359_v24 = vld [vmem:[%s5803_s5 + $0xd0] sm:$0xf0] }
0x2cfc   : > { %v2921_v7 = vsel %vm559_vm2, %v2916_v28, 0 }
0x2cfd   : > { %2930 = vmatpush.bf16.xpose.msra.mxu0 %v2921_v7  ;;  %v4358_v7 = vld [vmem:[%s5803_s5 + $0xa0] sm:$0xf] }
0x2d00   : > { %v2912_v29 = vpop.f32.mrf.mxu2 }
0x2d01   : > { %v2915_v31 = vpack.c.bf16 %v2912_v29, %v2910_v21  ;;  %v4168_v21 = vld [vmem:[%s5803_s5 + $0x9c] sm:$0xf]  ;;  %v4170_v29 = vld [vmem:[%s5803_s5 + $0xd4] sm:$0xf0] }
0x2d04   : > { %4147 = vmatmul.msk.bf16.vlgmr.msra.gmra.mxu0 %vm559_vm2, %v2915_v31  ;;  %v4173_v31 = vor.u32 %v4358_v7, %v4170_v29 }
0x2d81   : > { %v2932_v32 = vpop.f32.mrf.mxu0 }
0x2d82   : > { %v2937_v55 = vsel %vm824_vm10, %v2932_v32, -inf }
0x2d83   : > { %2938 = vmax.xlane.f32.xlu0 %v2937_v55 }
0x2d89   : > { %v2934_v36 = vpop.f32.mrf.mxu0 }
0x2d8a   : > { %v2940_v37 = vsel %vm824_vm10, %v2934_v36, -inf }
0x2d8b   : > { %2941 = vmax.xlane.f32.xlu1 %v2940_v37 }
0x2df6   : > { %v2939_v40 = vpop.xlane.xlu0 %2938 }
0x2df7   : > { %v2943_v10 = vsub.f32 %v2932_v32, %v2939_v40 }
0x2df9   : > { %v2945_v41 = vmul.f32 1.442695, %v2943_v10 }
0x2dfb   : > { %4568 = vpow2.f32 %v2945_v41 }
0x2dfe   : > { %v2942_v42 = vpop.xlane.xlu1 %2941 }
0x2dff   : > { %v2944_v43 = vsub.f32 %v2934_v36, %v2942_v42 }
0x2e01   : > { %v4569_v44 = vpop.eup %4568  ;;  %v2947_v45 = vmul.f32 1.442695, %v2944_v43 }
0x2e02   : > { %v2949_v46 = vsel %vm824_vm10, %v4569_v44, 0.0 }
0x2e03   : > { %4570 = vpow2.f32 %v2947_v45  ;;  %2950 = vadd.xlane.f32.xlu2 %v2949_v46 }
0x2e09   : > { %v4571_v47 = vpop.eup %4570 }
0x2e0a   : > { %v2952_v48 = vsel %vm824_vm10, %v4571_v47, 0.0 }
0x2e0b   : > { %2953 = vadd.xlane.f32.xlu0 %v2952_v48 }
0x2e1f   : > { %2961 = vrot.lane.b32.xlu0 %v2916_v28, %s4631_s19  ;;  %v4169_v28 = vor.u32 %v4359_v24, %v4168_v21 }
0x2e27   : > { %3090 = vrot.lane.b32.xlu0 %v4161_v30, %s4631_s19  ;;  %v4363_v30 = vld [vmem:[%s5804_s6 + $0x138] sm:$0xff] }
0x2e2f   : > { %3092 = vrot.lane.b32.xlu0 %v4165_v35, %s4631_s19 }
0x2e76   : > { %v2951_v50 = vpop.xlane.xlu2 %2950 }
0x2e7e   : > { %v2954_v49 = vpop.xlane.xlu0 %2953 }
0x2e7f   : > { %4572 = vrcp.f32 %v2954_v49 }
0x2e80   : > { %4574 = vrcp.f32 %v2951_v50 }
0x2e85   : > { %v4573_v51 = vpop.eup %4572 }
0x2e86   : > { %v4575_v52 = vpop.eup %4574  ;;  %v2958_v53 = vmul.f32 %v4573_v51, %v4571_v47 }
0x2e87   : > { %v2957_v57 = vmul.f32 %v4575_v52, %v4569_v44 }
0x2e89   : > { %v2959_v59 = vpack.c.bf16 %v2958_v53, %v2957_v57 }
0x2e91   : > { %v2962_v56 = vpop.permute.xlu0 %2961 }
0x2e92   : > { %2974 = vmatpush.bf16.msra.mxu1 %v2962_v56 }
0x2e95   : > { %4148 = vmatmul.msk.bf16.vlgmr.msra.gmra.mxu1 %vm824_vm10, %v2959_v59 }
0x2e99   : > { %v3091_v45 = vpop.permute.xlu0 %3090 }
0x2ea1   : > { %v3093_v60 = vpop.permute.xlu0 %3092 }
0x2ea2   : > { %v3098_v63 = vsel %vm1324_vm14, %v3091_v45, %v3093_v60  ;;  %v4370_v60 = vld [vmem:[%s5803_s5 + $0x34] sm:$0xf] }
0x2f12   : > { %v2976_v2 = vpop.f32.mrf.mxu1 }
0x2f1a   : > { %v2978_v11 = vpop.f32.mrf.mxu1 }
0x2f1b   : > { %v2985_v3 = vpack.c.bf16 %v2978_v11, %v2976_v2  ;;  %v3064_v2 = vperm.slane %v5518_v26, 3 }
0x2f1d   : > { %4157 = vmatmul.msk.bf16.vlgmr.msra.gmra.mxu3 %vm559_vm2, %v2985_v3 }
0x2fa0   : > { %v3010_v4 = vpop.f32.mrf.mxu3 }
0x2fa1   : > { %v3015_v5 = vadd.f32 %v3010_v4, %v2869_v22 }
0x2fa3   : > { %v3017_v54 = vsel %vm559_vm2, %v3015_v5, 0.0 }
0x2fa4   : > { %3018 = vadd.xlane.f32.xlu1 %v3017_v54 }
0x2fa8   : > { %v3012_v6 = vpop.f32.mrf.mxu3 }
0x2fa9   : > { %v3016_v17 = vadd.f32 %v3012_v6, %v2870_v18 }
0x2fab   : > { %v3020_v23 = vsel %vm559_vm2, %v3016_v17, 0.0 }
0x2fac   : > { %3021 = vadd.xlane.f32.xlu2 %v3020_v23  ;;  %v4366_v23 = vld [vmem:[%s5804_s6 + $0x150] sm:$0xff] }
0x3017   : > { %v3019_v25 = vpop.xlane.xlu1 %3018 }
0x3018   : > { %v3023_v16 = vmul.f32 %v3019_v25, %v4777_v8  ;;  %v4362_v25 = vld [vmem:[%s5804_s6 + $0x130] sm:$0xff] }
0x301a   : > { %v3025_v38 = vsub.f32 %v3015_v5, %v3023_v16  ;;  %v4360_v16 = vld [vmem:[%s5804_s6 + $0x120] sm:$0xff] }
0x301c   : > { %v3027_v13 = vmul.f32 %v3025_v38, %v3025_v38 }
0x301e   : > { %v3029_v14 = vsel %vm559_vm2, %v3027_v13, 0.0 }
0x301f   : > { %3030 = vadd.xlane.f32.xlu1 %v3029_v14  ;;  %v3022_v15 = vpop.xlane.xlu2 %3021 }
0x3020   : > { %v3024_v22 = vmul.f32 %v3022_v15, %v4777_v8 }
0x3022   : > { %v3026_v18 = vsub.f32 %v3016_v17, %v3024_v22  ;;  %v4367_v17 = vld [vmem:[%s5804_s6 + $0x158] sm:$0xff] }
0x3023   : > { %3204 = vmatpush.bf16.msrb.mxu0 %v4367_v17 }
0x3024   : > { %v3028_v19 = vmul.f32 %v3026_v18, %v3026_v18 }
0x3026   : > { %v3032_v20 = vsel %vm559_vm2, %v3028_v19, 0.0 }
0x3027   : > { %3033 = vadd.xlane.f32.xlu2 %v3032_v20  ;;  %3205 = vmatpush.bf16.msrb.mxu0 %v4366_v23 }
0x302b   : > { %3206 = vmatpush.bf16.msrb.mxu0 %v4365_v58  ;;  %v4429_v58 = vld [vmem:[%s5805_s7 + $0x59] ss:$0 sm:$0xff] }
0x302f   : > { %3207 = vmatpush.bf16.msrb.mxu0 %v4364_v9 }
0x3033   : > { %3208 = vmatpush.bf16.msrb.mxu0 %v4363_v30 }
0x3037   : > { %3209 = vmatpush.bf16.msrb.mxu0 %v4362_v25 }
0x3038   : > { %3094 = vrot.lane.b32.xlu1 %v4169_v28, %s4631_s19 }
0x303b   : > { %3210 = vmatpush.bf16.msrb.mxu0 %v4361_v12 }
0x303f   : > { %3096 = vrot.lane.b32.xlu2 %v4173_v31, %s4631_s19  ;;  %3211 = vmatpush.bf16.msrb.mxu0 %v4360_v16 }
0x3092   : > { %v3031_v32 = vpop.xlane.xlu1 %3030 }
0x3093   : > { %v3035_v55 = vmul.f32 %v3031_v32, %v4777_v8 }
0x3095   : > { %v3037_v36 = vadd.f32 1e-05, %v3035_v55 }
0x3097   : > { %4576 = vrsqrt.f32 %v3037_v36  ;;  %vm3045_vm8 = vweird.f32 %v3037_v36 }
0x309a   : > { %v3034_v37 = vpop.xlane.xlu2 %3033 }
0x309b   : > { %v3036_v40 = vmul.f32 %v3034_v37, %v4777_v8 }
0x309d   : > { %v4577_v10 = vpop.eup %4576  ;;  %v3038_v41 = vadd.f32 1e-05, %v3036_v40 }
0x309e   : > { %v3040_v42 = vmul.f32 %v4577_v10, %v3037_v36  ;;  %vm3046_vm7 = vweird.f32 %v4577_v10 }
0x309f   : > { %4578 = vrsqrt.f32 %v3038_v41  ;;  %vm3047_vm9 = vmor %vm3045_vm8, %vm3046_vm7  ;;  %vm3055_vm12 = vweird.f32 %v3038_v41 }
0x30a0   : > { %v3041_v43 = vmul.f32 %v4577_v10, %v3040_v42 }
0x30a2   : > { %v3042_v44 = vmul.f32 0.5, %v3041_v43  ;;  %v3097_v51 = vpop.permute.xlu2 %3096  ;;  %v5620_v43 = vld [vmem:[%s5805_s7 + $0x55] ss:$0 sm:$0xff] }
0x30a4   : > { %v3043_v46 = vsub.f32 1.5, %v3042_v44 }
0x30a5   : > { %v4579_v47 = vpop.eup %4578 }
0x30a6   : > { %v3044_v48 = vmul.f32 %v4577_v10, %v3043_v46  ;;  %v3050_v49 = vmul.f32 %v4579_v47, %v3038_v41  ;;  %vm3056_vm11 = vweird.f32 %v4579_v47 }
0x30a7   : > { %vm3057_vm13 = vmor %vm3055_vm12, %vm3056_vm11 }
0x30a8   : > { %v3051_v50 = vmul.f32 %v4579_v47, %v3050_v49  ;;  %v3048_v52 = vsel %vm3047_vm9, %v4577_v10, %v3044_v48  ;;  %v4226_v48 = vld [vmem:[%s5803_s5 + $0xa0] sm:$0xf]  ;;  %v4373_v49 = vld [vmem:[%s5803_s5 + $0xd4] sm:$0xf0] }
0x30a9   : > { %v3059_v62 = vmul.f32 %v3048_v52, %v3025_v38  ;;  %v4228_v52 = vld [vmem:[%s5803_s5 + $0xd8] sm:$0xf0] }
0x30aa   : > { %v3052_v53 = vmul.f32 0.5, %v3051_v50  ;;  %v3095_v57 = vpop.permute.xlu1 %3094  ;;  %v4227_v50 = vor.u32 %v4373_v49, %v4226_v48 }
0x30ab   : > { %v3099_v56 = vsel %vm1324_vm14, %v3095_v57, %v3097_v51  ;;  %v3062_v11 = vmul.f32 %v3061_v61, %v3059_v62  ;;  %v4372_v51 = vld [vmem:[%s5803_s5 + $0xa4] sm:$0xf]  ;;  %v4218_v57 = vld [vmem:[%s5803_s5 + $0x30] sm:$0xf] }
0x30ac   : > { %v3053_v59 = vsub.f32 1.5, %v3052_v53  ;;  %3111 = vmatpush.bf16.msrb.mxu2 %v3099_v56  ;;  %3339 = vrot.lane.b32.xlu1 %v4227_v50, %s4635_s11  ;;  %v4231_v53 = vor.u32 %v4372_v51, %v4228_v52  ;;  %v4371_v56 = vld [vmem:[%s5803_s5 + $0x64] sm:$0xf0] }
0x30ad   : > { %v3065_v5 = vadd.f32 %v3064_v2, %v3062_v11 }
0x30ae   : > { %v3054_v0 = vmul.f32 %v4579_v47, %v3053_v59  ;;  %v4219_v59 = vor.u32 %v4371_v56, %v4218_v57 }
0x30b0   : > { %v3058_v1 = vsel %vm3057_vm13, %v4579_v47, %v3054_v0  ;;  %3112 = vmatpush.bf16.msrb.mxu2 %v3098_v63 }
0x30b1   : > { %v3060_v3 = vmul.f32 %v3058_v1, %v3026_v18 }
0x30b3   : > { %v3063_v4 = vmul.f32 %v3061_v61, %v3060_v3  ;;  %v4220_v61 = vld [vmem:[%s5803_s5 + $0x68] sm:$0xf0] }
0x30b4   : > { %3341 = vrot.lane.b32.xlu1 %v4231_v53, %s4635_s11  ;;  %v4223_v62 = vor.u32 %v4370_v60, %v4220_v61 }
0x30b5   : > { %v5586_v54 = vadd.f32 %v3064_v2, %v3063_v4 }
0x30b7   : > { %v3071_v6 = vpack.c.bf16 %v5586_v54, %v3065_v5 }
0x30b9   : > { %4174 = vmatmul.msk.bf16.vlgmr.msrb.gmra.mxu2 %vm559_vm2, %v3071_v6 }
0x30bc   : > { %3335 = vrot.lane.b32.xlu1 %v4219_v59, %s4635_s11 }
0x30c4   : > { %3337 = vrot.lane.b32.xlu1 %v4223_v62, %s4635_s11 }
0x30cc   : > { %3385 = vrot.lane.b32.xlu1 %v4429_v58, %s4636_s30 }
0x311e   : > { %v3340_v3 = vpop.permute.xlu1 %3339 }
0x3126   : > { %v3342_v4 = vpop.permute.xlu1 %3341 }
0x3127   : > { %3372 = vmatpush.bf16.msra.mxu2 %v3342_v4 }
0x312e   : > { %v3336_v6 = vpop.permute.xlu1 %3335 }
0x3136   : > { %v3338_v17 = vpop.permute.xlu1 %3337 }
0x3137   : > { %v3344_v23 = vsel %vm469_vm1, %v3336_v6, %v3338_v17  ;;  %3373 = vmatpush.bf16.msra.mxu2 %v3338_v17 }
0x313c   : > { %v3114_v35 = vpop.f32.mrf.mxu2 }
0x313d   : > { %v3115_v38 = vadd.f32 %v4427_v33, %v3114_v35 }
0x313f   : > { %v3119_v13 = vmul.f32 %v3115_v38, %v3115_v38 }
0x3141   : > { %v3121_v14 = vmul.f32 %v3119_v13, %v3115_v38 }
0x3143   : > { %v3123_v15 = vmul.f32 0.044715, %v3121_v14  ;;  %v3264_v14 = vperm.slane %v5518_v26, 4 }
0x3144   : > { %v3116_v22 = vpop.f32.mrf.mxu2 }
0x3145   : > { %v3125_v18 = vadd.f32 %v3123_v15, %v3115_v38  ;;  %v3117_v19 = vadd.f32 %v4427_v33, %v3116_v22  ;;  %v3267_v22 = vperm.slane %v5518_v26, 5  ;;  %v4433_v26 = vld [vmem:[%s5805_s7 + $0x57] ss:$0 sm:$0xff] }
0x3147   : > { %v3127_v20 = vmul.f32 0.7978846, %v3125_v18  ;;  %v3120_v21 = vmul.f32 %v3117_v19, %v3117_v19 }
0x3149   : > { %v3122_v24 = vmul.f32 %v3120_v21, %v3117_v19  ;;  %4580 = vtanh.f32 %v3127_v20 }
0x314b   : > { %v3124_v28 = vmul.f32 0.044715, %v3122_v24  ;;  %v3386_v24 = vpop.permute.xlu1 %3385 }
0x314d   : > { %v3126_v7 = vadd.f32 %v3124_v28, %v3117_v19 }
0x314f   : > { %v3128_v29 = vmul.f32 0.7978846, %v3126_v7  ;;  %v4581_v31 = vpop.eup %4580 }
0x3150   : > { %v3131_v32 = vadd.f32 1.0, %v4581_v31 }
0x3151   : > { %4582 = vtanh.f32 %v3128_v29 }
0x3152   : > { %v3133_v36 = vmul.f32 0.5, %v3131_v32 }
0x3154   : > { %v3135_v10 = vmul.f32 %v3133_v36, %v3115_v38 }
0x3157   : > { %v4583_v55 = vpop.eup %4582 }
0x3158   : > { %v3132_v37 = vadd.f32 1.0, %v4583_v55 }
0x315a   : > { %v3134_v40 = vmul.f32 0.5, %v3132_v37 }
0x315c   : > { %v3136_v41 = vmul.f32 %v3134_v40, %v3117_v19 }
0x315e   : > { %v3153_v42 = vpack.c.bf16 %v3136_v41, %v3135_v10 }
0x3160   : > { %3212 = vmatmul.bf16.vlgmr.msrb.gmra.mxu0 %v3153_v42 }
0x31dd   : > { %v3213_v44 = vpop.f32.mrf.mxu0 }
0x31de   : > { %v3214_v45 = vadd.f32 %v5620_v43, %v3213_v44 }
0x31e0   : > { %v3218_v46 = vadd.f32 %v3214_v45, %v3065_v5  ;;  %v3345_v5 = vsel %vm469_vm1, %v3340_v3, %v3342_v4  ;;  %v4379_v3 = vld [vmem:[%s5804_s6 + $0x48] sm:$0xff]  ;;  %v4374_v4 = vld [vmem:[%s5804_s6 + $0x20] sm:$0xff] }
0x31e1   : > { %3359 = vmatpush.bf16.msrb.mxu3 %v3345_v5  ;;  %v4378_v5 = vld [vmem:[%s5804_s6 + $0x40] sm:$0xff] }
0x31e2   : > { %v3220_v47 = vsel %vm559_vm2, %v3218_v46, 0.0 }
0x31e3   : > { %3221 = vadd.xlane.f32.xlu0 %v3220_v47 }
0x31e5   : > { %3360 = vmatpush.bf16.msrb.mxu3 %v3344_v23  ;;  %v3215_v61 = vpop.f32.mrf.mxu0 }
0x31e6   : > { %v3216_v62 = vadd.f32 %v5620_v43, %v3215_v61  ;;  %v4375_v43 = vld [vmem:[%s5804_s6 + $0x28] sm:$0xff] }
0x3256   : > { %v3222_v0 = vpop.xlane.xlu0 %3221 }
0x3257   : > { %v3226_v63 = vmul.f32 %v3222_v0, %v4777_v8  ;;  %v3219_v0 = vadd.f32 %v3216_v62, %v5586_v54  ;;  %v4380_v54 = vld [vmem:[%s5804_s6 + $0x50] sm:$0xff] }
0x3259   : > { %v3228_v1 = vsub.f32 %v3218_v46, %v3226_v63  ;;  %v3223_v63 = vsel %vm559_vm2, %v3219_v0, 0.0 }
0x325b   : > { %v3230_v2 = vmul.f32 %v3228_v1, %v3228_v1 }
0x325d   : > { %v3232_v11 = vsel %vm559_vm2, %v3230_v2, 0.0  ;;  %v4381_v2 = vld [vmem:[%s5804_s6 + $0x58] sm:$0xff] }
0x325e   : > { %3233 = vadd.xlane.f32.xlu2 %v3232_v11  ;;  %3583 = vmatpush.bf16.msrb.mxu2 %v4381_v2  ;;  %v4376_v11 = vld [vmem:[%s5804_s6 + $0x30] sm:$0xff] }
0x3262   : > { %3584 = vmatpush.bf16.msrb.mxu2 %v4380_v54 }
0x3266   : > { %3585 = vmatpush.bf16.msrb.mxu2 %v4379_v3 }
0x326a   : > { %3586 = vmatpush.bf16.msrb.mxu2 %v4378_v5 }
0x32d1   : > { %v3234_v9 = vpop.xlane.xlu2 %3233 }
0x32d2   : > { %v3238_v30 = vmul.f32 %v3234_v9, %v4777_v8  ;;  %v4213_v9 = vld [vmem:[%s5803_s5 + $0xa0] sm:$0xf] }
0x32d4   : > { %v3240_v25 = vadd.f32 1e-05, %v3238_v30  ;;  %v4369_v30 = vld [vmem:[%s5803_s5 + $0xd4] sm:$0xf0] }
0x32d6   : > { %4584 = vrsqrt.f32 %v3240_v25  ;;  %vm3248_vm14 = vweird.f32 %v3240_v25 }
0x32dc   : > { %v4585_v12 = vpop.eup %4584 }
0x32dd   : > { %v3243_v33 = vmul.f32 %v4585_v12, %v3240_v25  ;;  %vm3249_vm1 = vweird.f32 %v4585_v12  ;;  %v4214_v25 = vor.u32 %v4369_v30, %v4213_v9 }
0x32de   : > { %vm3250_vm3 = vmor %vm3248_vm14, %vm3249_vm1 }
0x32df   : > { %v3244_v16 = vmul.f32 %v4585_v12, %v3243_v33  ;;  %v4368_v33 = vld [vmem:[%s5803_s5 + $0x64] sm:$0xf0] }
0x32e1   : > { %v3245_v35 = vmul.f32 0.5, %v3244_v16 }
0x32e3   : > { %v3246_v38 = vsub.f32 1.5, %v3245_v35 }
0x32e5   : > { %v3247_v13 = vmul.f32 %v4585_v12, %v3246_v38 }
0x32e7   : > { %v3251_v15 = vsel %vm3250_vm3, %v4585_v12, %v3247_v13  ;;  %v4209_v12 = vld [vmem:[%s5803_s5 + $0x30] sm:$0xf] }
0x32e8   : > { %v3262_v18 = vmul.f32 %v3251_v15, %v3228_v1  ;;  %v4377_v1 = vld [vmem:[%s5804_s6 + $0x38] sm:$0xff]  ;;  %v4210_v16 = vor.u32 %v4368_v33, %v4209_v12 }
0x32e9   : > { %3481 = vmatpush.bf16.msra.mxu3 %v4377_v1 }
0x32ea   : > { %v3265_v19 = vmul.f32 %v3264_v14, %v3262_v18 }
0x32ec   : > { %v3268_v20 = vadd.f32 %v3267_v22, %v3265_v19  ;;  %v4431_v19 = vld [vmem:[%s5805_s7 + $0x5a] ss:$0 sm:$0xff] }
0x32ed   : > { %3482 = vmatpush.bf16.msra.mxu3 %v4376_v11 }
0x32ee   : > { %v3318_v21 = vpack.c.bf16 %v3268_v20, %v3268_v20  ;;  %v4432_v20 = vld [vmem:[%s5805_s7 + $0x5d] ss:$0 sm:$0xff] }
0x32f0   : > { %4232 = vmatmul.msk.bf16.vlgmr.msrb.gmra.mxu3 %vm559_vm2, %v3318_v21  ;;  %4233 = vmatmul.msk.bf16.vlgmr.msra.gmra.mxu2 %vm559_vm2, %v3318_v21 }
0x32f1   : > { %3483 = vmatpush.bf16.msra.mxu3 %v4375_v43 }
0x32f5   : > { %3484 = vmatpush.bf16.msra.mxu3 %v4374_v4 }
0x3373   : > { %v5665_v28 = vpop.f32.mrf.mxu3  ;;  %v3375_v7 = vpop.f32.mrf.mxu2 }
0x3374   : > { %v3388_v29 = vadd.f32 %v3386_v24, %v5665_v28  ;;  %v3389_v31 = vadd.f32 %v3386_v24, %v3375_v7 }
0x3376   : > { %v3390_v32 = vmul.f32 %v3388_v29, %v3388_v29  ;;  %v3391_v55 = vmul.f32 %v3389_v31, %v3389_v31 }
0x3378   : > { %v3392_v36 = vmul.f32 %v3390_v32, %v3388_v29  ;;  %v3393_v37 = vmul.f32 %v3391_v55, %v3389_v31 }
0x337a   : > { %v3394_v40 = vmul.f32 0.044715, %v3392_v36  ;;  %v3395_v10 = vmul.f32 0.044715, %v3393_v37 }
0x337b   : > { %v3364_v41 = vpop.f32.mrf.mxu3  ;;  %v3377_v42 = vpop.f32.mrf.mxu2 }
0x337c   : > { %v3396_v44 = vadd.f32 %v3394_v40, %v3388_v29  ;;  %v3397_v45 = vadd.f32 %v3395_v10, %v3389_v31 }
0x337e   : > { %v3398_v46 = vmul.f32 0.7978846, %v3396_v44  ;;  %v3399_v47 = vmul.f32 0.7978846, %v3397_v45 }
0x3380   : > { %4586 = vtanh.f32 %v3398_v46 }
0x3381   : > { %4588 = vtanh.f32 %v3399_v47 }
0x3386   : > { %v4587_v48 = vpop.eup %4586 }
0x3387   : > { %v4589_v49 = vpop.eup %4588  ;;  %v3402_v50 = vadd.f32 1.0, %v4587_v48 }
0x3388   : > { %v3403_v51 = vadd.f32 1.0, %v4589_v49 }
0x3389   : > { %v3404_v52 = vmul.f32 0.5, %v3402_v50 }
0x338a   : > { %v3405_v53 = vmul.f32 0.5, %v3403_v51 }
0x338b   : > { %v3406_v57 = vmul.f32 %v3404_v52, %v3388_v29 }
0x338c   : > { %v3407_v56 = vmul.f32 %v3405_v53, %v3389_v31 }
0x338d   : > { %v3444_v59 = vpack.c.bf16 %v3406_v57, %v3406_v57 }
0x338e   : > { %v3542_v60 = vpack.c.bf16 %v3407_v56, %v3407_v56 }
0x338f   : > { %3546 = vrot.lane.b32.xlu1 %v3444_v59, %s4636_s30  ;;  %3448 = vrot.lane.b32.xlu0 %v3444_v59, %s4631_s19 }
0x3390   : > { %3548 = vrot.lane.b32.xlu2 %v3542_v60, %s4636_s30 }
0x3398   : > { %3287 = vrot.lane.b32.xlu2 %v4214_v25, %s4631_s19 }
0x33a0   : > { %3285 = vrot.lane.b32.xlu2 %v4210_v16, %s4631_s19  ;;  %s304_s19 = scalar_lea.vmem %s5806_s8, %s4276_s17 }
0x33b9   : > { %3224 = vadd.xlane.f32.xlu1 %v3223_v63 }
0x33ea   : > { %v3549_v6 = vpop.permute.xlu2 %3548 }
0x33f2   : > { %v3288_v37 = vpop.permute.xlu2 %3287 }
0x33f3   : > { %3300 = vmatpush.bf16.msrb.mxu1 %v3288_v37  ;;  %v4437_v37 = vld [vmem:[%s5805_s7 + $0x5f] ss:$0 sm:$0xff] }
0x33fa   : > { %v3286_v40 = vpop.permute.xlu2 %3285 }
0x33fb   : > { %3301 = vmatpush.bf16.msrb.mxu1 %v3286_v40 }
0x3401   : > { %v3547_v17 = vpop.permute.xlu1 %3546  ;;  %v3449_v23 = vpop.permute.xlu0 %3448 }
0x3402   : > { %v3551_v58 = vsel %vm559_vm2, %v3547_v17, %v3549_v6  ;;  %4251 = vmatmul.msk.bf16.vlgmr.msra.gmra.mxu3 %vm410_vm0, %v3449_v23 }
0x3403   : > { %4268 = vmatmul.msk.bf16.vlgmr.msrb.gmra.mxu2 %vm410_vm0, %v3551_v58 }
0x342c   : > { %v3225_v35 = vpop.xlane.xlu1 %3224 }
0x342d   : > { %v3227_v38 = vmul.f32 %v3225_v35, %v4777_v8 }
0x342f   : > { %v3229_v13 = vsub.f32 %v3219_v0, %v3227_v38 }
0x3431   : > { %v3231_v15 = vmul.f32 %v3229_v13, %v3229_v13 }
0x3433   : > { %v3235_v18 = vsel %vm559_vm2, %v3231_v15, 0.0 }
0x3434   : > { %3236 = vadd.xlane.f32.xlu0 %v3235_v18 }
0x3485   : > { %v3486_v21 = vpop.f32.mrf.mxu3 }
0x3486   : > { %v3487_v24 = vadd.f32 %v4431_v19, %v3486_v21  ;;  %v3588_v7 = vpop.f32.mrf.mxu2  ;;  %v4436_v21 = vld [vmem:[%s5805_s7 + $0x5e] ss:$0 sm:$0xff] }
0x3487   : > { %v3589_v29 = vadd.f32 %v4432_v20, %v3588_v7  ;;  %v4435_v20 = vld [vmem:[%s5805_s7 + $0x5c] ss:$0 sm:$0xff] }
0x3488   : > { %v3492_v31 = vsel %vm559_vm2, %v3487_v24, 0.0 }
0x3489   : > { %3493 = vadd.xlane.f32.xlu2 %v3492_v31  ;;  %v3594_v32 = vsel %vm559_vm2, %v3589_v29, 0.0 }
0x348a   : > { %3595 = vadd.xlane.f32.xlu1 %v3594_v32 }
0x348d   : > { %v3488_v55 = vpop.f32.mrf.mxu3 }
0x348e   : > { %v3590_v36 = vpop.f32.mrf.mxu2 }
0x34a7   : > { %v3237_v10 = vpop.xlane.xlu0 %3236 }
0x34a8   : > { %v3239_v41 = vmul.f32 %v3237_v10, %v4777_v8 }
0x34aa   : > { %v3241_v42 = vadd.f32 1e-05, %v3239_v41 }
0x34ac   : > { %4590 = vrsqrt.f32 %v3241_v42  ;;  %vm3258_vm5 = vweird.f32 %v3241_v42 }
0x34b2   : > { %v4591_v44 = vpop.eup %4590 }
0x34b3   : > { %v3253_v45 = vmul.f32 %v4591_v44, %v3241_v42  ;;  %vm3259_vm0 = vweird.f32 %v4591_v44 }
0x34b4   : > { %vm3260_vm6 = vmor %vm3258_vm5, %vm3259_vm0 }
0x34b5   : > { %v3254_v46 = vmul.f32 %v4591_v44, %v3253_v45  ;;  %v4600_v45 = vld [vmem:[%s4870_s12] sm:$0xff]  ;;  %s4639_s12 = smov 24  }
0x34b7   : > { %v3255_v47 = vmul.f32 0.5, %v3254_v46  ;;  %v3636_v46 = vsel %vm804_vm15, %v4600_v45, 0.0 }
0x34b9   : > { %v3256_v48 = vsub.f32 1.5, %v3255_v47  ;;  %v4430_v47 = vld [vmem:[%s5805_s7 + $0x56] ss:$0 sm:$0xff] }
0x34bb   : > { %v3257_v49 = vmul.f32 %v4591_v44, %v3256_v48 }
0x34bd   : > { %v3261_v50 = vsel %vm3260_vm6, %v4591_v44, %v3257_v49 }
0x34be   : > { %v3263_v51 = vmul.f32 %v3261_v50, %v3229_v13  ;;  %v4434_v13 = vld [vmem:[%s5805_s7 + $0x5b] ss:$0 sm:$0xff]  ;;  %v3381_v50 = vadd.f32 %v4430_v47, %v5665_v28 }
0x34c0   : > { %v3266_v52 = vmul.f32 %v3264_v14, %v3263_v51  ;;  %v3408_v51 = vld [vmem:[%s5805_s7 + $0x58] sm:$0x1] }
0x34c2   : > { %v3269_v53 = vadd.f32 %v3267_v22, %v3266_v52  ;;  %v3409_v52 = vpack.c.bf16 %v3408_v51, %v3381_v50 }
0x34c4   : > { %v3274_v57 = vpack.c.bf16 %v3269_v53, %v3269_v53 }
0x34c6   : > { %4215 = vmatmul.msk.bf16.vlgmr.msrb.gmra.mxu1 %vm559_vm2, %v3274_v57 }
0x34fc   : > { %v3494_v56 = vpop.xlane.xlu2 %3493 }
0x34fd   : > { %v3495_v59 = vmul.f32 %v3494_v56, %v4777_v8  ;;  %v3596_v60 = vpop.xlane.xlu1 %3595 }
0x34fe   : > { %v3597_v61 = vmul.f32 %v3596_v60, %v4777_v8 }
0x34ff   : > { %v3496_v62 = vsub.f32 %v3487_v24, %v3495_v59 }
0x3500   : > { %v3598_v0 = vsub.f32 %v3589_v29, %v3597_v61 }
0x3501   : > { %v3497_v63 = vmul.f32 %v3496_v62, %v3496_v62 }
0x3502   : > { %v3599_v1 = vmul.f32 %v3598_v0, %v3598_v0 }
0x3503   : > { %v3498_v2 = vsel %vm559_vm2, %v3497_v63, 0.0 }
0x3504   : > { %3499 = vadd.xlane.f32.xlu1 %v3498_v2  ;;  %v3600_v14 = vsel %vm559_vm2, %v3599_v1, 0.0 }
0x3505   : > { %3601 = vadd.xlane.f32.xlu0 %v3600_v14 }
0x351d   : > { %3310 = vrot.lane.b32.xlu1 %v4433_v26, %s4637_s21 }
0x3543   : > { %v5739_v22 = vpop.f32.mrf.mxu1 }
0x354b   : > { %v3305_v11 = vpop.f32.mrf.mxu1 }
0x3577   : > { %v3500_v54 = vpop.xlane.xlu1 %3499 }
0x3578   : > { %v3501_v43 = vmul.f32 %v3500_v54, %v4777_v8  ;;  %v3602_v3 = vpop.xlane.xlu0 %3601 }
0x3579   : > { %v3603_v4 = vmul.f32 %v3602_v3, %v4777_v8 }
0x357a   : > { %v3502_v5 = vadd.f32 1e-05, %v3501_v43 }
0x357b   : > { %v3604_v6 = vadd.f32 1e-05, %v3603_v4 }
0x357c   : > { %4592 = vrsqrt.f32 %v3502_v5  ;;  %vm3509_vm9 = vweird.f32 %v3502_v5 }
0x357d   : > { %4594 = vrsqrt.f32 %v3604_v6  ;;  %vm3611_vm12 = vweird.f32 %v3604_v6 }
0x3582   : > { %v4593_v17 = vpop.eup %4592 }
0x3583   : > { %v4595_v23 = vpop.eup %4594  ;;  %v3504_v58 = vmul.f32 %v4593_v17, %v3502_v5  ;;  %vm3510_vm7 = vweird.f32 %v4593_v17 }
0x3584   : > { %v3606_v9 = vmul.f32 %v4595_v23, %v3604_v6  ;;  %vm3612_vm8 = vweird.f32 %v4595_v23  ;;  %vm3511_vm11 = vmor %vm3509_vm9, %vm3510_vm7  ;;  %vm3642_vm7 = vcmp.ne.s32.totalorder %v4961_v27, %v4880_v34 }
0x3585   : > { %v3505_v30 = vmul.f32 %v4593_v17, %v3504_v58  ;;  %vm3613_vm13 = vmor %vm3611_vm12, %vm3612_vm8  ;;  %vm3714_vm8 = vcmask 326656  }
0x3586   : > { %v3607_v25 = vmul.f32 %v4595_v23, %v3606_v9 }
0x3587   : > { %v3506_v12 = vmul.f32 0.5, %v3505_v30 }
0x3588   : > { %v3608_v33 = vmul.f32 0.5, %v3607_v25 }
0x3589   : > { %v3507_v16 = vsub.f32 1.5, %v3506_v12 }
0x358a   : > { %v3609_v35 = vsub.f32 1.5, %v3608_v33 }
0x358b   : > { %v3508_v38 = vmul.f32 %v4593_v17, %v3507_v16 }
0x358c   : > { %v3610_v8 = vmul.f32 %v4595_v23, %v3609_v35 }
0x358d   : > { %v3512_v15 = vsel %vm3511_vm11, %v4593_v17, %v3508_v38 }
0x358e   : > { %v3614_v18 = vsel %vm3613_vm13, %v4595_v23, %v3610_v8  ;;  %v3513_v19 = vmul.f32 %v3512_v15, %v3496_v62 }
0x358f   : > { %v3311_v24 = vpop.permute.xlu1 %3310  ;;  %v3615_v7 = vmul.f32 %v3614_v18, %v3598_v0 }
0x3590   : > { %v3313_v29 = vadd.f32 %v3311_v24, %v5739_v22  ;;  %v3515_v31 = vmul.f32 %v4434_v13, %v3513_v19  ;;  %v4270_v13 = vsel %vm3642_vm7, 1.0, %v4628_v39 }
0x3591   : > { %v3617_v36 = vmul.f32 %v4436_v21, %v3615_v7 }
0x3592   : > { %v3410_v32 = vpack.c.bf16 %v3313_v29, %v3313_v29  ;;  %v3517_v55 = vadd.f32 %v4435_v20, %v3515_v31 }
0x3593   : > { %v3619_v41 = vadd.f32 %v4437_v37, %v3617_v36 }
0x3594   : > { %3412 = vrot.lane.b32.xlu2 %v3410_v32, %s4638_s10  ;;  %v3518_v40 = vmul.f32 %v3517_v55, %v3517_v55 }
0x3595   : > { %v3620_v42 = vmul.f32 %v3619_v41, %v3619_v41 }
0x3596   : > { %v3519_v10 = vsel %vm559_vm2, %v3518_v40, 0.0 }
0x3597   : > { %3520 = vadd.xlane.f32.xlu0 %v3519_v10  ;;  %v3621_v44 = vsel %vm559_vm2, %v3620_v42, 0.0 }
0x359c   : > { %3696 = vrot.lane.b32.xlu2 %v4628_v39, %s4639_s12 }
0x359f   : > { %3622 = vadd.xlane.f32.xlu0 %v3621_v44 }
0x35a7   : > { %3637 = vadd.xlane.f32.xlu0 %v3636_v46 }
0x35ee   : > { %v3413_v48 = vpop.permute.xlu2 %3412 }
0x35ef   : > { %v3418_v49 = vsel %vm559_vm2, %v3413_v48, 0 }
0x35f0   : > { %3427 = vmatpush.bf16.xpose.msra.mxu1 %v3418_v49 }
0x35f6   : > { %v3697_v29 = vpop.permute.xlu2 %3696 }
0x35f7   : > { %4234 = vmatmul.msk.bf16.vlgmr.msra.gmra.mxu1 %vm559_vm2, %v3409_v52 }
0x360a   : > { %v3521_v53 = vpop.xlane.xlu0 %3520 }
0x360b   : > { %v3522_v57 = vmax.f32 %v3521_v53, 1e-24 }
0x360d   : > { %4596 = vrsqrt.f32 %v3522_v57  ;;  %vm3529_vm14 = vweird.f32 %v3522_v57 }
0x3612   : > { %v3623_v56 = vpop.xlane.xlu0 %3622 }
0x3613   : > { %v4597_v59 = vpop.eup %4596  ;;  %v3624_v60 = vmax.f32 %v3623_v56, 1e-24 }
0x3614   : > { %v3524_v61 = vmul.f32 %v4597_v59, %v3522_v57  ;;  %vm3530_vm15 = vweird.f32 %v4597_v59 }
0x3615   : > { %4598 = vrsqrt.f32 %v3624_v60  ;;  %vm3531_vm3 = vmor %vm3529_vm14, %vm3530_vm15  ;;  %vm3631_vm5 = vweird.f32 %v3624_v60 }
0x3616   : > { %v3525_v28 = vmul.f32 %v4597_v59, %v3524_v61 }
0x3618   : > { %v3526_v62 = vmul.f32 0.5, %v3525_v28 }
0x361a   : > { %v3527_v0 = vsub.f32 1.5, %v3526_v62  ;;  %v3638_v63 = vpop.xlane.xlu0 %3637 }
0x361b   : > { %v4599_v1 = vpop.eup %4598  ;;  %vm3639_vm1 = vcmp.ne.f32.partialorder %v3638_v63, 0.0 }
0x361c   : > { %v3626_v2 = vmul.f32 %v4599_v1, %v3624_v60  ;;  %v3528_v14 = vmul.f32 %v4597_v59, %v3527_v0  ;;  %v4269_v54 = vsel %vm3639_vm1, 1.0, %v4628_v39  ;;  %vm3632_vm0 = vweird.f32 %v4599_v1 }
0x361d   : > { %vm3633_vm6 = vmor %vm3631_vm5, %vm3632_vm0 }
0x361e   : > { %v3627_v26 = vmul.f32 %v4599_v1, %v3626_v2  ;;  %v3532_v11 = vsel %vm3531_vm3, %v4597_v59, %v3528_v14 }
0x361f   : > { %v3533_v43 = vmul.f32 %v3532_v11, %v3517_v55 }
0x3620   : > { %v3628_v3 = vmul.f32 0.5, %v3627_v26 }
0x3621   : > { %v3645_v4 = vmul.f32 %v4269_v54, %v3533_v43 }
0x3622   : > { %v3629_v5 = vsub.f32 1.5, %v3628_v3 }
0x3623   : > { %v3647_v6 = vpack.c.bf16 %v3645_v4, %v3645_v4 }
0x3624   : > { %v3630_v17 = vmul.f32 %v4599_v1, %v3629_v5 }
0x3625   : > { %v3649_v23 = vsel %vm559_vm2, %v3647_v6, 0 }
0x3626   : > { %v3634_v58 = vsel %vm3633_vm6, %v4599_v1, %v3630_v17  ;;  %3658 = vmatpush.bf16.xpose.msra.mxu0 %v3649_v23 }
0x3627   : > { %v3635_v9 = vmul.f32 %v3634_v58, %v3619_v41 }
0x3629   : > { %v3646_v30 = vmul.f32 %v4269_v54, %v3635_v9 }
0x362b   : > { %v3665_v25 = vpack.c.bf16 %v3646_v30, %v3646_v30 }
0x362d   : > { %4271 = vmatmul.msk.bf16.vlgmr.msra.gmra.mxu0 %vm559_vm2, %v3647_v6  ;;  %v3667_v12 = vsel %vm559_vm2, %v3665_v25, 0 }
0x362e   : > { %3676 = vmatpush.bf16.xpose.msrb.mxu1 %v3667_v12 }
0x3635   : > { %4272 = vmatmul.msk.bf16.vlgmr.msrb.gmra.mxu1 %vm559_vm2, %v3665_v25 }
0x3674   : > { %v3429_v33 = vpop.f32.mrf.mxu1 }
0x3675   : > { %v3434_v16 = vmul.f32 10.0, %v3429_v33 }
0x3677   : > { %3686 = vrot.lane.b32.xlu0 %v3434_v16, %s4637_s21 }
0x367c   : > { %v3431_v35 = vpop.f32.mrf.mxu1 }
0x367d   : > { %v3435_v38 = vmul.f32 10.0, %v3431_v35 }
0x367f   : > { %v3683_v8 = vsel %vm784_vm4, %v3435_v38, 0.0  ;;  %3703 = vrot.lane.b32.xlu0 %v4628_v39, %s4636_s30  ;;  %vm3709_vm4 = vcmask 195584  }
0x3680   : > { %3688 = vrot.lane.b32.xlu1 %v3683_v8, %s4637_s21 }
0x36aa   : > { %v3660_v15 = vpop.f32.mrf.mxu0 }
0x36ab   : > { %v3664_v18 = vmul.f32 %v4270_v13, %v3660_v15 }
0x36ad   : > { %3694 = vrot.lane.b32.xlu1 %v3664_v18, %s4639_s12 }
0x36b2   : > { %v3662_v19 = vpop.f32.mrf.mxu0  ;;  %v3678_v20 = vpop.f32.mrf.mxu1 }
0x36b3   : > { %v3682_v21 = vmul.f32 %v4270_v13, %v3678_v20 }
0x36b5   : > { %3701 = vrot.lane.b32.xlu1 %v3682_v21, %s4636_s30 }
0x36ba   : > { %v3680_v24 = vpop.f32.mrf.mxu1 }
0x36e9   : > { %v3687_v7 = vpop.permute.xlu0 %3686 }
0x36ea   : > { %v3707_v37 = vsel %vm824_vm10, %v5739_v22, %v3687_v7 }
0x36f1   : > { %v3704_v32 = vpop.permute.xlu0 %3703 }
0x36f2   : > { %v3689_v31 = vpop.permute.xlu1 %3688 }
0x36f3   : > { %v3708_v34 = vsel %vm824_vm10, 0.0, %v3689_v31 }
0x36f4   : > { %v3711_v39 = vsel %vm3709_vm4, %v3708_v34, %v3697_v29 }
0x36f5   : > { %v3713_v27 = vsel %vm559_vm2, %v3711_v39, %v3704_v32 }
0x36f6   : > { %v3716_v55 = vsel %vm3714_vm8, %v3713_v27, 0.0 }
0x36f7   : > { %3718 = vst [vmem:[%s304_s19 + $0x8] sm:$0xff] %v3716_v55 }
0x371f   : > { %v3695_v36 = vpop.permute.xlu1 %3694 }
0x3720   : > { %v3710_v40 = vsel %vm3709_vm4, %v3707_v37, %v3695_v36 }
0x3727   : > { %v3702_v10 = vpop.permute.xlu1 %3701 }
0x3728   : > { %v3712_v41 = vsel %vm559_vm2, %v3710_v40, %v3702_v10 }
0x3729   : > { %v3715_v42 = vsel %vm3714_vm8, %v3712_v41, 0.0 }
0x372a   : > { %3717 = vst [vmem:[%s304_s19] sm:$0xff] %v3715_v42 }
0x372b PF: > { %s26_s9 = sadd.s32 1, %s4621_s9  }
0x372c   : > { %p23_p4 = scmp.ge.s32.totalorder %s26_s9, 4  }
0x372e   :  { %25 = sbr.rel (!%p23_p4) target bundleno = 7 (0x7), region = 81 }

</bundles_post_ra>
